<compile_context>
chip_gen: v7x
topology: tpu7x:2x2x1
jax: 0.10.0
libtpu: 0.0.40
codegen_flags: <defaults>
</compile_context>

<pallas_src>
import functools

import jax
import jax.numpy as jnp
from jax import lax
from jax.experimental import pallas as pl
from jax.experimental.pallas import tpu as pltpu


# ---------------------------------------------------------------------------
# Generation-aware VMEM budget
# ---------------------------------------------------------------------------

_VMEM_LIMIT = None


def _vmem_limit_bytes():
    """~75% of physical VMEM, capped at 96 MiB (v5e/v6e: 96 MiB, v7x: 48 MiB)."""
    global _VMEM_LIMIT
    if _VMEM_LIMIT is None:
        cap = 128 * 1024 * 1024
        try:
            cap = int(getattr(pltpu.get_tpu_info(), "vmem_capacity_bytes", cap))
        except Exception:
            pass
        _VMEM_LIMIT = int(min(cap * 3 // 4, 96 * 1024 * 1024))
    return _VMEM_LIMIT


# ---------------------------------------------------------------------------
# Kernel 1: fused Graph_Conv_Block
#   GCN 1x1 conv + K-hop graph mix + BN1 + ReLU  ->  padded VMEM scratch
#   temporal conv (block-diag taps) + folded BN2 + residual + ReLU -> HBM
#   One grid step per batch sample; everything stays in VMEM in between.
# ---------------------------------------------------------------------------

def _st_block_body(x, res, wg_ref, bg_ref, wt_ref, sh_ref, o_ref, pad_scr,
                   *, T, pad, kt):
    VC = o_ref.shape[-1]
    # GCN matmul (bf16 operands, f32 accumulation) + folded BN1 + ReLU
    g = jnp.maximum(
        jnp.dot(x, wg_ref[...], preferred_element_type=jnp.float32)
        + bg_ref[...], 0.0)

    # Zero temporal halos every step (scratch is per-core with "parallel"
    # grid semantics, so a program_id==0 guard would be unsafe; 2*pad rows of
    # VPU stores are noise).
    if pad > 0:
        pad_scr[0:pad, :] = jnp.zeros((pad, VC), jnp.float32)
        pad_scr[pad + T:pad + T + pad, :] = jnp.zeros((pad, VC), jnp.float32)
    pad_scr[pad:pad + T, :] = g

    # Epilogue terms first: folded (BN2-scaled) conv bias + BN2 shift + residual
    acc = sh_ref[...] + res
    for dt in range(kt):                               # static, unrolled taps
        tap = pad_scr[dt:dt + T, :].astype(wt_ref.dtype)
        acc = acc + jnp.dot(tap, wt_ref[dt],
                            preferred_element_type=jnp.float32)
    o_ref[0] = jnp.maximum(acc, 0.0).astype(o_ref.dtype)


def _st_block_kernel(x_ref, wg_ref, bg_ref, wt_ref, sh_ref, o_ref, pad_scr,
                     *, T, pad, kt):
    x = x_ref[0]                                       # (T, V*C) bf16
    _st_block_body(x, x.astype(jnp.float32),           # identity residual
                   wg_ref, bg_ref, wt_ref, sh_ref, o_ref, pad_scr,
                   T=T, pad=pad, kt=kt)


def _st_block_res_kernel(x_ref, wg_ref, bg_ref, wr_ref, br_ref,
                         wt_ref, sh_ref, o_ref, pad_scr, *, T, pad, kt):
    x = x_ref[0]                                       # (T, V*Cin) bf16
    res = (jnp.dot(x, wr_ref[...], preferred_element_type=jnp.float32)
           + br_ref[...])                              # BN-folded 1x1 residual
    _st_block_body(x, res, wg_ref, bg_ref, wt_ref, sh_ref, o_ref, pad_scr,
                   T=T, pad=pad, kt=kt)


def graph_conv_block(x3, a_hat, p, *, T, V):
    """One fused Graph_Conv_Block.  x3: (N, T, V*Cin) bf16 channel-last."""
    N, _, VCin = x3.shape
    cout = p['bn1_scale'].shape[0]
    VC = V * cout
    kt = p['tcn_w'].shape[0]
    pad = (kt - 1) // 2
    bf = jnp.bfloat16

    wg, bg = _build_gcn_weight(p, a_hat, V)            # (V*Cin, V*Cout), (V*Cout,)
    wt = _build_tcn_weight(p['tcn_w'], V)              # (kt, V*C, V*C) block-diag
    sh = jnp.tile(p['tcn_shift'], V).reshape(1, VC)

    has_res = 'res_w' in p
    x_spec = pl.BlockSpec((1, T, VCin), lambda n: (n, 0, 0))
    o_spec = pl.BlockSpec((1, T, VC), lambda n: (n, 0, 0))
    wt_spec = pl.BlockSpec((kt, VC, VC), lambda n: (0, 0, 0))

    def bcast2(shp):
        return pl.BlockSpec(shp, lambda n: (0, 0))

    args = [x3, wg.astype(bf), bg.reshape(1, VC)]
    in_specs = [x_spec, bcast2((VCin, VC)), bcast2((1, VC))]
    kern = functools.partial(_st_block_kernel, T=T, pad=pad, kt=kt)
    if has_res:
        wr, br = _build_res_weight(p, V)
        args += [wr.astype(bf), br.reshape(1, VC)]
        in_specs += [bcast2((VCin, VC)), bcast2((1, VC))]
        kern = functools.partial(_st_block_res_kernel, T=T, pad=pad, kt=kt)
    args += [wt.astype(bf), sh]
    in_specs += [wt_spec, bcast2((1, VC))]

    n_mm = 2 if has_res else 1
    flops = 2 * N * T * VCin * VC * n_mm + 2 * N * T * VC * VC * kt
    bytes_acc = (2 * N * T * (VCin + VC)
                 + 2 * (n_mm * VCin * VC + kt * VC * VC) + 4 * 3 * VC)

    return pl.pallas_call(
        kern,
        out_shape=jax.ShapeDtypeStruct((N, T, VC), jnp.bfloat16),
        grid=(N,),
        in_specs=in_specs,
        out_specs=o_spec,
        scratch_shapes=[pltpu.VMEM((T + 2 * pad, VC), jnp.float32)],
        compiler_params=pltpu.CompilerParams(
            dimension_semantics=("parallel",),
            vmem_limit_bytes=_vmem_limit_bytes()),
        cost_estimate=pl.CostEstimate(flops=flops, transcendentals=0,
                                      bytes_accessed=bytes_acc),
    )(*args)


# ---------------------------------------------------------------------------
# Kernel 2: fused 2-layer GRU encoder (only final hidden states are needed)
#   Grid over batch tiles ("parallel"); layers skewed by one step + unrolled.
# ---------------------------------------------------------------------------

def _gru2_kernel(x_ref, wih1_ref, whh1_ref, bih1_ref, bhh1_ref,
                 wih2_ref, whh2_ref, bih2_ref, bhh2_ref,
                 h1_ref, h2_ref, *, T, H):
    Bt = x_ref.shape[1]

    def in_proj(xt, wih_ref, bih_ref):
        return (jnp.dot(xt, wih_ref[...], preferred_element_type=jnp.float32)
                + bih_ref[...])

    def cell(gx, h, whh_ref, bhh_ref):
        gh = (jnp.dot(h.astype(whh_ref.dtype), whh_ref[...],
                      preferred_element_type=jnp.float32) + bhh_ref[...])
        r = jax.nn.sigmoid(gx[:, 0:H] + gh[:, 0:H])
        z = jax.nn.sigmoid(gx[:, H:2 * H] + gh[:, H:2 * H])
        n = jnp.tanh(gx[:, 2 * H:3 * H] + r * gh[:, 2 * H:3 * H])
        return (1.0 - z) * n + z * h

    zeros = jnp.zeros((Bt, H), jnp.float32)
    # Peel layer-1 step 0 so the skewed loop body stays branch-free.
    h1 = cell(in_proj(x_ref[0], wih1_ref, bih1_ref), zeros, whh1_ref, bhh1_ref)
    h2 = zeros

    def step(t, carry):
        h1_prev, h2_prev = carry
        # Layer-1 step t and layer-2 step t-1 are independent -> the unrolled
        # loop lets the scheduler overlap their small MXU passes.
        h1_t = cell(in_proj(x_ref[t], wih1_ref, bih1_ref), h1_prev,
                    whh1_ref, bhh1_ref)
        gx2 = in_proj(h1_prev.astype(wih2_ref.dtype), wih2_ref, bih2_ref)
        h2_t = cell(gx2, h2_prev, whh2_ref, bhh2_ref)
        return h1_t, h2_t

    h1, h2 = lax.fori_loop(1, T, step, (h1, h2), unroll=True)
    # Trailing layer-2 step T-1.
    gx2 = in_proj(h1.astype(wih2_ref.dtype), wih2_ref, bih2_ref)
    h2 = cell(gx2, h2, whh2_ref, bhh2_ref)

    h1_ref[...] = h1
    h2_ref[...] = h2


def _pad_gate_cols(a, gp):
    g = a.shape[-1]
    if g == gp:
        return a
    return jnp.pad(a, [(0, 0)] * (a.ndim - 1) + [(0, gp - g)])


def _pick_batch_tile(B):
    # >=2 tiles so both v7x TensorCores get work; tiles a multiple of 8 rows.
    for bt in (256, 128, 64, 32, 16, 8):
        if B % bt == 0 and B // bt >= 2:
            return bt
    return B


def gru2_encoder(x_tm, layers):
    """x_tm: (T, B, C) time-major input; layers: 2 GRU layers (PyTorch order)."""
    # TODO(synk): only the module default rnn_num_layer=2 is implemented (fused).
    assert len(layers) == 2
    T, B, Cin = x_tm.shape
    H = layers[0]['w_hh'].shape[0]
    G = 3 * H
    Gp = ((G + 127) // 128) * 128            # zero-pad gates to a lane multiple
    Bt = _pick_batch_tile(B)
    bf = jnp.bfloat16

    args = [x_tm.astype(bf)]
    in_specs = [pl.BlockSpec((T, Bt, Cin), lambda i: (0, i, 0))]
    for lyr in layers:
        wih = _pad_gate_cols(lyr['w_ih'], Gp)
        whh = _pad_gate_cols(lyr['w_hh'], Gp)
        bih = _pad_gate_cols(lyr['b_ih'].reshape(1, G), Gp)
        bhh = _pad_gate_cols(lyr['b_hh'].reshape(1, G), Gp)
        args += [wih.astype(bf), whh.astype(bf), bih, bhh]
        in_specs += [pl.BlockSpec((wih.shape[0], Gp), lambda i: (0, 0)),
                     pl.BlockSpec((H, Gp), lambda i: (0, 0)),
                     pl.BlockSpec((1, Gp), lambda i: (0, 0)),
                     pl.BlockSpec((1, Gp), lambda i: (0, 0))]
    out_specs = (pl.BlockSpec((Bt, H), lambda i: (i, 0)),
                 pl.BlockSpec((Bt, H), lambda i: (i, 0)))

    cost = pl.CostEstimate(
        flops=2 * T * B * Gp * (Cin + 3 * H),
        transcendentals=6 * T * B * H,
        bytes_accessed=(2 * T * B * Cin + 4 * 2 * B * H
                        + 2 * (Cin + 3 * H) * Gp + 4 * 4 * Gp))

    h1, h2 = pl.pallas_call(
        functools.partial(_gru2_kernel, T=T, H=H),
        out_shape=(jax.ShapeDtypeStruct((B, H), jnp.float32),
                   jax.ShapeDtypeStruct((B, H), jnp.float32)),
        grid=(B // Bt,),
        in_specs=in_specs,
        out_specs=out_specs,
        compiler_params=pltpu.CompilerParams(
            dimension_semantics=("parallel",),
            vmem_limit_bytes=_vmem_limit_bytes()),
        cost_estimate=cost,
    )(*args)
    return jnp.stack([h1, h2], axis=0)


# ---------------------------------------------------------------------------
# Parameter-sized weight folding (plain JAX; independent of batch/time)
# ---------------------------------------------------------------------------

def _build_gcn_weight(p, a_hat, V):
    """Fold 1x1 GCN conv + K-hop mix (with edge importance) + eval BN1 into one
    (V*Cin, V*Cout) matrix + bias (V, K are small)."""
    cin = p['gcn_w'].shape[0]
    K = a_hat.shape[0]
    cout = p['bn1_scale'].shape[0]
    gw = p['gcn_w'].reshape(cin, K, cout)                # columns are k-major
    wbig = jnp.einsum('ikc,kvw->viwc', gw, a_hat).reshape(V * cin, V * cout)
    bbig = jnp.einsum('kc,kvw->wc', p['gcn_b'].reshape(K, cout),
                      a_hat).reshape(V * cout)
    s1 = jnp.tile(p['bn1_scale'], V)
    sh1 = jnp.tile(p['bn1_shift'], V)
    return wbig * s1[None, :], bbig * s1 + sh1


def _build_res_weight(p, V):
    """Block-diagonal (over nodes) version of the BN-folded residual 1x1 conv."""
    res_w, res_b = p['res_w'], p['res_b']
    cin, cout = res_w.shape
    eye = jnp.eye(V, dtype=res_w.dtype)
    wr = jnp.einsum('vw,ic->viwc', eye, res_w).reshape(V * cin, V * cout)
    return wr, jnp.tile(res_b, V)


def _build_tcn_weight(tcn_w, V):
    """Block-diagonal (over nodes) temporal tap weights: (kt, V*C, V*C)."""
    kt, cin, cout = tcn_w.shape
    eye = jnp.eye(V, dtype=tcn_w.dtype)
    return jnp.einsum('vw,dij->dviwj', eye, tcn_w).reshape(kt, V * cin, V * cout)


# ---------------------------------------------------------------------------
# Module forward (glue = free row-major reshapes + one tiny input transpose)
# ---------------------------------------------------------------------------

def graph_social_encoder_forward(x, adj, params, num_node,
                                 ret_h=False, ret_o=False):
    N, C0, T, V = x.shape
    # Channel-last once; all later layout changes are free row-major reshapes.
    a3 = jnp.transpose(x, (0, 2, 3, 1)).reshape(N, T, V * C0).astype(jnp.bfloat16)
    for p, imp in zip(params['blocks'], params['edge_importance']):
        a3 = graph_conv_block(a3, adj + imp, p, T=T, V=V)
    C = params['blocks'][-1]['bn1_scale'].shape[0]

    # reshape_for_lstm: (N,C,T,V) -> (N*V, T, C); fed time-major to the GRU.
    # TODO(synk): emit the last block's output time-major to drop this transpose.
    x_tm = a3.reshape(N, T, V, C).transpose(1, 0, 2, 3).reshape(T, N * V, C)
    h = gru2_encoder(x_tm, params['gru'])            # (num_layers, N*V, H)

    if ret_o:
        o = h[-1].reshape(-1, num_node, h.shape[-1])  # reshape_from_lstm
        return (o, h) if ret_h else o
    return h


# ---------------------------------------------------------------------------
# Deterministic parameter init (eval-mode BN folded at setup where exact)
# ---------------------------------------------------------------------------

def init_block_params(key, cin, cout, K, kt):
    ks = jax.random.split(key, 6)
    eps = 1e-5
    bn_scale = jnp.full((cout,), 1.0 / jnp.sqrt(1.0 + eps), jnp.float32)
    bn_shift = jnp.zeros((cout,), jnp.float32)
    tcn_w = 0.1 * jax.random.normal(ks[2], (kt, cout, cout), jnp.float32)
    tcn_b = 0.1 * jax.random.normal(ks[3], (cout,), jnp.float32)
    p = {
        'gcn_w': 0.1 * jax.random.normal(ks[0], (cin, K * cout), jnp.float32),
        'gcn_b': 0.1 * jax.random.normal(ks[1], (K * cout,), jnp.float32),
        'bn1_scale': bn_scale, 'bn1_shift': bn_shift,
        # eval-mode BN2 + conv bias folded into the temporal conv (exact)
        'tcn_w': tcn_w * bn_scale[None, None, :],
        'tcn_shift': tcn_b * bn_scale + bn_shift,
    }
    if cin != cout:
        res_w = 0.1 * jax.random.normal(ks[4], (cin, cout), jnp.float32)
        res_b = 0.1 * jax.random.normal(ks[5], (cout,), jnp.float32)
        # eval-mode BN of the residual branch folded into its 1x1 conv (exact)
        p['res_w'] = res_w * bn_scale[None, :]
        p['res_b'] = res_b * bn_scale + bn_shift
    return p


def init_gru_params(key, input_size, hidden, nlayers):
    layers = []
    for l in range(nlayers):
        key, k1, k2, k3, k4 = jax.random.split(key, 5)
        cin = input_size if l == 0 else hidden
        layers.append({
            'w_ih': 0.1 * jax.random.normal(k1, (cin, 3 * hidden), jnp.float32),
            'w_hh': 0.1 * jax.random.normal(k2, (hidden, 3 * hidden), jnp.float32),
            'b_ih': 0.1 * jax.random.normal(k3, (3 * hidden,), jnp.float32),
            'b_hh': 0.1 * jax.random.normal(k4, (3 * hidden,), jnp.float32),
        })
    return layers


# ---------------------------------------------------------------------------
# Demo
# ---------------------------------------------------------------------------

if __name__ == "__main__":
    # GraphSocialEncoder(in_channels=4, max_hop=2, num_node=4,
    #                    edge_importance_weighting=True, graph_hidden_size=32,
    #                    rnn_hidden_size=32, rnn_num_layer=2)
    in_channels, max_hop, num_node = 4, 2, 4
    temporal_kernel_size = 5
    graph_hidden, rnn_hidden, rnn_layers = 32, 32, 2
    N, T = 2, 8
    K = max_hop + 1

    key = jax.random.PRNGKey(0)
    k_x, k_adj, k_p = jax.random.split(key, 3)
    x = jax.random.normal(k_x, (N, in_channels, T, num_node), jnp.float32)
    adj = jax.random.uniform(k_adj, (K, num_node, num_node), jnp.float32)

    kb1, kb2, kb3, kg = jax.random.split(k_p, 4)
    params = {
        'blocks': [
            init_block_params(kb1, in_channels, graph_hidden, K, temporal_kernel_size),
            init_block_params(kb2, graph_hidden, graph_hidden, K, temporal_kernel_size),
            init_block_params(kb3, graph_hidden, graph_hidden, K, temporal_kernel_size),
        ],
        # edge_importance = nn.Parameter(torch.ones(A.shape)) per block
        'edge_importance': [jnp.ones((K, num_node, num_node), jnp.float32)
                            for _ in range(3)],
        'gru': init_gru_params(kg, graph_hidden, rnn_hidden, rnn_layers),
    }

    fwd = jax.jit(lambda xx, aa, pp:
                  graph_social_encoder_forward(xx, aa, pp, num_node))
    h = jax.block_until_ready(fwd(x, adj, params))     # default: returns h
    assert h.shape == (rnn_layers, N * num_node, rnn_hidden)
    assert bool(jnp.all(jnp.isfinite(h)))
    print("KERNEL_OK")
</pallas_src>

<mosaic_0001>
module attributes {stable_mosaic.version = 11 : i64} {
  func.func @_st_block_res_kernel(%arg0: i32, %arg1: memref<1x8x16xbf16, #tpu.memory_space<vmem>>, %arg2: memref<16x128xbf16, #tpu.memory_space<vmem>>, %arg3: memref<1x128xf32, #tpu.memory_space<vmem>>, %arg4: memref<16x128xbf16, #tpu.memory_space<vmem>>, %arg5: memref<1x128xf32, #tpu.memory_space<vmem>>, %arg6: memref<5x128x128xbf16, #tpu.memory_space<vmem>>, %arg7: memref<1x128xf32, #tpu.memory_space<vmem>>, %arg8: memref<1x8x128xbf16, #tpu.memory_space<vmem>>, %arg9: memref<12x128xf32, #tpu.memory_space<vmem>>) attributes {dimension_semantics = [#tpu.dimension_semantics<parallel>], iteration_bounds = array<i64: 2>, scalar_prefetch = 0 : i64, scratch_operands = 1 : i64, tpu.core_type = #tpu.core_type<tc>, window_params = [{transform_indices = @transform_0, window_bounds = array<i64: 1, 8, 16>}, {pipeline_mode = #tpu.pipeline_mode<synchronous>, transform_indices = @transform_1, window_bounds = array<i64: 16, 128>}, {pipeline_mode = #tpu.pipeline_mode<synchronous>, transform_indices = @transform_2, window_bounds = array<i64: 1, 128>}, {pipeline_mode = #tpu.pipeline_mode<synchronous>, transform_indices = @transform_3, window_bounds = array<i64: 16, 128>}, {pipeline_mode = #tpu.pipeline_mode<synchronous>, transform_indices = @transform_4, window_bounds = array<i64: 1, 128>}, {pipeline_mode = #tpu.pipeline_mode<synchronous>, transform_indices = @transform_5, window_bounds = array<i64: 5, 128, 128>}, {pipeline_mode = #tpu.pipeline_mode<synchronous>, transform_indices = @transform_6, window_bounds = array<i64: 1, 128>}, {transform_indices = @transform_7, window_bounds = array<i64: 1, 8, 128>}]} {
    %c0 = arith.constant 0 : index
    %c0_0 = arith.constant 0 : index
    %c0_1 = arith.constant 0 : index
    %0 = vector.load %arg1[%c0, %c0_0, %c0_1] : memref<1x8x16xbf16, #tpu.memory_space<vmem>>, vector<1x8x16xbf16>
    %1 = vector.shape_cast %0 : vector<1x8x16xbf16> to vector<8x16xbf16>
    %c0_2 = arith.constant 0 : index
    %c0_3 = arith.constant 0 : index
    %2 = vector.load %arg4[%c0_2, %c0_3] : memref<16x128xbf16, #tpu.memory_space<vmem>>, vector<16x128xbf16>
    %cst = arith.constant dense<0.000000e+00> : vector<8x128xf32>
    %3 = tpu.matmul %1, %2, %cst {dimension_numbers = #tpu.dot_dimension_numbers<[1], [0], [0], [1], [0, 0, 1, 1], [], []>} : vector<8x16xbf16>, vector<16x128xbf16>, vector<8x128xf32> -> vector<8x128xf32>
    %c0_4 = arith.constant 0 : index
    %c0_5 = arith.constant 0 : index
    %4 = vector.load %arg5[%c0_4, %c0_5] : memref<1x128xf32, #tpu.memory_space<vmem>>, vector<1x128xf32>
    %5 = vector.broadcast %4 : vector<1x128xf32> to vector<8x128xf32>
    %6 = arith.addf %3, %5 : vector<8x128xf32>
    %c0_6 = arith.constant 0 : index
    %c0_7 = arith.constant 0 : index
    %7 = vector.load %arg2[%c0_6, %c0_7] : memref<16x128xbf16, #tpu.memory_space<vmem>>, vector<16x128xbf16>
    %cst_8 = arith.constant dense<0.000000e+00> : vector<8x128xf32>
    %8 = tpu.matmul %1, %7, %cst_8 {dimension_numbers = #tpu.dot_dimension_numbers<[1], [0], [0], [1], [0, 0, 1, 1], [], []>} : vector<8x16xbf16>, vector<16x128xbf16>, vector<8x128xf32> -> vector<8x128xf32>
    %c0_9 = arith.constant 0 : index
    %c0_10 = arith.constant 0 : index
    %9 = vector.load %arg3[%c0_9, %c0_10] : memref<1x128xf32, #tpu.memory_space<vmem>>, vector<1x128xf32>
    %10 = vector.broadcast %9 : vector<1x128xf32> to vector<8x128xf32>
    %11 = arith.addf %8, %10 : vector<8x128xf32>
    %cst_11 = arith.constant 0.000000e+00 : f32
    %12 = vector.broadcast %cst_11 : f32 to vector<8x128xf32>
    %13 = arith.maximumf %11, %12 : vector<8x128xf32>
    %cst_12 = arith.constant 0.000000e+00 : f32
    %14 = vector.broadcast %cst_12 : f32 to vector<2x128xf32>
    %c0_13 = arith.constant 0 : index
    %c0_14 = arith.constant 0 : index
    %15 = vector.load %arg9[%c0_13, %c0_14] : memref<12x128xf32, #tpu.memory_space<vmem>>, vector<2x128xf32>
    tpu.vector_store %arg9[%c0_13, %c0_14], %14 {strides = array<i32>} : memref<12x128xf32, #tpu.memory_space<vmem>>, vector<2x128xf32>,
    %cst_15 = arith.constant 0.000000e+00 : f32
    %16 = vector.broadcast %cst_15 : f32 to vector<2x128xf32>
    %c10 = arith.constant 10 : index
    %c0_16 = arith.constant 0 : index
    %17 = vector.load %arg9[%c10, %c0_16] : memref<12x128xf32, #tpu.memory_space<vmem>>, vector<2x128xf32>
    tpu.vector_store %arg9[%c10, %c0_16], %16 {strides = array<i32>} : memref<12x128xf32, #tpu.memory_space<vmem>>, vector<2x128xf32>,
    %c2 = arith.constant 2 : index
    %c0_17 = arith.constant 0 : index
    %18 = vector.load %arg9[%c2, %c0_17] : memref<12x128xf32, #tpu.memory_space<vmem>>, vector<8x128xf32>
    tpu.vector_store %arg9[%c2, %c0_17], %13 {strides = array<i32>} : memref<12x128xf32, #tpu.memory_space<vmem>>, vector<8x128xf32>,
    %c0_18 = arith.constant 0 : index
    %c0_19 = arith.constant 0 : index
    %19 = vector.load %arg7[%c0_18, %c0_19] : memref<1x128xf32, #tpu.memory_space<vmem>>, vector<1x128xf32>
    %20 = vector.broadcast %19 : vector<1x128xf32> to vector<8x128xf32>
    %21 = arith.addf %20, %6 : vector<8x128xf32>
    %c0_20 = arith.constant 0 : index
    %c0_21 = arith.constant 0 : index
    %22 = vector.load %arg9[%c0_20, %c0_21] : memref<12x128xf32, #tpu.memory_space<vmem>>, vector<8x128xf32>
    %23 = arith.truncf %22 : vector<8x128xf32> to vector<8x128xbf16>
    %c0_22 = arith.constant 0 : index
    %c0_23 = arith.constant 0 : index
    %c0_24 = arith.constant 0 : index
    %24 = vector.load %arg6[%c0_22, %c0_23, %c0_24] : memref<5x128x128xbf16, #tpu.memory_space<vmem>>, vector<1x128x128xbf16>
    %25 = vector.shape_cast %24 : vector<1x128x128xbf16> to vector<128x128xbf16>
    %cst_25 = arith.constant dense<0.000000e+00> : vector<8x128xf32>
    %26 = tpu.matmul %23, %25, %cst_25 {dimension_numbers = #tpu.dot_dimension_numbers<[1], [0], [0], [1], [0, 0, 1, 1], [], []>} : vector<8x128xbf16>, vector<128x128xbf16>, vector<8x128xf32> -> vector<8x128xf32>
    %27 = arith.addf %21, %26 : vector<8x128xf32>
    %c1 = arith.constant 1 : index
    %c0_26 = arith.constant 0 : index
    %28 = vector.load %arg9[%c1, %c0_26] : memref<12x128xf32, #tpu.memory_space<vmem>>, vector<8x128xf32>
    %29 = arith.truncf %28 : vector<8x128xf32> to vector<8x128xbf16>
    %c1_27 = arith.constant 1 : index
    %c0_28 = arith.constant 0 : index
    %c0_29 = arith.constant 0 : index
    %30 = vector.load %arg6[%c1_27, %c0_28, %c0_29] : memref<5x128x128xbf16, #tpu.memory_space<vmem>>, vector<1x128x128xbf16>
    %31 = vector.shape_cast %30 : vector<1x128x128xbf16> to vector<128x128xbf16>
    %cst_30 = arith.constant dense<0.000000e+00> : vector<8x128xf32>
    %32 = tpu.matmul %29, %31, %cst_30 {dimension_numbers = #tpu.dot_dimension_numbers<[1], [0], [0], [1], [0, 0, 1, 1], [], []>} : vector<8x128xbf16>, vector<128x128xbf16>, vector<8x128xf32> -> vector<8x128xf32>
    %33 = arith.addf %27, %32 : vector<8x128xf32>
    %c2_31 = arith.constant 2 : index
    %c0_32 = arith.constant 0 : index
    %34 = vector.load %arg9[%c2_31, %c0_32] : memref<12x128xf32, #tpu.memory_space<vmem>>, vector<8x128xf32>
    %35 = arith.truncf %34 : vector<8x128xf32> to vector<8x128xbf16>
    %c2_33 = arith.constant 2 : index
    %c0_34 = arith.constant 0 : index
    %c0_35 = arith.constant 0 : index
    %36 = vector.load %arg6[%c2_33, %c0_34, %c0_35] : memref<5x128x128xbf16, #tpu.memory_space<vmem>>, vector<1x128x128xbf16>
    %37 = vector.shape_cast %36 : vector<1x128x128xbf16> to vector<128x128xbf16>
    %cst_36 = arith.constant dense<0.000000e+00> : vector<8x128xf32>
    %38 = tpu.matmul %35, %37, %cst_36 {dimension_numbers = #tpu.dot_dimension_numbers<[1], [0], [0], [1], [0, 0, 1, 1], [], []>} : vector<8x128xbf16>, vector<128x128xbf16>, vector<8x128xf32> -> vector<8x128xf32>
    %39 = arith.addf %33, %38 : vector<8x128xf32>
    %c3 = arith.constant 3 : index
    %c0_37 = arith.constant 0 : index
    %40 = vector.load %arg9[%c3, %c0_37] : memref<12x128xf32, #tpu.memory_space<vmem>>, vector<8x128xf32>
    %41 = arith.truncf %40 : vector<8x128xf32> to vector<8x128xbf16>
    %c3_38 = arith.constant 3 : index
    %c0_39 = arith.constant 0 : index
    %c0_40 = arith.constant 0 : index
    %42 = vector.load %arg6[%c3_38, %c0_39, %c0_40] : memref<5x128x128xbf16, #tpu.memory_space<vmem>>, vector<1x128x128xbf16>
    %43 = vector.shape_cast %42 : vector<1x128x128xbf16> to vector<128x128xbf16>
    %cst_41 = arith.constant dense<0.000000e+00> : vector<8x128xf32>
    %44 = tpu.matmul %41, %43, %cst_41 {dimension_numbers = #tpu.dot_dimension_numbers<[1], [0], [0], [1], [0, 0, 1, 1], [], []>} : vector<8x128xbf16>, vector<128x128xbf16>, vector<8x128xf32> -> vector<8x128xf32>
    %45 = arith.addf %39, %44 : vector<8x128xf32>
    %c4 = arith.constant 4 : index
    %c0_42 = arith.constant 0 : index
    %46 = vector.load %arg9[%c4, %c0_42] : memref<12x128xf32, #tpu.memory_space<vmem>>, vector<8x128xf32>
    %47 = arith.truncf %46 : vector<8x128xf32> to vector<8x128xbf16>
    %c4_43 = arith.constant 4 : index
    %c0_44 = arith.constant 0 : index
    %c0_45 = arith.constant 0 : index
    %48 = vector.load %arg6[%c4_43, %c0_44, %c0_45] : memref<5x128x128xbf16, #tpu.memory_space<vmem>>, vector<1x128x128xbf16>
    %49 = vector.shape_cast %48 : vector<1x128x128xbf16> to vector<128x128xbf16>
    %cst_46 = arith.constant dense<0.000000e+00> : vector<8x128xf32>
    %50 = tpu.matmul %47, %49, %cst_46 {dimension_numbers = #tpu.dot_dimension_numbers<[1], [0], [0], [1], [0, 0, 1, 1], [], []>} : vector<8x128xbf16>, vector<128x128xbf16>, vector<8x128xf32> -> vector<8x128xf32>
    %51 = arith.addf %45, %50 : vector<8x128xf32>
    %cst_47 = arith.constant 0.000000e+00 : f32
    %52 = vector.broadcast %cst_47 : f32 to vector<8x128xf32>
    %53 = arith.maximumf %51, %52 : vector<8x128xf32>
    %54 = arith.truncf %53 : vector<8x128xf32> to vector<8x128xbf16>
    %c0_48 = arith.constant 0 : index
    %c0_49 = arith.constant 0 : index
    %c0_50 = arith.constant 0 : index
    %55 = vector.load %arg8[%c0_48, %c0_49, %c0_50] : memref<1x8x128xbf16, #tpu.memory_space<vmem>>, vector<1x8x128xbf16>
    %56 = vector.shape_cast %55 : vector<1x8x128xbf16> to vector<8x128xbf16>
    %57 = vector.shape_cast %54 : vector<8x128xbf16> to vector<1x8x128xbf16>
    tpu.vector_store %arg8[%c0_48, %c0_49, %c0_50], %57 {strides = array<i32>} : memref<1x8x128xbf16, #tpu.memory_space<vmem>>, vector<1x8x128xbf16>,
    return
  }
  func.func @transform_0(%arg0: i32) -> (i32, i32, i32) {
    %c0_i32 = arith.constant 0 : i32
    %c0_i32_0 = arith.constant 0 : i32
    %c0_i32_1 = arith.constant 0 : i32
    return %arg0, %c0_i32, %c0_i32_0 : i32, i32, i32
  }
  func.func @transform_1(%arg0: i32) -> (i32, i32) {
    %c0_i32 = arith.constant 0 : i32
    %c0_i32_0 = arith.constant 0 : i32
    %c0_i32_1 = arith.constant 0 : i32
    return %c0_i32, %c0_i32_0 : i32, i32
  }
  func.func @transform_2(%arg0: i32) -> (i32, i32) {
    %c0_i32 = arith.constant 0 : i32
    %c0_i32_0 = arith.constant 0 : i32
    %c0_i32_1 = arith.constant 0 : i32
    return %c0_i32, %c0_i32_0 : i32, i32
  }
  func.func @transform_3(%arg0: i32) -> (i32, i32) {
    %c0_i32 = arith.constant 0 : i32
    %c0_i32_0 = arith.constant 0 : i32
    %c0_i32_1 = arith.constant 0 : i32
    return %c0_i32, %c0_i32_0 : i32, i32
  }
  func.func @transform_4(%arg0: i32) -> (i32, i32) {
    %c0_i32 = arith.constant 0 : i32
    %c0_i32_0 = arith.constant 0 : i32
    %c0_i32_1 = arith.constant 0 : i32
    return %c0_i32, %c0_i32_0 : i32, i32
  }
  func.func @transform_5(%arg0: i32) -> (i32, i32, i32) {
    %c0_i32 = arith.constant 0 : i32
    %c0_i32_0 = arith.constant 0 : i32
    %c0_i32_1 = arith.constant 0 : i32
    %c0_i32_2 = arith.constant 0 : i32
    return %c0_i32, %c0_i32_0, %c0_i32_1 : i32, i32, i32
  }
  func.func @transform_6(%arg0: i32) -> (i32, i32) {
    %c0_i32 = arith.constant 0 : i32
    %c0_i32_0 = arith.constant 0 : i32
    %c0_i32_1 = arith.constant 0 : i32
    return %c0_i32, %c0_i32_0 : i32, i32
  }
  func.func @transform_7(%arg0: i32) -> (i32, i32, i32) {
    %c0_i32 = arith.constant 0 : i32
    %c0_i32_0 = arith.constant 0 : i32
    %c0_i32_1 = arith.constant 0 : i32
    return %arg0, %c0_i32, %c0_i32_0 : i32, i32, i32
  }
}

module attributes {stable_mosaic.version = 11 : i64} {
  func.func @_st_block_kernel(%arg0: i32, %arg1: memref<1x8x128xbf16, #tpu.memory_space<vmem>>, %arg2: memref<128x128xbf16, #tpu.memory_space<vmem>>, %arg3: memref<1x128xf32, #tpu.memory_space<vmem>>, %arg4: memref<5x128x128xbf16, #tpu.memory_space<vmem>>, %arg5: memref<1x128xf32, #tpu.memory_space<vmem>>, %arg6: memref<1x8x128xbf16, #tpu.memory_space<vmem>>, %arg7: memref<12x128xf32, #tpu.memory_space<vmem>>) attributes {dimension_semantics = [#tpu.dimension_semantics<parallel>], iteration_bounds = array<i64: 2>, scalar_prefetch = 0 : i64, scratch_operands = 1 : i64, tpu.core_type = #tpu.core_type<tc>, window_params = [{transform_indices = @transform_0, window_bounds = array<i64: 1, 8, 128>}, {pipeline_mode = #tpu.pipeline_mode<synchronous>, transform_indices = @transform_1, window_bounds = array<i64: 128, 128>}, {pipeline_mode = #tpu.pipeline_mode<synchronous>, transform_indices = @transform_2, window_bounds = array<i64: 1, 128>}, {pipeline_mode = #tpu.pipeline_mode<synchronous>, transform_indices = @transform_3, window_bounds = array<i64: 5, 128, 128>}, {pipeline_mode = #tpu.pipeline_mode<synchronous>, transform_indices = @transform_4, window_bounds = array<i64: 1, 128>}, {transform_indices = @transform_5, window_bounds = array<i64: 1, 8, 128>}]} {
    %c0 = arith.constant 0 : index
    %c0_0 = arith.constant 0 : index
    %c0_1 = arith.constant 0 : index
    %0 = vector.load %arg1[%c0, %c0_0, %c0_1] : memref<1x8x128xbf16, #tpu.memory_space<vmem>>, vector<1x8x128xbf16>
    %1 = vector.shape_cast %0 : vector<1x8x128xbf16> to vector<8x128xbf16>
    %2 = arith.extf %1 : vector<8x128xbf16> to vector<8x128xf32>
    %c0_2 = arith.constant 0 : index
    %c0_3 = arith.constant 0 : index
    %3 = vector.load %arg2[%c0_2, %c0_3] : memref<128x128xbf16, #tpu.memory_space<vmem>>, vector<128x128xbf16>
    %cst = arith.constant dense<0.000000e+00> : vector<8x128xf32>
    %4 = tpu.matmul %1, %3, %cst {dimension_numbers = #tpu.dot_dimension_numbers<[1], [0], [0], [1], [0, 0, 1, 1], [], []>} : vector<8x128xbf16>, vector<128x128xbf16>, vector<8x128xf32> -> vector<8x128xf32>
    %c0_4 = arith.constant 0 : index
    %c0_5 = arith.constant 0 : index
    %5 = vector.load %arg3[%c0_4, %c0_5] : memref<1x128xf32, #tpu.memory_space<vmem>>, vector<1x128xf32>
    %6 = vector.broadcast %5 : vector<1x128xf32> to vector<8x128xf32>
    %7 = arith.addf %4, %6 : vector<8x128xf32>
    %cst_6 = arith.constant 0.000000e+00 : f32
    %8 = vector.broadcast %cst_6 : f32 to vector<8x128xf32>
    %9 = arith.maximumf %7, %8 : vector<8x128xf32>
    %cst_7 = arith.constant 0.000000e+00 : f32
    %10 = vector.broadcast %cst_7 : f32 to vector<2x128xf32>
    %c0_8 = arith.constant 0 : index
    %c0_9 = arith.constant 0 : index
    %11 = vector.load %arg7[%c0_8, %c0_9] : memref<12x128xf32, #tpu.memory_space<vmem>>, vector<2x128xf32>
    tpu.vector_store %arg7[%c0_8, %c0_9], %10 {strides = array<i32>} : memref<12x128xf32, #tpu.memory_space<vmem>>, vector<2x128xf32>,
    %cst_10 = arith.constant 0.000000e+00 : f32
    %12 = vector.broadcast %cst_10 : f32 to vector<2x128xf32>
    %c10 = arith.constant 10 : index
    %c0_11 = arith.constant 0 : index
    %13 = vector.load %arg7[%c10, %c0_11] : memref<12x128xf32, #tpu.memory_space<vmem>>, vector<2x128xf32>
    tpu.vector_store %arg7[%c10, %c0_11], %12 {strides = array<i32>} : memref<12x128xf32, #tpu.memory_space<vmem>>, vector<2x128xf32>,
    %c2 = arith.constant 2 : index
    %c0_12 = arith.constant 0 : index
    %14 = vector.load %arg7[%c2, %c0_12] : memref<12x128xf32, #tpu.memory_space<vmem>>, vector<8x128xf32>
    tpu.vector_store %arg7[%c2, %c0_12], %9 {strides = array<i32>} : memref<12x128xf32, #tpu.memory_space<vmem>>, vector<8x128xf32>,
    %c0_13 = arith.constant 0 : index
    %c0_14 = arith.constant 0 : index
    %15 = vector.load %arg5[%c0_13, %c0_14] : memref<1x128xf32, #tpu.memory_space<vmem>>, vector<1x128xf32>
    %16 = vector.broadcast %15 : vector<1x128xf32> to vector<8x128xf32>
    %17 = arith.addf %16, %2 : vector<8x128xf32>
    %c0_15 = arith.constant 0 : index
    %c0_16 = arith.constant 0 : index
    %18 = vector.load %arg7[%c0_15, %c0_16] : memref<12x128xf32, #tpu.memory_space<vmem>>, vector<8x128xf32>
    %19 = arith.truncf %18 : vector<8x128xf32> to vector<8x128xbf16>
    %c0_17 = arith.constant 0 : index
    %c0_18 = arith.constant 0 : index
    %c0_19 = arith.constant 0 : index
    %20 = vector.load %arg4[%c0_17, %c0_18, %c0_19] : memref<5x128x128xbf16, #tpu.memory_space<vmem>>, vector<1x128x128xbf16>
    %21 = vector.shape_cast %20 : vector<1x128x128xbf16> to vector<128x128xbf16>
    %cst_20 = arith.constant dense<0.000000e+00> : vector<8x128xf32>
    %22 = tpu.matmul %19, %21, %cst_20 {dimension_numbers = #tpu.dot_dimension_numbers<[1], [0], [0], [1], [0, 0, 1, 1], [], []>} : vector<8x128xbf16>, vector<128x128xbf16>, vector<8x128xf32> -> vector<8x128xf32>
    %23 = arith.addf %17, %22 : vector<8x128xf32>
    %c1 = arith.constant 1 : index
    %c0_21 = arith.constant 0 : index
    %24 = vector.load %arg7[%c1, %c0_21] : memref<12x128xf32, #tpu.memory_space<vmem>>, vector<8x128xf32>
    %25 = arith.truncf %24 : vector<8x128xf32> to vector<8x128xbf16>
    %c1_22 = arith.constant 1 : index
    %c0_23 = arith.constant 0 : index
    %c0_24 = arith.constant 0 : index
    %26 = vector.load %arg4[%c1_22, %c0_23, %c0_24] : memref<5x128x128xbf16, #tpu.memory_space<vmem>>, vector<1x128x128xbf16>
    %27 = vector.shape_cast %26 : vector<1x128x128xbf16> to vector<128x128xbf16>
    %cst_25 = arith.constant dense<0.000000e+00> : vector<8x128xf32>
    %28 = tpu.matmul %25, %27, %cst_25 {dimension_numbers = #tpu.dot_dimension_numbers<[1], [0], [0], [1], [0, 0, 1, 1], [], []>} : vector<8x128xbf16>, vector<128x128xbf16>, vector<8x128xf32> -> vector<8x128xf32>
    %29 = arith.addf %23, %28 : vector<8x128xf32>
    %c2_26 = arith.constant 2 : index
    %c0_27 = arith.constant 0 : index
    %30 = vector.load %arg7[%c2_26, %c0_27] : memref<12x128xf32, #tpu.memory_space<vmem>>, vector<8x128xf32>
    %31 = arith.truncf %30 : vector<8x128xf32> to vector<8x128xbf16>
    %c2_28 = arith.constant 2 : index
    %c0_29 = arith.constant 0 : index
    %c0_30 = arith.constant 0 : index
    %32 = vector.load %arg4[%c2_28, %c0_29, %c0_30] : memref<5x128x128xbf16, #tpu.memory_space<vmem>>, vector<1x128x128xbf16>
    %33 = vector.shape_cast %32 : vector<1x128x128xbf16> to vector<128x128xbf16>
    %cst_31 = arith.constant dense<0.000000e+00> : vector<8x128xf32>
    %34 = tpu.matmul %31, %33, %cst_31 {dimension_numbers = #tpu.dot_dimension_numbers<[1], [0], [0], [1], [0, 0, 1, 1], [], []>} : vector<8x128xbf16>, vector<128x128xbf16>, vector<8x128xf32> -> vector<8x128xf32>
    %35 = arith.addf %29, %34 : vector<8x128xf32>
    %c3 = arith.constant 3 : index
    %c0_32 = arith.constant 0 : index
    %36 = vector.load %arg7[%c3, %c0_32] : memref<12x128xf32, #tpu.memory_space<vmem>>, vector<8x128xf32>
    %37 = arith.truncf %36 : vector<8x128xf32> to vector<8x128xbf16>
    %c3_33 = arith.constant 3 : index
    %c0_34 = arith.constant 0 : index
    %c0_35 = arith.constant 0 : index
    %38 = vector.load %arg4[%c3_33, %c0_34, %c0_35] : memref<5x128x128xbf16, #tpu.memory_space<vmem>>, vector<1x128x128xbf16>
    %39 = vector.shape_cast %38 : vector<1x128x128xbf16> to vector<128x128xbf16>
    %cst_36 = arith.constant dense<0.000000e+00> : vector<8x128xf32>
    %40 = tpu.matmul %37, %39, %cst_36 {dimension_numbers = #tpu.dot_dimension_numbers<[1], [0], [0], [1], [0, 0, 1, 1], [], []>} : vector<8x128xbf16>, vector<128x128xbf16>, vector<8x128xf32> -> vector<8x128xf32>
    %41 = arith.addf %35, %40 : vector<8x128xf32>
    %c4 = arith.constant 4 : index
    %c0_37 = arith.constant 0 : index
    %42 = vector.load %arg7[%c4, %c0_37] : memref<12x128xf32, #tpu.memory_space<vmem>>, vector<8x128xf32>
    %43 = arith.truncf %42 : vector<8x128xf32> to vector<8x128xbf16>
    %c4_38 = arith.constant 4 : index
    %c0_39 = arith.constant 0 : index
    %c0_40 = arith.constant 0 : index
    %44 = vector.load %arg4[%c4_38, %c0_39, %c0_40] : memref<5x128x128xbf16, #tpu.memory_space<vmem>>, vector<1x128x128xbf16>
    %45 = vector.shape_cast %44 : vector<1x128x128xbf16> to vector<128x128xbf16>
    %cst_41 = arith.constant dense<0.000000e+00> : vector<8x128xf32>
    %46 = tpu.matmul %43, %45, %cst_41 {dimension_numbers = #tpu.dot_dimension_numbers<[1], [0], [0], [1], [0, 0, 1, 1], [], []>} : vector<8x128xbf16>, vector<128x128xbf16>, vector<8x128xf32> -> vector<8x128xf32>
    %47 = arith.addf %41, %46 : vector<8x128xf32>
    %cst_42 = arith.constant 0.000000e+00 : f32
    %48 = vector.broadcast %cst_42 : f32 to vector<8x128xf32>
    %49 = arith.maximumf %47, %48 : vector<8x128xf32>
    %50 = arith.truncf %49 : vector<8x128xf32> to vector<8x128xbf16>
    %c0_43 = arith.constant 0 : index
    %c0_44 = arith.constant 0 : index
    %c0_45 = arith.constant 0 : index
    %51 = vector.load %arg6[%c0_43, %c0_44, %c0_45] : memref<1x8x128xbf16, #tpu.memory_space<vmem>>, vector<1x8x128xbf16>
    %52 = vector.shape_cast %51 : vector<1x8x128xbf16> to vector<8x128xbf16>
    %53 = vector.shape_cast %50 : vector<8x128xbf16> to vector<1x8x128xbf16>
    tpu.vector_store %arg6[%c0_43, %c0_44, %c0_45], %53 {strides = array<i32>} : memref<1x8x128xbf16, #tpu.memory_space<vmem>>, vector<1x8x128xbf16>,
    return
  }
  func.func @transform_0(%arg0: i32) -> (i32, i32, i32) {
    %c0_i32 = arith.constant 0 : i32
    %c0_i32_0 = arith.constant 0 : i32
    %c0_i32_1 = arith.constant 0 : i32
    return %arg0, %c0_i32, %c0_i32_0 : i32, i32, i32
  }
  func.func @transform_1(%arg0: i32) -> (i32, i32) {
    %c0_i32 = arith.constant 0 : i32
    %c0_i32_0 = arith.constant 0 : i32
    %c0_i32_1 = arith.constant 0 : i32
    return %c0_i32, %c0_i32_0 : i32, i32
  }
  func.func @transform_2(%arg0: i32) -> (i32, i32) {
    %c0_i32 = arith.constant 0 : i32
    %c0_i32_0 = arith.constant 0 : i32
    %c0_i32_1 = arith.constant 0 : i32
    return %c0_i32, %c0_i32_0 : i32, i32
  }
  func.func @transform_3(%arg0: i32) -> (i32, i32, i32) {
    %c0_i32 = arith.constant 0 : i32
    %c0_i32_0 = arith.constant 0 : i32
    %c0_i32_1 = arith.constant 0 : i32
    %c0_i32_2 = arith.constant 0 : i32
    return %c0_i32, %c0_i32_0, %c0_i32_1 : i32, i32, i32
  }
  func.func @transform_4(%arg0: i32) -> (i32, i32) {
    %c0_i32 = arith.constant 0 : i32
    %c0_i32_0 = arith.constant 0 : i32
    %c0_i32_1 = arith.constant 0 : i32
    return %c0_i32, %c0_i32_0 : i32, i32
  }
  func.func @transform_5(%arg0: i32) -> (i32, i32, i32) {
    %c0_i32 = arith.constant 0 : i32
    %c0_i32_0 = arith.constant 0 : i32
    %c0_i32_1 = arith.constant 0 : i32
    return %arg0, %c0_i32, %c0_i32_0 : i32, i32, i32
  }
}

module attributes {stable_mosaic.version = 11 : i64} {
  func.func @_gru2_kernel(%arg0: i32, %arg1: memref<8x8x32xbf16, #tpu.memory_space<vmem>>, %arg2: memref<32x128xbf16, #tpu.memory_space<vmem>>, %arg3: memref<32x128xbf16, #tpu.memory_space<vmem>>, %arg4: memref<1x128xf32, #tpu.memory_space<vmem>>, %arg5: memref<1x128xf32, #tpu.memory_space<vmem>>, %arg6: memref<32x128xbf16, #tpu.memory_space<vmem>>, %arg7: memref<32x128xbf16, #tpu.memory_space<vmem>>, %arg8: memref<1x128xf32, #tpu.memory_space<vmem>>, %arg9: memref<1x128xf32, #tpu.memory_space<vmem>>, %arg10: memref<8x32xf32, #tpu.memory_space<vmem>>, %arg11: memref<8x32xf32, #tpu.memory_space<vmem>>) attributes {dimension_semantics = [#tpu.dimension_semantics<parallel>], iteration_bounds = array<i64: 1>, scalar_prefetch = 0 : i64, scratch_operands = 0 : i64, tpu.core_type = #tpu.core_type<tc>, window_params = [{transform_indices = @transform_0, window_bounds = array<i64: 8, 8, 32>}, {pipeline_mode = #tpu.pipeline_mode<synchronous>, transform_indices = @transform_1, window_bounds = array<i64: 32, 128>}, {pipeline_mode = #tpu.pipeline_mode<synchronous>, transform_indices = @transform_2, window_bounds = array<i64: 32, 128>}, {pipeline_mode = #tpu.pipeline_mode<synchronous>, transform_indices = @transform_3, window_bounds = array<i64: 1, 128>}, {pipeline_mode = #tpu.pipeline_mode<synchronous>, transform_indices = @transform_4, window_bounds = array<i64: 1, 128>}, {pipeline_mode = #tpu.pipeline_mode<synchronous>, transform_indices = @transform_5, window_bounds = array<i64: 32, 128>}, {pipeline_mode = #tpu.pipeline_mode<synchronous>, transform_indices = @transform_6, window_bounds = array<i64: 32, 128>}, {pipeline_mode = #tpu.pipeline_mode<synchronous>, transform_indices = @transform_7, window_bounds = array<i64: 1, 128>}, {pipeline_mode = #tpu.pipeline_mode<synchronous>, transform_indices = @transform_8, window_bounds = array<i64: 1, 128>}, {transform_indices = @transform_9, window_bounds = array<i64: 8, 32>}, {transform_indices = @transform_10, window_bounds = array<i64: 8, 32>}]} {
    %cst = arith.constant 0.000000e+00 : f32
    %0 = vector.broadcast %cst : f32 to vector<8x32xf32>
    %c0 = arith.constant 0 : index
    %c0_0 = arith.constant 0 : index
    %c0_1 = arith.constant 0 : index
    %1 = vector.load %arg1[%c0, %c0_0, %c0_1] : memref<8x8x32xbf16, #tpu.memory_space<vmem>>, vector<1x8x32xbf16>
    %2 = vector.shape_cast %1 : vector<1x8x32xbf16> to vector<8x32xbf16>
    %c0_2 = arith.constant 0 : index
    %c0_3 = arith.constant 0 : index
    %3 = vector.load %arg2[%c0_2, %c0_3] : memref<32x128xbf16, #tpu.memory_space<vmem>>, vector<32x128xbf16>
    %cst_4 = arith.constant dense<0.000000e+00> : vector<8x128xf32>
    %4 = tpu.matmul %2, %3, %cst_4 {dimension_numbers = #tpu.dot_dimension_numbers<[1], [0], [0], [1], [0, 0, 1, 1], [], []>} : vector<8x32xbf16>, vector<32x128xbf16>, vector<8x128xf32> -> vector<8x128xf32>
    %c0_5 = arith.constant 0 : index
    %c0_6 = arith.constant 0 : index
    %5 = vector.load %arg4[%c0_5, %c0_6] : memref<1x128xf32, #tpu.memory_space<vmem>>, vector<1x128xf32>
    %6 = vector.broadcast %5 : vector<1x128xf32> to vector<8x128xf32>
    %7 = arith.addf %4, %6 : vector<8x128xf32>
    %8 = arith.truncf %0 : vector<8x32xf32> to vector<8x32xbf16>
    %c0_7 = arith.constant 0 : index
    %c0_8 = arith.constant 0 : index
    %9 = vector.load %arg3[%c0_7, %c0_8] : memref<32x128xbf16, #tpu.memory_space<vmem>>, vector<32x128xbf16>
    %cst_9 = arith.constant dense<0.000000e+00> : vector<8x128xf32>
    %10 = tpu.matmul %8, %9, %cst_9 {dimension_numbers = #tpu.dot_dimension_numbers<[1], [0], [0], [1], [0, 0, 1, 1], [], []>} : vector<8x32xbf16>, vector<32x128xbf16>, vector<8x128xf32> -> vector<8x128xf32>
    %c0_10 = arith.constant 0 : index
    %c0_11 = arith.constant 0 : index
    %11 = vector.load %arg5[%c0_10, %c0_11] : memref<1x128xf32, #tpu.memory_space<vmem>>, vector<1x128xf32>
    %12 = vector.broadcast %11 : vector<1x128xf32> to vector<8x128xf32>
    %13 = arith.addf %10, %12 : vector<8x128xf32>
    %14 = vector.extract_strided_slice %7 {offsets = [0, 0], sizes = [8, 32], strides = [1, 1]} : vector<8x128xf32> to vector<8x32xf32>
    %15 = vector.extract_strided_slice %13 {offsets = [0, 0], sizes = [8, 32], strides = [1, 1]} : vector<8x128xf32> to vector<8x32xf32>
    %16 = arith.addf %14, %15 : vector<8x32xf32>
    %17 = arith.negf %16 : vector<8x32xf32>
    %18 = math.exp %17 : vector<8x32xf32>
    %cst_12 = arith.constant 1.000000e+00 : f32
    %19 = vector.broadcast %cst_12 : f32 to vector<8x32xf32>
    %20 = arith.addf %19, %18 : vector<8x32xf32>
    %21 = arith.divf %19, %20 : vector<8x32xf32>
    %22 = vector.extract_strided_slice %7 {offsets = [0, 32], sizes = [8, 32], strides = [1, 1]} : vector<8x128xf32> to vector<8x32xf32>
    %23 = vector.extract_strided_slice %13 {offsets = [0, 32], sizes = [8, 32], strides = [1, 1]} : vector<8x128xf32> to vector<8x32xf32>
    %24 = arith.addf %22, %23 : vector<8x32xf32>
    %25 = arith.negf %24 : vector<8x32xf32>
    %26 = math.exp %25 : vector<8x32xf32>
    %cst_13 = arith.constant 1.000000e+00 : f32
    %27 = vector.broadcast %cst_13 : f32 to vector<8x32xf32>
    %28 = arith.addf %27, %26 : vector<8x32xf32>
    %29 = arith.divf %27, %28 : vector<8x32xf32>
    %30 = vector.extract_strided_slice %7 {offsets = [0, 64], sizes = [8, 32], strides = [1, 1]} : vector<8x128xf32> to vector<8x32xf32>
    %31 = vector.extract_strided_slice %13 {offsets = [0, 64], sizes = [8, 32], strides = [1, 1]} : vector<8x128xf32> to vector<8x32xf32>
    %32 = arith.mulf %21, %31 : vector<8x32xf32>
    %33 = arith.addf %30, %32 : vector<8x32xf32>
    %34 = math.tanh %33 : vector<8x32xf32>
    %cst_14 = arith.constant 1.000000e+00 : f32
    %35 = vector.broadcast %cst_14 : f32 to vector<8x32xf32>
    %36 = arith.subf %35, %29 : vector<8x32xf32>
    %37 = arith.mulf %36, %34 : vector<8x32xf32>
    %38 = arith.mulf %29, %0 : vector<8x32xf32>
    %39 = arith.addf %37, %38 : vector<8x32xf32>
    %c1_i32 = arith.constant 1 : i32
    %40 = arith.index_cast %c1_i32 : i32 to index
    %c0_15 = arith.constant 0 : index
    %c0_16 = arith.constant 0 : index
    %41 = vector.load %arg1[%40, %c0_15, %c0_16] : memref<8x8x32xbf16, #tpu.memory_space<vmem>>, vector<1x8x32xbf16>
    %42 = vector.shape_cast %41 : vector<1x8x32xbf16> to vector<8x32xbf16>
    %c0_17 = arith.constant 0 : index
    %c0_18 = arith.constant 0 : index
    %43 = vector.load %arg2[%c0_17, %c0_18] : memref<32x128xbf16, #tpu.memory_space<vmem>>, vector<32x128xbf16>
    %cst_19 = arith.constant dense<0.000000e+00> : vector<8x128xf32>
    %44 = tpu.matmul %42, %43, %cst_19 {dimension_numbers = #tpu.dot_dimension_numbers<[1], [0], [0], [1], [0, 0, 1, 1], [], []>} : vector<8x32xbf16>, vector<32x128xbf16>, vector<8x128xf32> -> vector<8x128xf32>
    %c0_20 = arith.constant 0 : index
    %c0_21 = arith.constant 0 : index
    %45 = vector.load %arg4[%c0_20, %c0_21] : memref<1x128xf32, #tpu.memory_space<vmem>>, vector<1x128xf32>
    %46 = vector.broadcast %45 : vector<1x128xf32> to vector<8x128xf32>
    %47 = arith.addf %44, %46 : vector<8x128xf32>
    %48 = arith.truncf %39 : vector<8x32xf32> to vector<8x32xbf16>
    %c0_22 = arith.constant 0 : index
    %c0_23 = arith.constant 0 : index
    %49 = vector.load %arg3[%c0_22, %c0_23] : memref<32x128xbf16, #tpu.memory_space<vmem>>, vector<32x128xbf16>
    %cst_24 = arith.constant dense<0.000000e+00> : vector<8x128xf32>
    %50 = tpu.matmul %48, %49, %cst_24 {dimension_numbers = #tpu.dot_dimension_numbers<[1], [0], [0], [1], [0, 0, 1, 1], [], []>} : vector<8x32xbf16>, vector<32x128xbf16>, vector<8x128xf32> -> vector<8x128xf32>
    %c0_25 = arith.constant 0 : index
    %c0_26 = arith.constant 0 : index
    %51 = vector.load %arg5[%c0_25, %c0_26] : memref<1x128xf32, #tpu.memory_space<vmem>>, vector<1x128xf32>
    %52 = vector.broadcast %51 : vector<1x128xf32> to vector<8x128xf32>
    %53 = arith.addf %50, %52 : vector<8x128xf32>
    %54 = vector.extract_strided_slice %47 {offsets = [0, 0], sizes = [8, 32], strides = [1, 1]} : vector<8x128xf32> to vector<8x32xf32>
    %55 = vector.extract_strided_slice %53 {offsets = [0, 0], sizes = [8, 32], strides = [1, 1]} : vector<8x128xf32> to vector<8x32xf32>
    %56 = arith.addf %54, %55 : vector<8x32xf32>
    %57 = arith.negf %56 : vector<8x32xf32>
    %58 = math.exp %57 : vector<8x32xf32>
    %cst_27 = arith.constant 1.000000e+00 : f32
    %59 = vector.broadcast %cst_27 : f32 to vector<8x32xf32>
    %60 = arith.addf %59, %58 : vector<8x32xf32>
    %61 = arith.divf %59, %60 : vector<8x32xf32>
    %62 = vector.extract_strided_slice %47 {offsets = [0, 32], sizes = [8, 32], strides = [1, 1]} : vector<8x128xf32> to vector<8x32xf32>
    %63 = vector.extract_strided_slice %53 {offsets = [0, 32], sizes = [8, 32], strides = [1, 1]} : vector<8x128xf32> to vector<8x32xf32>
    %64 = arith.addf %62, %63 : vector<8x32xf32>
    %65 = arith.negf %64 : vector<8x32xf32>
    %66 = math.exp %65 : vector<8x32xf32>
    %cst_28 = arith.constant 1.000000e+00 : f32
    %67 = vector.broadcast %cst_28 : f32 to vector<8x32xf32>
    %68 = arith.addf %67, %66 : vector<8x32xf32>
    %69 = arith.divf %67, %68 : vector<8x32xf32>
    %70 = vector.extract_strided_slice %47 {offsets = [0, 64], sizes = [8, 32], strides = [1, 1]} : vector<8x128xf32> to vector<8x32xf32>
    %71 = vector.extract_strided_slice %53 {offsets = [0, 64], sizes = [8, 32], strides = [1, 1]} : vector<8x128xf32> to vector<8x32xf32>
    %72 = arith.mulf %61, %71 : vector<8x32xf32>
    %73 = arith.addf %70, %72 : vector<8x32xf32>
    %74 = math.tanh %73 : vector<8x32xf32>
    %cst_29 = arith.constant 1.000000e+00 : f32
    %75 = vector.broadcast %cst_29 : f32 to vector<8x32xf32>
    %76 = arith.subf %75, %69 : vector<8x32xf32>
    %77 = arith.mulf %76, %74 : vector<8x32xf32>
    %78 = arith.mulf %69, %39 : vector<8x32xf32>
    %79 = arith.addf %77, %78 : vector<8x32xf32>
    %80 = arith.truncf %39 : vector<8x32xf32> to vector<8x32xbf16>
    %c0_30 = arith.constant 0 : index
    %c0_31 = arith.constant 0 : index
    %81 = vector.load %arg6[%c0_30, %c0_31] : memref<32x128xbf16, #tpu.memory_space<vmem>>, vector<32x128xbf16>
    %cst_32 = arith.constant dense<0.000000e+00> : vector<8x128xf32>
    %82 = tpu.matmul %80, %81, %cst_32 {dimension_numbers = #tpu.dot_dimension_numbers<[1], [0], [0], [1], [0, 0, 1, 1], [], []>} : vector<8x32xbf16>, vector<32x128xbf16>, vector<8x128xf32> -> vector<8x128xf32>
    %c0_33 = arith.constant 0 : index
    %c0_34 = arith.constant 0 : index
    %83 = vector.load %arg8[%c0_33, %c0_34] : memref<1x128xf32, #tpu.memory_space<vmem>>, vector<1x128xf32>
    %84 = vector.broadcast %83 : vector<1x128xf32> to vector<8x128xf32>
    %85 = arith.addf %82, %84 : vector<8x128xf32>
    %86 = arith.truncf %0 : vector<8x32xf32> to vector<8x32xbf16>
    %c0_35 = arith.constant 0 : index
    %c0_36 = arith.constant 0 : index
    %87 = vector.load %arg7[%c0_35, %c0_36] : memref<32x128xbf16, #tpu.memory_space<vmem>>, vector<32x128xbf16>
    %cst_37 = arith.constant dense<0.000000e+00> : vector<8x128xf32>
    %88 = tpu.matmul %86, %87, %cst_37 {dimension_numbers = #tpu.dot_dimension_numbers<[1], [0], [0], [1], [0, 0, 1, 1], [], []>} : vector<8x32xbf16>, vector<32x128xbf16>, vector<8x128xf32> -> vector<8x128xf32>
    %c0_38 = arith.constant 0 : index
    %c0_39 = arith.constant 0 : index
    %89 = vector.load %arg9[%c0_38, %c0_39] : memref<1x128xf32, #tpu.memory_space<vmem>>, vector<1x128xf32>
    %90 = vector.broadcast %89 : vector<1x128xf32> to vector<8x128xf32>
    %91 = arith.addf %88, %90 : vector<8x128xf32>
    %92 = vector.extract_strided_slice %85 {offsets = [0, 0], sizes = [8, 32], strides = [1, 1]} : vector<8x128xf32> to vector<8x32xf32>
    %93 = vector.extract_strided_slice %91 {offsets = [0, 0], sizes = [8, 32], strides = [1, 1]} : vector<8x128xf32> to vector<8x32xf32>
    %94 = arith.addf %92, %93 : vector<8x32xf32>
    %95 = arith.negf %94 : vector<8x32xf32>
    %96 = math.exp %95 : vector<8x32xf32>
    %cst_40 = arith.constant 1.000000e+00 : f32
    %97 = vector.broadcast %cst_40 : f32 to vector<8x32xf32>
    %98 = arith.addf %97, %96 : vector<8x32xf32>
    %99 = arith.divf %97, %98 : vector<8x32xf32>
    %100 = vector.extract_strided_slice %85 {offsets = [0, 32], sizes = [8, 32], strides = [1, 1]} : vector<8x128xf32> to vector<8x32xf32>
    %101 = vector.extract_strided_slice %91 {offsets = [0, 32], sizes = [8, 32], strides = [1, 1]} : vector<8x128xf32> to vector<8x32xf32>
    %102 = arith.addf %100, %101 : vector<8x32xf32>
    %103 = arith.negf %102 : vector<8x32xf32>
    %104 = math.exp %103 : vector<8x32xf32>
    %cst_41 = arith.constant 1.000000e+00 : f32
    %105 = vector.broadcast %cst_41 : f32 to vector<8x32xf32>
    %106 = arith.addf %105, %104 : vector<8x32xf32>
    %107 = arith.divf %105, %106 : vector<8x32xf32>
    %108 = vector.extract_strided_slice %85 {offsets = [0, 64], sizes = [8, 32], strides = [1, 1]} : vector<8x128xf32> to vector<8x32xf32>
    %109 = vector.extract_strided_slice %91 {offsets = [0, 64], sizes = [8, 32], strides = [1, 1]} : vector<8x128xf32> to vector<8x32xf32>
    %110 = arith.mulf %99, %109 : vector<8x32xf32>
    %111 = arith.addf %108, %110 : vector<8x32xf32>
    %112 = math.tanh %111 : vector<8x32xf32>
    %cst_42 = arith.constant 1.000000e+00 : f32
    %113 = vector.broadcast %cst_42 : f32 to vector<8x32xf32>
    %114 = arith.subf %113, %107 : vector<8x32xf32>
    %115 = arith.mulf %114, %112 : vector<8x32xf32>
    %116 = arith.mulf %107, %0 : vector<8x32xf32>
    %117 = arith.addf %115, %116 : vector<8x32xf32>
    %c2_i32 = arith.constant 2 : i32
    %118 = arith.index_cast %c2_i32 : i32 to index
    %c0_43 = arith.constant 0 : index
    %c0_44 = arith.constant 0 : index
    %119 = vector.load %arg1[%118, %c0_43, %c0_44] : memref<8x8x32xbf16, #tpu.memory_space<vmem>>, vector<1x8x32xbf16>
    %120 = vector.shape_cast %119 : vector<1x8x32xbf16> to vector<8x32xbf16>
    %c0_45 = arith.constant 0 : index
    %c0_46 = arith.constant 0 : index
    %121 = vector.load %arg2[%c0_45, %c0_46] : memref<32x128xbf16, #tpu.memory_space<vmem>>, vector<32x128xbf16>
    %cst_47 = arith.constant dense<0.000000e+00> : vector<8x128xf32>
    %122 = tpu.matmul %120, %121, %cst_47 {dimension_numbers = #tpu.dot_dimension_numbers<[1], [0], [0], [1], [0, 0, 1, 1], [], []>} : vector<8x32xbf16>, vector<32x128xbf16>, vector<8x128xf32> -> vector<8x128xf32>
    %c0_48 = arith.constant 0 : index
    %c0_49 = arith.constant 0 : index
    %123 = vector.load %arg4[%c0_48, %c0_49] : memref<1x128xf32, #tpu.memory_space<vmem>>, vector<1x128xf32>
    %124 = vector.broadcast %123 : vector<1x128xf32> to vector<8x128xf32>
    %125 = arith.addf %122, %124 : vector<8x128xf32>
    %126 = arith.truncf %79 : vector<8x32xf32> to vector<8x32xbf16>
    %c0_50 = arith.constant 0 : index
    %c0_51 = arith.constant 0 : index
    %127 = vector.load %arg3[%c0_50, %c0_51] : memref<32x128xbf16, #tpu.memory_space<vmem>>, vector<32x128xbf16>
    %cst_52 = arith.constant dense<0.000000e+00> : vector<8x128xf32>
    %128 = tpu.matmul %126, %127, %cst_52 {dimension_numbers = #tpu.dot_dimension_numbers<[1], [0], [0], [1], [0, 0, 1, 1], [], []>} : vector<8x32xbf16>, vector<32x128xbf16>, vector<8x128xf32> -> vector<8x128xf32>
    %c0_53 = arith.constant 0 : index
    %c0_54 = arith.constant 0 : index
    %129 = vector.load %arg5[%c0_53, %c0_54] : memref<1x128xf32, #tpu.memory_space<vmem>>, vector<1x128xf32>
    %130 = vector.broadcast %129 : vector<1x128xf32> to vector<8x128xf32>
    %131 = arith.addf %128, %130 : vector<8x128xf32>
    %132 = vector.extract_strided_slice %125 {offsets = [0, 0], sizes = [8, 32], strides = [1, 1]} : vector<8x128xf32> to vector<8x32xf32>
    %133 = vector.extract_strided_slice %131 {offsets = [0, 0], sizes = [8, 32], strides = [1, 1]} : vector<8x128xf32> to vector<8x32xf32>
    %134 = arith.addf %132, %133 : vector<8x32xf32>
    %135 = arith.negf %134 : vector<8x32xf32>
    %136 = math.exp %135 : vector<8x32xf32>
    %cst_55 = arith.constant 1.000000e+00 : f32
    %137 = vector.broadcast %cst_55 : f32 to vector<8x32xf32>
    %138 = arith.addf %137, %136 : vector<8x32xf32>
    %139 = arith.divf %137, %138 : vector<8x32xf32>
    %140 = vector.extract_strided_slice %125 {offsets = [0, 32], sizes = [8, 32], strides = [1, 1]} : vector<8x128xf32> to vector<8x32xf32>
    %141 = vector.extract_strided_slice %131 {offsets = [0, 32], sizes = [8, 32], strides = [1, 1]} : vector<8x128xf32> to vector<8x32xf32>
    %142 = arith.addf %140, %141 : vector<8x32xf32>
    %143 = arith.negf %142 : vector<8x32xf32>
    %144 = math.exp %143 : vector<8x32xf32>
    %cst_56 = arith.constant 1.000000e+00 : f32
    %145 = vector.broadcast %cst_56 : f32 to vector<8x32xf32>
    %146 = arith.addf %145, %144 : vector<8x32xf32>
    %147 = arith.divf %145, %146 : vector<8x32xf32>
    %148 = vector.extract_strided_slice %125 {offsets = [0, 64], sizes = [8, 32], strides = [1, 1]} : vector<8x128xf32> to vector<8x32xf32>
    %149 = vector.extract_strided_slice %131 {offsets = [0, 64], sizes = [8, 32], strides = [1, 1]} : vector<8x128xf32> to vector<8x32xf32>
    %150 = arith.mulf %139, %149 : vector<8x32xf32>
    %151 = arith.addf %148, %150 : vector<8x32xf32>
    %152 = math.tanh %151 : vector<8x32xf32>
    %cst_57 = arith.constant 1.000000e+00 : f32
    %153 = vector.broadcast %cst_57 : f32 to vector<8x32xf32>
    %154 = arith.subf %153, %147 : vector<8x32xf32>
    %155 = arith.mulf %154, %152 : vector<8x32xf32>
    %156 = arith.mulf %147, %79 : vector<8x32xf32>
    %157 = arith.addf %155, %156 : vector<8x32xf32>
    %158 = arith.truncf %79 : vector<8x32xf32> to vector<8x32xbf16>
    %c0_58 = arith.constant 0 : index
    %c0_59 = arith.constant 0 : index
    %159 = vector.load %arg6[%c0_58, %c0_59] : memref<32x128xbf16, #tpu.memory_space<vmem>>, vector<32x128xbf16>
    %cst_60 = arith.constant dense<0.000000e+00> : vector<8x128xf32>
    %160 = tpu.matmul %158, %159, %cst_60 {dimension_numbers = #tpu.dot_dimension_numbers<[1], [0], [0], [1], [0, 0, 1, 1], [], []>} : vector<8x32xbf16>, vector<32x128xbf16>, vector<8x128xf32> -> vector<8x128xf32>
    %c0_61 = arith.constant 0 : index
    %c0_62 = arith.constant 0 : index
    %161 = vector.load %arg8[%c0_61, %c0_62] : memref<1x128xf32, #tpu.memory_space<vmem>>, vector<1x128xf32>
    %162 = vector.broadcast %161 : vector<1x128xf32> to vector<8x128xf32>
    %163 = arith.addf %160, %162 : vector<8x128xf32>
    %164 = arith.truncf %117 : vector<8x32xf32> to vector<8x32xbf16>
    %c0_63 = arith.constant 0 : index
    %c0_64 = arith.constant 0 : index
    %165 = vector.load %arg7[%c0_63, %c0_64] : memref<32x128xbf16, #tpu.memory_space<vmem>>, vector<32x128xbf16>
    %cst_65 = arith.constant dense<0.000000e+00> : vector<8x128xf32>
    %166 = tpu.matmul %164, %165, %cst_65 {dimension_numbers = #tpu.dot_dimension_numbers<[1], [0], [0], [1], [0, 0, 1, 1], [], []>} : vector<8x32xbf16>, vector<32x128xbf16>, vector<8x128xf32> -> vector<8x128xf32>
    %c0_66 = arith.constant 0 : index
    %c0_67 = arith.constant 0 : index
    %167 = vector.load %arg9[%c0_66, %c0_67] : memref<1x128xf32, #tpu.memory_space<vmem>>, vector<1x128xf32>
    %168 = vector.broadcast %167 : vector<1x128xf32> to vector<8x128xf32>
    %169 = arith.addf %166, %168 : vector<8x128xf32>
    %170 = vector.extract_strided_slice %163 {offsets = [0, 0], sizes = [8, 32], strides = [1, 1]} : vector<8x128xf32> to vector<8x32xf32>
    %171 = vector.extract_strided_slice %169 {offsets = [0, 0], sizes = [8, 32], strides = [1, 1]} : vector<8x128xf32> to vector<8x32xf32>
    %172 = arith.addf %170, %171 : vector<8x32xf32>
    %173 = arith.negf %172 : vector<8x32xf32>
    %174 = math.exp %173 : vector<8x32xf32>
    %cst_68 = arith.constant 1.000000e+00 : f32
    %175 = vector.broadcast %cst_68 : f32 to vector<8x32xf32>
    %176 = arith.addf %175, %174 : vector<8x32xf32>
    %177 = arith.divf %175, %176 : vector<8x32xf32>
    %178 = vector.extract_strided_slice %163 {offsets = [0, 32], sizes = [8, 32], strides = [1, 1]} : vector<8x128xf32> to vector<8x32xf32>
    %179 = vector.extract_strided_slice %169 {offsets = [0, 32], sizes = [8, 32], strides = [1, 1]} : vector<8x128xf32> to vector<8x32xf32>
    %180 = arith.addf %178, %179 : vector<8x32xf32>
    %181 = arith.negf %180 : vector<8x32xf32>
    %182 = math.exp %181 : vector<8x32xf32>
    %cst_69 = arith.constant 1.000000e+00 : f32
    %183 = vector.broadcast %cst_69 : f32 to vector<8x32xf32>
    %184 = arith.addf %183, %182 : vector<8x32xf32>
    %185 = arith.divf %183, %184 : vector<8x32xf32>
    %186 = vector.extract_strided_slice %163 {offsets = [0, 64], sizes = [8, 32], strides = [1, 1]} : vector<8x128xf32> to vector<8x32xf32>
    %187 = vector.extract_strided_slice %169 {offsets = [0, 64], sizes = [8, 32], strides = [1, 1]} : vector<8x128xf32> to vector<8x32xf32>
    %188 = arith.mulf %177, %187 : vector<8x32xf32>
    %189 = arith.addf %186, %188 : vector<8x32xf32>
    %190 = math.tanh %189 : vector<8x32xf32>
    %cst_70 = arith.constant 1.000000e+00 : f32
    %191 = vector.broadcast %cst_70 : f32 to vector<8x32xf32>
    %192 = arith.subf %191, %185 : vector<8x32xf32>
    %193 = arith.mulf %192, %190 : vector<8x32xf32>
    %194 = arith.mulf %185, %117 : vector<8x32xf32>
    %195 = arith.addf %193, %194 : vector<8x32xf32>
    %c3_i32 = arith.constant 3 : i32
    %196 = arith.index_cast %c3_i32 : i32 to index
    %c0_71 = arith.constant 0 : index
    %c0_72 = arith.constant 0 : index
    %197 = vector.load %arg1[%196, %c0_71, %c0_72] : memref<8x8x32xbf16, #tpu.memory_space<vmem>>, vector<1x8x32xbf16>
    %198 = vector.shape_cast %197 : vector<1x8x32xbf16> to vector<8x32xbf16>
    %c0_73 = arith.constant 0 : index
    %c0_74 = arith.constant 0 : index
    %199 = vector.load %arg2[%c0_73, %c0_74] : memref<32x128xbf16, #tpu.memory_space<vmem>>, vector<32x128xbf16>
    %cst_75 = arith.constant dense<0.000000e+00> : vector<8x128xf32>
    %200 = tpu.matmul %198, %199, %cst_75 {dimension_numbers = #tpu.dot_dimension_numbers<[1], [0], [0], [1], [0, 0, 1, 1], [], []>} : vector<8x32xbf16>, vector<32x128xbf16>, vector<8x128xf32> -> vector<8x128xf32>
    %c0_76 = arith.constant 0 : index
    %c0_77 = arith.constant 0 : index
    %201 = vector.load %arg4[%c0_76, %c0_77] : memref<1x128xf32, #tpu.memory_space<vmem>>, vector<1x128xf32>
    %202 = vector.broadcast %201 : vector<1x128xf32> to vector<8x128xf32>
    %203 = arith.addf %200, %202 : vector<8x128xf32>
    %204 = arith.truncf %157 : vector<8x32xf32> to vector<8x32xbf16>
    %c0_78 = arith.constant 0 : index
    %c0_79 = arith.constant 0 : index
    %205 = vector.load %arg3[%c0_78, %c0_79] : memref<32x128xbf16, #tpu.memory_space<vmem>>, vector<32x128xbf16>
    %cst_80 = arith.constant dense<0.000000e+00> : vector<8x128xf32>
    %206 = tpu.matmul %204, %205, %cst_80 {dimension_numbers = #tpu.dot_dimension_numbers<[1], [0], [0], [1], [0, 0, 1, 1], [], []>} : vector<8x32xbf16>, vector<32x128xbf16>, vector<8x128xf32> -> vector<8x128xf32>
    %c0_81 = arith.constant 0 : index
    %c0_82 = arith.constant 0 : index
    %207 = vector.load %arg5[%c0_81, %c0_82] : memref<1x128xf32, #tpu.memory_space<vmem>>, vector<1x128xf32>
    %208 = vector.broadcast %207 : vector<1x128xf32> to vector<8x128xf32>
    %209 = arith.addf %206, %208 : vector<8x128xf32>
    %210 = vector.extract_strided_slice %203 {offsets = [0, 0], sizes = [8, 32], strides = [1, 1]} : vector<8x128xf32> to vector<8x32xf32>
    %211 = vector.extract_strided_slice %209 {offsets = [0, 0], sizes = [8, 32], strides = [1, 1]} : vector<8x128xf32> to vector<8x32xf32>
    %212 = arith.addf %210, %211 : vector<8x32xf32>
    %213 = arith.negf %212 : vector<8x32xf32>
    %214 = math.exp %213 : vector<8x32xf32>
    %cst_83 = arith.constant 1.000000e+00 : f32
    %215 = vector.broadcast %cst_83 : f32 to vector<8x32xf32>
    %216 = arith.addf %215, %214 : vector<8x32xf32>
    %217 = arith.divf %215, %216 : vector<8x32xf32>
    %218 = vector.extract_strided_slice %203 {offsets = [0, 32], sizes = [8, 32], strides = [1, 1]} : vector<8x128xf32> to vector<8x32xf32>
    %219 = vector.extract_strided_slice %209 {offsets = [0, 32], sizes = [8, 32], strides = [1, 1]} : vector<8x128xf32> to vector<8x32xf32>
    %220 = arith.addf %218, %219 : vector<8x32xf32>
    %221 = arith.negf %220 : vector<8x32xf32>
    %222 = math.exp %221 : vector<8x32xf32>
    %cst_84 = arith.constant 1.000000e+00 : f32
    %223 = vector.broadcast %cst_84 : f32 to vector<8x32xf32>
    %224 = arith.addf %223, %222 : vector<8x32xf32>
    %225 = arith.divf %223, %224 : vector<8x32xf32>
    %226 = vector.extract_strided_slice %203 {offsets = [0, 64], sizes = [8, 32], strides = [1, 1]} : vector<8x128xf32> to vector<8x32xf32>
    %227 = vector.extract_strided_slice %209 {offsets = [0, 64], sizes = [8, 32], strides = [1, 1]} : vector<8x128xf32> to vector<8x32xf32>
    %228 = arith.mulf %217, %227 : vector<8x32xf32>
    %229 = arith.addf %226, %228 : vector<8x32xf32>
    %230 = math.tanh %229 : vector<8x32xf32>
    %cst_85 = arith.constant 1.000000e+00 : f32
    %231 = vector.broadcast %cst_85 : f32 to vector<8x32xf32>
    %232 = arith.subf %231, %225 : vector<8x32xf32>
    %233 = arith.mulf %232, %230 : vector<8x32xf32>
    %234 = arith.mulf %225, %157 : vector<8x32xf32>
    %235 = arith.addf %233, %234 : vector<8x32xf32>
    %236 = arith.truncf %157 : vector<8x32xf32> to vector<8x32xbf16>
    %c0_86 = arith.constant 0 : index
    %c0_87 = arith.constant 0 : index
    %237 = vector.load %arg6[%c0_86, %c0_87] : memref<32x128xbf16, #tpu.memory_space<vmem>>, vector<32x128xbf16>
    %cst_88 = arith.constant dense<0.000000e+00> : vector<8x128xf32>
    %238 = tpu.matmul %236, %237, %cst_88 {dimension_numbers = #tpu.dot_dimension_numbers<[1], [0], [0], [1], [0, 0, 1, 1], [], []>} : vector<8x32xbf16>, vector<32x128xbf16>, vector<8x128xf32> -> vector<8x128xf32>
    %c0_89 = arith.constant 0 : index
    %c0_90 = arith.constant 0 : index
    %239 = vector.load %arg8[%c0_89, %c0_90] : memref<1x128xf32, #tpu.memory_space<vmem>>, vector<1x128xf32>
    %240 = vector.broadcast %239 : vector<1x128xf32> to vector<8x128xf32>
    %241 = arith.addf %238, %240 : vector<8x128xf32>
    %242 = arith.truncf %195 : vector<8x32xf32> to vector<8x32xbf16>
    %c0_91 = arith.constant 0 : index
    %c0_92 = arith.constant 0 : index
    %243 = vector.load %arg7[%c0_91, %c0_92] : memref<32x128xbf16, #tpu.memory_space<vmem>>, vector<32x128xbf16>
    %cst_93 = arith.constant dense<0.000000e+00> : vector<8x128xf32>
    %244 = tpu.matmul %242, %243, %cst_93 {dimension_numbers = #tpu.dot_dimension_numbers<[1], [0], [0], [1], [0, 0, 1, 1], [], []>} : vector<8x32xbf16>, vector<32x128xbf16>, vector<8x128xf32> -> vector<8x128xf32>
    %c0_94 = arith.constant 0 : index
    %c0_95 = arith.constant 0 : index
    %245 = vector.load %arg9[%c0_94, %c0_95] : memref<1x128xf32, #tpu.memory_space<vmem>>, vector<1x128xf32>
    %246 = vector.broadcast %245 : vector<1x128xf32> to vector<8x128xf32>
    %247 = arith.addf %244, %246 : vector<8x128xf32>
    %248 = vector.extract_strided_slice %241 {offsets = [0, 0], sizes = [8, 32], strides = [1, 1]} : vector<8x128xf32> to vector<8x32xf32>
    %249 = vector.extract_strided_slice %247 {offsets = [0, 0], sizes = [8, 32], strides = [1, 1]} : vector<8x128xf32> to vector<8x32xf32>
    %250 = arith.addf %248, %249 : vector<8x32xf32>
    %251 = arith.negf %250 : vector<8x32xf32>
    %252 = math.exp %251 : vector<8x32xf32>
    %cst_96 = arith.constant 1.000000e+00 : f32
    %253 = vector.broadcast %cst_96 : f32 to vector<8x32xf32>
    %254 = arith.addf %253, %252 : vector<8x32xf32>
    %255 = arith.divf %253, %254 : vector<8x32xf32>
    %256 = vector.extract_strided_slice %241 {offsets = [0, 32], sizes = [8, 32], strides = [1, 1]} : vector<8x128xf32> to vector<8x32xf32>
    %257 = vector.extract_strided_slice %247 {offsets = [0, 32], sizes = [8, 32], strides = [1, 1]} : vector<8x128xf32> to vector<8x32xf32>
    %258 = arith.addf %256, %257 : vector<8x32xf32>
    %259 = arith.negf %258 : vector<8x32xf32>
    %260 = math.exp %259 : vector<8x32xf32>
    %cst_97 = arith.constant 1.000000e+00 : f32
    %261 = vector.broadcast %cst_97 : f32 to vector<8x32xf32>
    %262 = arith.addf %261, %260 : vector<8x32xf32>
    %263 = arith.divf %261, %262 : vector<8x32xf32>
    %264 = vector.extract_strided_slice %241 {offsets = [0, 64], sizes = [8, 32], strides = [1, 1]} : vector<8x128xf32> to vector<8x32xf32>
    %265 = vector.extract_strided_slice %247 {offsets = [0, 64], sizes = [8, 32], strides = [1, 1]} : vector<8x128xf32> to vector<8x32xf32>
    %266 = arith.mulf %255, %265 : vector<8x32xf32>
    %267 = arith.addf %264, %266 : vector<8x32xf32>
    %268 = math.tanh %267 : vector<8x32xf32>
    %cst_98 = arith.constant 1.000000e+00 : f32
    %269 = vector.broadcast %cst_98 : f32 to vector<8x32xf32>
    %270 = arith.subf %269, %263 : vector<8x32xf32>
    %271 = arith.mulf %270, %268 : vector<8x32xf32>
    %272 = arith.mulf %263, %195 : vector<8x32xf32>
    %273 = arith.addf %271, %272 : vector<8x32xf32>
    %c4_i32 = arith.constant 4 : i32
    %274 = arith.index_cast %c4_i32 : i32 to index
    %c0_99 = arith.constant 0 : index
    %c0_100 = arith.constant 0 : index
    %275 = vector.load %arg1[%274, %c0_99, %c0_100] : memref<8x8x32xbf16, #tpu.memory_space<vmem>>, vector<1x8x32xbf16>
    %276 = vector.shape_cast %275 : vector<1x8x32xbf16> to vector<8x32xbf16>
    %c0_101 = arith.constant 0 : index
    %c0_102 = arith.constant 0 : index
    %277 = vector.load %arg2[%c0_101, %c0_102] : memref<32x128xbf16, #tpu.memory_space<vmem>>, vector<32x128xbf16>
    %cst_103 = arith.constant dense<0.000000e+00> : vector<8x128xf32>
    %278 = tpu.matmul %276, %277, %cst_103 {dimension_numbers = #tpu.dot_dimension_numbers<[1], [0], [0], [1], [0, 0, 1, 1], [], []>} : vector<8x32xbf16>, vector<32x128xbf16>, vector<8x128xf32> -> vector<8x128xf32>
    %c0_104 = arith.constant 0 : index
    %c0_105 = arith.constant 0 : index
    %279 = vector.load %arg4[%c0_104, %c0_105] : memref<1x128xf32, #tpu.memory_space<vmem>>, vector<1x128xf32>
    %280 = vector.broadcast %279 : vector<1x128xf32> to vector<8x128xf32>
    %281 = arith.addf %278, %280 : vector<8x128xf32>
    %282 = arith.truncf %235 : vector<8x32xf32> to vector<8x32xbf16>
    %c0_106 = arith.constant 0 : index
    %c0_107 = arith.constant 0 : index
    %283 = vector.load %arg3[%c0_106, %c0_107] : memref<32x128xbf16, #tpu.memory_space<vmem>>, vector<32x128xbf16>
    %cst_108 = arith.constant dense<0.000000e+00> : vector<8x128xf32>
    %284 = tpu.matmul %282, %283, %cst_108 {dimension_numbers = #tpu.dot_dimension_numbers<[1], [0], [0], [1], [0, 0, 1, 1], [], []>} : vector<8x32xbf16>, vector<32x128xbf16>, vector<8x128xf32> -> vector<8x128xf32>
    %c0_109 = arith.constant 0 : index
    %c0_110 = arith.constant 0 : index
    %285 = vector.load %arg5[%c0_109, %c0_110] : memref<1x128xf32, #tpu.memory_space<vmem>>, vector<1x128xf32>
    %286 = vector.broadcast %285 : vector<1x128xf32> to vector<8x128xf32>
    %287 = arith.addf %284, %286 : vector<8x128xf32>
    %288 = vector.extract_strided_slice %281 {offsets = [0, 0], sizes = [8, 32], strides = [1, 1]} : vector<8x128xf32> to vector<8x32xf32>
    %289 = vector.extract_strided_slice %287 {offsets = [0, 0], sizes = [8, 32], strides = [1, 1]} : vector<8x128xf32> to vector<8x32xf32>
    %290 = arith.addf %288, %289 : vector<8x32xf32>
    %291 = arith.negf %290 : vector<8x32xf32>
    %292 = math.exp %291 : vector<8x32xf32>
    %cst_111 = arith.constant 1.000000e+00 : f32
    %293 = vector.broadcast %cst_111 : f32 to vector<8x32xf32>
    %294 = arith.addf %293, %292 : vector<8x32xf32>
    %295 = arith.divf %293, %294 : vector<8x32xf32>
    %296 = vector.extract_strided_slice %281 {offsets = [0, 32], sizes = [8, 32], strides = [1, 1]} : vector<8x128xf32> to vector<8x32xf32>
    %297 = vector.extract_strided_slice %287 {offsets = [0, 32], sizes = [8, 32], strides = [1, 1]} : vector<8x128xf32> to vector<8x32xf32>
    %298 = arith.addf %296, %297 : vector<8x32xf32>
    %299 = arith.negf %298 : vector<8x32xf32>
    %300 = math.exp %299 : vector<8x32xf32>
    %cst_112 = arith.constant 1.000000e+00 : f32
    %301 = vector.broadcast %cst_112 : f32 to vector<8x32xf32>
    %302 = arith.addf %301, %300 : vector<8x32xf32>
    %303 = arith.divf %301, %302 : vector<8x32xf32>
    %304 = vector.extract_strided_slice %281 {offsets = [0, 64], sizes = [8, 32], strides = [1, 1]} : vector<8x128xf32> to vector<8x32xf32>
    %305 = vector.extract_strided_slice %287 {offsets = [0, 64], sizes = [8, 32], strides = [1, 1]} : vector<8x128xf32> to vector<8x32xf32>
    %306 = arith.mulf %295, %305 : vector<8x32xf32>
    %307 = arith.addf %304, %306 : vector<8x32xf32>
    %308 = math.tanh %307 : vector<8x32xf32>
    %cst_113 = arith.constant 1.000000e+00 : f32
    %309 = vector.broadcast %cst_113 : f32 to vector<8x32xf32>
    %310 = arith.subf %309, %303 : vector<8x32xf32>
    %311 = arith.mulf %310, %308 : vector<8x32xf32>
    %312 = arith.mulf %303, %235 : vector<8x32xf32>
    %313 = arith.addf %311, %312 : vector<8x32xf32>
    %314 = arith.truncf %235 : vector<8x32xf32> to vector<8x32xbf16>
    %c0_114 = arith.constant 0 : index
    %c0_115 = arith.constant 0 : index
    %315 = vector.load %arg6[%c0_114, %c0_115] : memref<32x128xbf16, #tpu.memory_space<vmem>>, vector<32x128xbf16>
    %cst_116 = arith.constant dense<0.000000e+00> : vector<8x128xf32>
    %316 = tpu.matmul %314, %315, %cst_116 {dimension_numbers = #tpu.dot_dimension_numbers<[1], [0], [0], [1], [0, 0, 1, 1], [], []>} : vector<8x32xbf16>, vector<32x128xbf16>, vector<8x128xf32> -> vector<8x128xf32>
    %c0_117 = arith.constant 0 : index
    %c0_118 = arith.constant 0 : index
    %317 = vector.load %arg8[%c0_117, %c0_118] : memref<1x128xf32, #tpu.memory_space<vmem>>, vector<1x128xf32>
    %318 = vector.broadcast %317 : vector<1x128xf32> to vector<8x128xf32>
    %319 = arith.addf %316, %318 : vector<8x128xf32>
    %320 = arith.truncf %273 : vector<8x32xf32> to vector<8x32xbf16>
    %c0_119 = arith.constant 0 : index
    %c0_120 = arith.constant 0 : index
    %321 = vector.load %arg7[%c0_119, %c0_120] : memref<32x128xbf16, #tpu.memory_space<vmem>>, vector<32x128xbf16>
    %cst_121 = arith.constant dense<0.000000e+00> : vector<8x128xf32>
    %322 = tpu.matmul %320, %321, %cst_121 {dimension_numbers = #tpu.dot_dimension_numbers<[1], [0], [0], [1], [0, 0, 1, 1], [], []>} : vector<8x32xbf16>, vector<32x128xbf16>, vector<8x128xf32> -> vector<8x128xf32>
    %c0_122 = arith.constant 0 : index
    %c0_123 = arith.constant 0 : index
    %323 = vector.load %arg9[%c0_122, %c0_123] : memref<1x128xf32, #tpu.memory_space<vmem>>, vector<1x128xf32>
    %324 = vector.broadcast %323 : vector<1x128xf32> to vector<8x128xf32>
    %325 = arith.addf %322, %324 : vector<8x128xf32>
    %326 = vector.extract_strided_slice %319 {offsets = [0, 0], sizes = [8, 32], strides = [1, 1]} : vector<8x128xf32> to vector<8x32xf32>
    %327 = vector.extract_strided_slice %325 {offsets = [0, 0], sizes = [8, 32], strides = [1, 1]} : vector<8x128xf32> to vector<8x32xf32>
    %328 = arith.addf %326, %327 : vector<8x32xf32>
    %329 = arith.negf %328 : vector<8x32xf32>
    %330 = math.exp %329 : vector<8x32xf32>
    %cst_124 = arith.constant 1.000000e+00 : f32
    %331 = vector.broadcast %cst_124 : f32 to vector<8x32xf32>
    %332 = arith.addf %331, %330 : vector<8x32xf32>
    %333 = arith.divf %331, %332 : vector<8x32xf32>
    %334 = vector.extract_strided_slice %319 {offsets = [0, 32], sizes = [8, 32], strides = [1, 1]} : vector<8x128xf32> to vector<8x32xf32>
    %335 = vector.extract_strided_slice %325 {offsets = [0, 32], sizes = [8, 32], strides = [1, 1]} : vector<8x128xf32> to vector<8x32xf32>
    %336 = arith.addf %334, %335 : vector<8x32xf32>
    %337 = arith.negf %336 : vector<8x32xf32>
    %338 = math.exp %337 : vector<8x32xf32>
    %cst_125 = arith.constant 1.000000e+00 : f32
    %339 = vector.broadcast %cst_125 : f32 to vector<8x32xf32>
    %340 = arith.addf %339, %338 : vector<8x32xf32>
    %341 = arith.divf %339, %340 : vector<8x32xf32>
    %342 = vector.extract_strided_slice %319 {offsets = [0, 64], sizes = [8, 32], strides = [1, 1]} : vector<8x128xf32> to vector<8x32xf32>
    %343 = vector.extract_strided_slice %325 {offsets = [0, 64], sizes = [8, 32], strides = [1, 1]} : vector<8x128xf32> to vector<8x32xf32>
    %344 = arith.mulf %333, %343 : vector<8x32xf32>
    %345 = arith.addf %342, %344 : vector<8x32xf32>
    %346 = math.tanh %345 : vector<8x32xf32>
    %cst_126 = arith.constant 1.000000e+00 : f32
    %347 = vector.broadcast %cst_126 : f32 to vector<8x32xf32>
    %348 = arith.subf %347, %341 : vector<8x32xf32>
    %349 = arith.mulf %348, %346 : vector<8x32xf32>
    %350 = arith.mulf %341, %273 : vector<8x32xf32>
    %351 = arith.addf %349, %350 : vector<8x32xf32>
    %c5_i32 = arith.constant 5 : i32
    %352 = arith.index_cast %c5_i32 : i32 to index
    %c0_127 = arith.constant 0 : index
    %c0_128 = arith.constant 0 : index
    %353 = vector.load %arg1[%352, %c0_127, %c0_128] : memref<8x8x32xbf16, #tpu.memory_space<vmem>>, vector<1x8x32xbf16>
    %354 = vector.shape_cast %353 : vector<1x8x32xbf16> to vector<8x32xbf16>
    %c0_129 = arith.constant 0 : index
    %c0_130 = arith.constant 0 : index
    %355 = vector.load %arg2[%c0_129, %c0_130] : memref<32x128xbf16, #tpu.memory_space<vmem>>, vector<32x128xbf16>
    %cst_131 = arith.constant dense<0.000000e+00> : vector<8x128xf32>
    %356 = tpu.matmul %354, %355, %cst_131 {dimension_numbers = #tpu.dot_dimension_numbers<[1], [0], [0], [1], [0, 0, 1, 1], [], []>} : vector<8x32xbf16>, vector<32x128xbf16>, vector<8x128xf32> -> vector<8x128xf32>
    %c0_132 = arith.constant 0 : index
    %c0_133 = arith.constant 0 : index
    %357 = vector.load %arg4[%c0_132, %c0_133] : memref<1x128xf32, #tpu.memory_space<vmem>>, vector<1x128xf32>
    %358 = vector.broadcast %357 : vector<1x128xf32> to vector<8x128xf32>
    %359 = arith.addf %356, %358 : vector<8x128xf32>
    %360 = arith.truncf %313 : vector<8x32xf32> to vector<8x32xbf16>
    %c0_134 = arith.constant 0 : index
    %c0_135 = arith.constant 0 : index
    %361 = vector.load %arg3[%c0_134, %c0_135] : memref<32x128xbf16, #tpu.memory_space<vmem>>, vector<32x128xbf16>
    %cst_136 = arith.constant dense<0.000000e+00> : vector<8x128xf32>
    %362 = tpu.matmul %360, %361, %cst_136 {dimension_numbers = #tpu.dot_dimension_numbers<[1], [0], [0], [1], [0, 0, 1, 1], [], []>} : vector<8x32xbf16>, vector<32x128xbf16>, vector<8x128xf32> -> vector<8x128xf32>
    %c0_137 = arith.constant 0 : index
    %c0_138 = arith.constant 0 : index
    %363 = vector.load %arg5[%c0_137, %c0_138] : memref<1x128xf32, #tpu.memory_space<vmem>>, vector<1x128xf32>
    %364 = vector.broadcast %363 : vector<1x128xf32> to vector<8x128xf32>
    %365 = arith.addf %362, %364 : vector<8x128xf32>
    %366 = vector.extract_strided_slice %359 {offsets = [0, 0], sizes = [8, 32], strides = [1, 1]} : vector<8x128xf32> to vector<8x32xf32>
    %367 = vector.extract_strided_slice %365 {offsets = [0, 0], sizes = [8, 32], strides = [1, 1]} : vector<8x128xf32> to vector<8x32xf32>
    %368 = arith.addf %366, %367 : vector<8x32xf32>
    %369 = arith.negf %368 : vector<8x32xf32>
    %370 = math.exp %369 : vector<8x32xf32>
    %cst_139 = arith.constant 1.000000e+00 : f32
    %371 = vector.broadcast %cst_139 : f32 to vector<8x32xf32>
    %372 = arith.addf %371, %370 : vector<8x32xf32>
    %373 = arith.divf %371, %372 : vector<8x32xf32>
    %374 = vector.extract_strided_slice %359 {offsets = [0, 32], sizes = [8, 32], strides = [1, 1]} : vector<8x128xf32> to vector<8x32xf32>
    %375 = vector.extract_strided_slice %365 {offsets = [0, 32], sizes = [8, 32], strides = [1, 1]} : vector<8x128xf32> to vector<8x32xf32>
    %376 = arith.addf %374, %375 : vector<8x32xf32>
    %377 = arith.negf %376 : vector<8x32xf32>
    %378 = math.exp %377 : vector<8x32xf32>
    %cst_140 = arith.constant 1.000000e+00 : f32
    %379 = vector.broadcast %cst_140 : f32 to vector<8x32xf32>
    %380 = arith.addf %379, %378 : vector<8x32xf32>
    %381 = arith.divf %379, %380 : vector<8x32xf32>
    %382 = vector.extract_strided_slice %359 {offsets = [0, 64], sizes = [8, 32], strides = [1, 1]} : vector<8x128xf32> to vector<8x32xf32>
    %383 = vector.extract_strided_slice %365 {offsets = [0, 64], sizes = [8, 32], strides = [1, 1]} : vector<8x128xf32> to vector<8x32xf32>
    %384 = arith.mulf %373, %383 : vector<8x32xf32>
    %385 = arith.addf %382, %384 : vector<8x32xf32>
    %386 = math.tanh %385 : vector<8x32xf32>
    %cst_141 = arith.constant 1.000000e+00 : f32
    %387 = vector.broadcast %cst_141 : f32 to vector<8x32xf32>
    %388 = arith.subf %387, %381 : vector<8x32xf32>
    %389 = arith.mulf %388, %386 : vector<8x32xf32>
    %390 = arith.mulf %381, %313 : vector<8x32xf32>
    %391 = arith.addf %389, %390 : vector<8x32xf32>
    %392 = arith.truncf %313 : vector<8x32xf32> to vector<8x32xbf16>
    %c0_142 = arith.constant 0 : index
    %c0_143 = arith.constant 0 : index
    %393 = vector.load %arg6[%c0_142, %c0_143] : memref<32x128xbf16, #tpu.memory_space<vmem>>, vector<32x128xbf16>
    %cst_144 = arith.constant dense<0.000000e+00> : vector<8x128xf32>
    %394 = tpu.matmul %392, %393, %cst_144 {dimension_numbers = #tpu.dot_dimension_numbers<[1], [0], [0], [1], [0, 0, 1, 1], [], []>} : vector<8x32xbf16>, vector<32x128xbf16>, vector<8x128xf32> -> vector<8x128xf32>
    %c0_145 = arith.constant 0 : index
    %c0_146 = arith.constant 0 : index
    %395 = vector.load %arg8[%c0_145, %c0_146] : memref<1x128xf32, #tpu.memory_space<vmem>>, vector<1x128xf32>
    %396 = vector.broadcast %395 : vector<1x128xf32> to vector<8x128xf32>
    %397 = arith.addf %394, %396 : vector<8x128xf32>
    %398 = arith.truncf %351 : vector<8x32xf32> to vector<8x32xbf16>
    %c0_147 = arith.constant 0 : index
    %c0_148 = arith.constant 0 : index
    %399 = vector.load %arg7[%c0_147, %c0_148] : memref<32x128xbf16, #tpu.memory_space<vmem>>, vector<32x128xbf16>
    %cst_149 = arith.constant dense<0.000000e+00> : vector<8x128xf32>
    %400 = tpu.matmul %398, %399, %cst_149 {dimension_numbers = #tpu.dot_dimension_numbers<[1], [0], [0], [1], [0, 0, 1, 1], [], []>} : vector<8x32xbf16>, vector<32x128xbf16>, vector<8x128xf32> -> vector<8x128xf32>
    %c0_150 = arith.constant 0 : index
    %c0_151 = arith.constant 0 : index
    %401 = vector.load %arg9[%c0_150, %c0_151] : memref<1x128xf32, #tpu.memory_space<vmem>>, vector<1x128xf32>
    %402 = vector.broadcast %401 : vector<1x128xf32> to vector<8x128xf32>
    %403 = arith.addf %400, %402 : vector<8x128xf32>
    %404 = vector.extract_strided_slice %397 {offsets = [0, 0], sizes = [8, 32], strides = [1, 1]} : vector<8x128xf32> to vector<8x32xf32>
    %405 = vector.extract_strided_slice %403 {offsets = [0, 0], sizes = [8, 32], strides = [1, 1]} : vector<8x128xf32> to vector<8x32xf32>
    %406 = arith.addf %404, %405 : vector<8x32xf32>
    %407 = arith.negf %406 : vector<8x32xf32>
    %408 = math.exp %407 : vector<8x32xf32>
    %cst_152 = arith.constant 1.000000e+00 : f32
    %409 = vector.broadcast %cst_152 : f32 to vector<8x32xf32>
    %410 = arith.addf %409, %408 : vector<8x32xf32>
    %411 = arith.divf %409, %410 : vector<8x32xf32>
    %412 = vector.extract_strided_slice %397 {offsets = [0, 32], sizes = [8, 32], strides = [1, 1]} : vector<8x128xf32> to vector<8x32xf32>
    %413 = vector.extract_strided_slice %403 {offsets = [0, 32], sizes = [8, 32], strides = [1, 1]} : vector<8x128xf32> to vector<8x32xf32>
    %414 = arith.addf %412, %413 : vector<8x32xf32>
    %415 = arith.negf %414 : vector<8x32xf32>
    %416 = math.exp %415 : vector<8x32xf32>
    %cst_153 = arith.constant 1.000000e+00 : f32
    %417 = vector.broadcast %cst_153 : f32 to vector<8x32xf32>
    %418 = arith.addf %417, %416 : vector<8x32xf32>
    %419 = arith.divf %417, %418 : vector<8x32xf32>
    %420 = vector.extract_strided_slice %397 {offsets = [0, 64], sizes = [8, 32], strides = [1, 1]} : vector<8x128xf32> to vector<8x32xf32>
    %421 = vector.extract_strided_slice %403 {offsets = [0, 64], sizes = [8, 32], strides = [1, 1]} : vector<8x128xf32> to vector<8x32xf32>
    %422 = arith.mulf %411, %421 : vector<8x32xf32>
    %423 = arith.addf %420, %422 : vector<8x32xf32>
    %424 = math.tanh %423 : vector<8x32xf32>
    %cst_154 = arith.constant 1.000000e+00 : f32
    %425 = vector.broadcast %cst_154 : f32 to vector<8x32xf32>
    %426 = arith.subf %425, %419 : vector<8x32xf32>
    %427 = arith.mulf %426, %424 : vector<8x32xf32>
    %428 = arith.mulf %419, %351 : vector<8x32xf32>
    %429 = arith.addf %427, %428 : vector<8x32xf32>
    %c6_i32 = arith.constant 6 : i32
    %430 = arith.index_cast %c6_i32 : i32 to index
    %c0_155 = arith.constant 0 : index
    %c0_156 = arith.constant 0 : index
    %431 = vector.load %arg1[%430, %c0_155, %c0_156] : memref<8x8x32xbf16, #tpu.memory_space<vmem>>, vector<1x8x32xbf16>
    %432 = vector.shape_cast %431 : vector<1x8x32xbf16> to vector<8x32xbf16>
    %c0_157 = arith.constant 0 : index
    %c0_158 = arith.constant 0 : index
    %433 = vector.load %arg2[%c0_157, %c0_158] : memref<32x128xbf16, #tpu.memory_space<vmem>>, vector<32x128xbf16>
    %cst_159 = arith.constant dense<0.000000e+00> : vector<8x128xf32>
    %434 = tpu.matmul %432, %433, %cst_159 {dimension_numbers = #tpu.dot_dimension_numbers<[1], [0], [0], [1], [0, 0, 1, 1], [], []>} : vector<8x32xbf16>, vector<32x128xbf16>, vector<8x128xf32> -> vector<8x128xf32>
    %c0_160 = arith.constant 0 : index
    %c0_161 = arith.constant 0 : index
    %435 = vector.load %arg4[%c0_160, %c0_161] : memref<1x128xf32, #tpu.memory_space<vmem>>, vector<1x128xf32>
    %436 = vector.broadcast %435 : vector<1x128xf32> to vector<8x128xf32>
    %437 = arith.addf %434, %436 : vector<8x128xf32>
    %438 = arith.truncf %391 : vector<8x32xf32> to vector<8x32xbf16>
    %c0_162 = arith.constant 0 : index
    %c0_163 = arith.constant 0 : index
    %439 = vector.load %arg3[%c0_162, %c0_163] : memref<32x128xbf16, #tpu.memory_space<vmem>>, vector<32x128xbf16>
    %cst_164 = arith.constant dense<0.000000e+00> : vector<8x128xf32>
    %440 = tpu.matmul %438, %439, %cst_164 {dimension_numbers = #tpu.dot_dimension_numbers<[1], [0], [0], [1], [0, 0, 1, 1], [], []>} : vector<8x32xbf16>, vector<32x128xbf16>, vector<8x128xf32> -> vector<8x128xf32>
    %c0_165 = arith.constant 0 : index
    %c0_166 = arith.constant 0 : index
    %441 = vector.load %arg5[%c0_165, %c0_166] : memref<1x128xf32, #tpu.memory_space<vmem>>, vector<1x128xf32>
    %442 = vector.broadcast %441 : vector<1x128xf32> to vector<8x128xf32>
    %443 = arith.addf %440, %442 : vector<8x128xf32>
    %444 = vector.extract_strided_slice %437 {offsets = [0, 0], sizes = [8, 32], strides = [1, 1]} : vector<8x128xf32> to vector<8x32xf32>
    %445 = vector.extract_strided_slice %443 {offsets = [0, 0], sizes = [8, 32], strides = [1, 1]} : vector<8x128xf32> to vector<8x32xf32>
    %446 = arith.addf %444, %445 : vector<8x32xf32>
    %447 = arith.negf %446 : vector<8x32xf32>
    %448 = math.exp %447 : vector<8x32xf32>
    %cst_167 = arith.constant 1.000000e+00 : f32
    %449 = vector.broadcast %cst_167 : f32 to vector<8x32xf32>
    %450 = arith.addf %449, %448 : vector<8x32xf32>
    %451 = arith.divf %449, %450 : vector<8x32xf32>
    %452 = vector.extract_strided_slice %437 {offsets = [0, 32], sizes = [8, 32], strides = [1, 1]} : vector<8x128xf32> to vector<8x32xf32>
    %453 = vector.extract_strided_slice %443 {offsets = [0, 32], sizes = [8, 32], strides = [1, 1]} : vector<8x128xf32> to vector<8x32xf32>
    %454 = arith.addf %452, %453 : vector<8x32xf32>
    %455 = arith.negf %454 : vector<8x32xf32>
    %456 = math.exp %455 : vector<8x32xf32>
    %cst_168 = arith.constant 1.000000e+00 : f32
    %457 = vector.broadcast %cst_168 : f32 to vector<8x32xf32>
    %458 = arith.addf %457, %456 : vector<8x32xf32>
    %459 = arith.divf %457, %458 : vector<8x32xf32>
    %460 = vector.extract_strided_slice %437 {offsets = [0, 64], sizes = [8, 32], strides = [1, 1]} : vector<8x128xf32> to vector<8x32xf32>
    %461 = vector.extract_strided_slice %443 {offsets = [0, 64], sizes = [8, 32], strides = [1, 1]} : vector<8x128xf32> to vector<8x32xf32>
    %462 = arith.mulf %451, %461 : vector<8x32xf32>
    %463 = arith.addf %460, %462 : vector<8x32xf32>
    %464 = math.tanh %463 : vector<8x32xf32>
    %cst_169 = arith.constant 1.000000e+00 : f32
    %465 = vector.broadcast %cst_169 : f32 to vector<8x32xf32>
    %466 = arith.subf %465, %459 : vector<8x32xf32>
    %467 = arith.mulf %466, %464 : vector<8x32xf32>
    %468 = arith.mulf %459, %391 : vector<8x32xf32>
    %469 = arith.addf %467, %468 : vector<8x32xf32>
    %470 = arith.truncf %391 : vector<8x32xf32> to vector<8x32xbf16>
    %c0_170 = arith.constant 0 : index
    %c0_171 = arith.constant 0 : index
    %471 = vector.load %arg6[%c0_170, %c0_171] : memref<32x128xbf16, #tpu.memory_space<vmem>>, vector<32x128xbf16>
    %cst_172 = arith.constant dense<0.000000e+00> : vector<8x128xf32>
    %472 = tpu.matmul %470, %471, %cst_172 {dimension_numbers = #tpu.dot_dimension_numbers<[1], [0], [0], [1], [0, 0, 1, 1], [], []>} : vector<8x32xbf16>, vector<32x128xbf16>, vector<8x128xf32> -> vector<8x128xf32>
    %c0_173 = arith.constant 0 : index
    %c0_174 = arith.constant 0 : index
    %473 = vector.load %arg8[%c0_173, %c0_174] : memref<1x128xf32, #tpu.memory_space<vmem>>, vector<1x128xf32>
    %474 = vector.broadcast %473 : vector<1x128xf32> to vector<8x128xf32>
    %475 = arith.addf %472, %474 : vector<8x128xf32>
    %476 = arith.truncf %429 : vector<8x32xf32> to vector<8x32xbf16>
    %c0_175 = arith.constant 0 : index
    %c0_176 = arith.constant 0 : index
    %477 = vector.load %arg7[%c0_175, %c0_176] : memref<32x128xbf16, #tpu.memory_space<vmem>>, vector<32x128xbf16>
    %cst_177 = arith.constant dense<0.000000e+00> : vector<8x128xf32>
    %478 = tpu.matmul %476, %477, %cst_177 {dimension_numbers = #tpu.dot_dimension_numbers<[1], [0], [0], [1], [0, 0, 1, 1], [], []>} : vector<8x32xbf16>, vector<32x128xbf16>, vector<8x128xf32> -> vector<8x128xf32>
    %c0_178 = arith.constant 0 : index
    %c0_179 = arith.constant 0 : index
    %479 = vector.load %arg9[%c0_178, %c0_179] : memref<1x128xf32, #tpu.memory_space<vmem>>, vector<1x128xf32>
    %480 = vector.broadcast %479 : vector<1x128xf32> to vector<8x128xf32>
    %481 = arith.addf %478, %480 : vector<8x128xf32>
    %482 = vector.extract_strided_slice %475 {offsets = [0, 0], sizes = [8, 32], strides = [1, 1]} : vector<8x128xf32> to vector<8x32xf32>
    %483 = vector.extract_strided_slice %481 {offsets = [0, 0], sizes = [8, 32], strides = [1, 1]} : vector<8x128xf32> to vector<8x32xf32>
    %484 = arith.addf %482, %483 : vector<8x32xf32>
    %485 = arith.negf %484 : vector<8x32xf32>
    %486 = math.exp %485 : vector<8x32xf32>
    %cst_180 = arith.constant 1.000000e+00 : f32
    %487 = vector.broadcast %cst_180 : f32 to vector<8x32xf32>
    %488 = arith.addf %487, %486 : vector<8x32xf32>
    %489 = arith.divf %487, %488 : vector<8x32xf32>
    %490 = vector.extract_strided_slice %475 {offsets = [0, 32], sizes = [8, 32], strides = [1, 1]} : vector<8x128xf32> to vector<8x32xf32>
    %491 = vector.extract_strided_slice %481 {offsets = [0, 32], sizes = [8, 32], strides = [1, 1]} : vector<8x128xf32> to vector<8x32xf32>
    %492 = arith.addf %490, %491 : vector<8x32xf32>
    %493 = arith.negf %492 : vector<8x32xf32>
    %494 = math.exp %493 : vector<8x32xf32>
    %cst_181 = arith.constant 1.000000e+00 : f32
    %495 = vector.broadcast %cst_181 : f32 to vector<8x32xf32>
    %496 = arith.addf %495, %494 : vector<8x32xf32>
    %497 = arith.divf %495, %496 : vector<8x32xf32>
    %498 = vector.extract_strided_slice %475 {offsets = [0, 64], sizes = [8, 32], strides = [1, 1]} : vector<8x128xf32> to vector<8x32xf32>
    %499 = vector.extract_strided_slice %481 {offsets = [0, 64], sizes = [8, 32], strides = [1, 1]} : vector<8x128xf32> to vector<8x32xf32>
    %500 = arith.mulf %489, %499 : vector<8x32xf32>
    %501 = arith.addf %498, %500 : vector<8x32xf32>
    %502 = math.tanh %501 : vector<8x32xf32>
    %cst_182 = arith.constant 1.000000e+00 : f32
    %503 = vector.broadcast %cst_182 : f32 to vector<8x32xf32>
    %504 = arith.subf %503, %497 : vector<8x32xf32>
    %505 = arith.mulf %504, %502 : vector<8x32xf32>
    %506 = arith.mulf %497, %429 : vector<8x32xf32>
    %507 = arith.addf %505, %506 : vector<8x32xf32>
    %c7_i32 = arith.constant 7 : i32
    %508 = arith.index_cast %c7_i32 : i32 to index
    %c0_183 = arith.constant 0 : index
    %c0_184 = arith.constant 0 : index
    %509 = vector.load %arg1[%508, %c0_183, %c0_184] : memref<8x8x32xbf16, #tpu.memory_space<vmem>>, vector<1x8x32xbf16>
    %510 = vector.shape_cast %509 : vector<1x8x32xbf16> to vector<8x32xbf16>
    %c0_185 = arith.constant 0 : index
    %c0_186 = arith.constant 0 : index
    %511 = vector.load %arg2[%c0_185, %c0_186] : memref<32x128xbf16, #tpu.memory_space<vmem>>, vector<32x128xbf16>
    %cst_187 = arith.constant dense<0.000000e+00> : vector<8x128xf32>
    %512 = tpu.matmul %510, %511, %cst_187 {dimension_numbers = #tpu.dot_dimension_numbers<[1], [0], [0], [1], [0, 0, 1, 1], [], []>} : vector<8x32xbf16>, vector<32x128xbf16>, vector<8x128xf32> -> vector<8x128xf32>
    %c0_188 = arith.constant 0 : index
    %c0_189 = arith.constant 0 : index
    %513 = vector.load %arg4[%c0_188, %c0_189] : memref<1x128xf32, #tpu.memory_space<vmem>>, vector<1x128xf32>
    %514 = vector.broadcast %513 : vector<1x128xf32> to vector<8x128xf32>
    %515 = arith.addf %512, %514 : vector<8x128xf32>
    %516 = arith.truncf %469 : vector<8x32xf32> to vector<8x32xbf16>
    %c0_190 = arith.constant 0 : index
    %c0_191 = arith.constant 0 : index
    %517 = vector.load %arg3[%c0_190, %c0_191] : memref<32x128xbf16, #tpu.memory_space<vmem>>, vector<32x128xbf16>
    %cst_192 = arith.constant dense<0.000000e+00> : vector<8x128xf32>
    %518 = tpu.matmul %516, %517, %cst_192 {dimension_numbers = #tpu.dot_dimension_numbers<[1], [0], [0], [1], [0, 0, 1, 1], [], []>} : vector<8x32xbf16>, vector<32x128xbf16>, vector<8x128xf32> -> vector<8x128xf32>
    %c0_193 = arith.constant 0 : index
    %c0_194 = arith.constant 0 : index
    %519 = vector.load %arg5[%c0_193, %c0_194] : memref<1x128xf32, #tpu.memory_space<vmem>>, vector<1x128xf32>
    %520 = vector.broadcast %519 : vector<1x128xf32> to vector<8x128xf32>
    %521 = arith.addf %518, %520 : vector<8x128xf32>
    %522 = vector.extract_strided_slice %515 {offsets = [0, 0], sizes = [8, 32], strides = [1, 1]} : vector<8x128xf32> to vector<8x32xf32>
    %523 = vector.extract_strided_slice %521 {offsets = [0, 0], sizes = [8, 32], strides = [1, 1]} : vector<8x128xf32> to vector<8x32xf32>
    %524 = arith.addf %522, %523 : vector<8x32xf32>
    %525 = arith.negf %524 : vector<8x32xf32>
    %526 = math.exp %525 : vector<8x32xf32>
    %cst_195 = arith.constant 1.000000e+00 : f32
    %527 = vector.broadcast %cst_195 : f32 to vector<8x32xf32>
    %528 = arith.addf %527, %526 : vector<8x32xf32>
    %529 = arith.divf %527, %528 : vector<8x32xf32>
    %530 = vector.extract_strided_slice %515 {offsets = [0, 32], sizes = [8, 32], strides = [1, 1]} : vector<8x128xf32> to vector<8x32xf32>
    %531 = vector.extract_strided_slice %521 {offsets = [0, 32], sizes = [8, 32], strides = [1, 1]} : vector<8x128xf32> to vector<8x32xf32>
    %532 = arith.addf %530, %531 : vector<8x32xf32>
    %533 = arith.negf %532 : vector<8x32xf32>
    %534 = math.exp %533 : vector<8x32xf32>
    %cst_196 = arith.constant 1.000000e+00 : f32
    %535 = vector.broadcast %cst_196 : f32 to vector<8x32xf32>
    %536 = arith.addf %535, %534 : vector<8x32xf32>
    %537 = arith.divf %535, %536 : vector<8x32xf32>
    %538 = vector.extract_strided_slice %515 {offsets = [0, 64], sizes = [8, 32], strides = [1, 1]} : vector<8x128xf32> to vector<8x32xf32>
    %539 = vector.extract_strided_slice %521 {offsets = [0, 64], sizes = [8, 32], strides = [1, 1]} : vector<8x128xf32> to vector<8x32xf32>
    %540 = arith.mulf %529, %539 : vector<8x32xf32>
    %541 = arith.addf %538, %540 : vector<8x32xf32>
    %542 = math.tanh %541 : vector<8x32xf32>
    %cst_197 = arith.constant 1.000000e+00 : f32
    %543 = vector.broadcast %cst_197 : f32 to vector<8x32xf32>
    %544 = arith.subf %543, %537 : vector<8x32xf32>
    %545 = arith.mulf %544, %542 : vector<8x32xf32>
    %546 = arith.mulf %537, %469 : vector<8x32xf32>
    %547 = arith.addf %545, %546 : vector<8x32xf32>
    %548 = arith.truncf %469 : vector<8x32xf32> to vector<8x32xbf16>
    %c0_198 = arith.constant 0 : index
    %c0_199 = arith.constant 0 : index
    %549 = vector.load %arg6[%c0_198, %c0_199] : memref<32x128xbf16, #tpu.memory_space<vmem>>, vector<32x128xbf16>
    %cst_200 = arith.constant dense<0.000000e+00> : vector<8x128xf32>
    %550 = tpu.matmul %548, %549, %cst_200 {dimension_numbers = #tpu.dot_dimension_numbers<[1], [0], [0], [1], [0, 0, 1, 1], [], []>} : vector<8x32xbf16>, vector<32x128xbf16>, vector<8x128xf32> -> vector<8x128xf32>
    %c0_201 = arith.constant 0 : index
    %c0_202 = arith.constant 0 : index
    %551 = vector.load %arg8[%c0_201, %c0_202] : memref<1x128xf32, #tpu.memory_space<vmem>>, vector<1x128xf32>
    %552 = vector.broadcast %551 : vector<1x128xf32> to vector<8x128xf32>
    %553 = arith.addf %550, %552 : vector<8x128xf32>
    %554 = arith.truncf %507 : vector<8x32xf32> to vector<8x32xbf16>
    %c0_203 = arith.constant 0 : index
    %c0_204 = arith.constant 0 : index
    %555 = vector.load %arg7[%c0_203, %c0_204] : memref<32x128xbf16, #tpu.memory_space<vmem>>, vector<32x128xbf16>
    %cst_205 = arith.constant dense<0.000000e+00> : vector<8x128xf32>
    %556 = tpu.matmul %554, %555, %cst_205 {dimension_numbers = #tpu.dot_dimension_numbers<[1], [0], [0], [1], [0, 0, 1, 1], [], []>} : vector<8x32xbf16>, vector<32x128xbf16>, vector<8x128xf32> -> vector<8x128xf32>
    %c0_206 = arith.constant 0 : index
    %c0_207 = arith.constant 0 : index
    %557 = vector.load %arg9[%c0_206, %c0_207] : memref<1x128xf32, #tpu.memory_space<vmem>>, vector<1x128xf32>
    %558 = vector.broadcast %557 : vector<1x128xf32> to vector<8x128xf32>
    %559 = arith.addf %556, %558 : vector<8x128xf32>
    %560 = vector.extract_strided_slice %553 {offsets = [0, 0], sizes = [8, 32], strides = [1, 1]} : vector<8x128xf32> to vector<8x32xf32>
    %561 = vector.extract_strided_slice %559 {offsets = [0, 0], sizes = [8, 32], strides = [1, 1]} : vector<8x128xf32> to vector<8x32xf32>
    %562 = arith.addf %560, %561 : vector<8x32xf32>
    %563 = arith.negf %562 : vector<8x32xf32>
    %564 = math.exp %563 : vector<8x32xf32>
    %cst_208 = arith.constant 1.000000e+00 : f32
    %565 = vector.broadcast %cst_208 : f32 to vector<8x32xf32>
    %566 = arith.addf %565, %564 : vector<8x32xf32>
    %567 = arith.divf %565, %566 : vector<8x32xf32>
    %568 = vector.extract_strided_slice %553 {offsets = [0, 32], sizes = [8, 32], strides = [1, 1]} : vector<8x128xf32> to vector<8x32xf32>
    %569 = vector.extract_strided_slice %559 {offsets = [0, 32], sizes = [8, 32], strides = [1, 1]} : vector<8x128xf32> to vector<8x32xf32>
    %570 = arith.addf %568, %569 : vector<8x32xf32>
    %571 = arith.negf %570 : vector<8x32xf32>
    %572 = math.exp %571 : vector<8x32xf32>
    %cst_209 = arith.constant 1.000000e+00 : f32
    %573 = vector.broadcast %cst_209 : f32 to vector<8x32xf32>
    %574 = arith.addf %573, %572 : vector<8x32xf32>
    %575 = arith.divf %573, %574 : vector<8x32xf32>
    %576 = vector.extract_strided_slice %553 {offsets = [0, 64], sizes = [8, 32], strides = [1, 1]} : vector<8x128xf32> to vector<8x32xf32>
    %577 = vector.extract_strided_slice %559 {offsets = [0, 64], sizes = [8, 32], strides = [1, 1]} : vector<8x128xf32> to vector<8x32xf32>
    %578 = arith.mulf %567, %577 : vector<8x32xf32>
    %579 = arith.addf %576, %578 : vector<8x32xf32>
    %580 = math.tanh %579 : vector<8x32xf32>
    %cst_210 = arith.constant 1.000000e+00 : f32
    %581 = vector.broadcast %cst_210 : f32 to vector<8x32xf32>
    %582 = arith.subf %581, %575 : vector<8x32xf32>
    %583 = arith.mulf %582, %580 : vector<8x32xf32>
    %584 = arith.mulf %575, %507 : vector<8x32xf32>
    %585 = arith.addf %583, %584 : vector<8x32xf32>
    %c7_i32_211 = arith.constant 7 : i32
    %586 = arith.truncf %547 : vector<8x32xf32> to vector<8x32xbf16>
    %c0_212 = arith.constant 0 : index
    %c0_213 = arith.constant 0 : index
    %587 = vector.load %arg6[%c0_212, %c0_213] : memref<32x128xbf16, #tpu.memory_space<vmem>>, vector<32x128xbf16>
    %cst_214 = arith.constant dense<0.000000e+00> : vector<8x128xf32>
    %588 = tpu.matmul %586, %587, %cst_214 {dimension_numbers = #tpu.dot_dimension_numbers<[1], [0], [0], [1], [0, 0, 1, 1], [], []>} : vector<8x32xbf16>, vector<32x128xbf16>, vector<8x128xf32> -> vector<8x128xf32>
    %c0_215 = arith.constant 0 : index
    %c0_216 = arith.constant 0 : index
    %589 = vector.load %arg8[%c0_215, %c0_216] : memref<1x128xf32, #tpu.memory_space<vmem>>, vector<1x128xf32>
    %590 = vector.broadcast %589 : vector<1x128xf32> to vector<8x128xf32>
    %591 = arith.addf %588, %590 : vector<8x128xf32>
    %592 = arith.truncf %585 : vector<8x32xf32> to vector<8x32xbf16>
    %c0_217 = arith.constant 0 : index
    %c0_218 = arith.constant 0 : index
    %593 = vector.load %arg7[%c0_217, %c0_218] : memref<32x128xbf16, #tpu.memory_space<vmem>>, vector<32x128xbf16>
    %cst_219 = arith.constant dense<0.000000e+00> : vector<8x128xf32>
    %594 = tpu.matmul %592, %593, %cst_219 {dimension_numbers = #tpu.dot_dimension_numbers<[1], [0], [0], [1], [0, 0, 1, 1], [], []>} : vector<8x32xbf16>, vector<32x128xbf16>, vector<8x128xf32> -> vector<8x128xf32>
    %c0_220 = arith.constant 0 : index
    %c0_221 = arith.constant 0 : index
    %595 = vector.load %arg9[%c0_220, %c0_221] : memref<1x128xf32, #tpu.memory_space<vmem>>, vector<1x128xf32>
    %596 = vector.broadcast %595 : vector<1x128xf32> to vector<8x128xf32>
    %597 = arith.addf %594, %596 : vector<8x128xf32>
    %598 = vector.extract_strided_slice %591 {offsets = [0, 0], sizes = [8, 32], strides = [1, 1]} : vector<8x128xf32> to vector<8x32xf32>
    %599 = vector.extract_strided_slice %597 {offsets = [0, 0], sizes = [8, 32], strides = [1, 1]} : vector<8x128xf32> to vector<8x32xf32>
    %600 = arith.addf %598, %599 : vector<8x32xf32>
    %601 = arith.negf %600 : vector<8x32xf32>
    %602 = math.exp %601 : vector<8x32xf32>
    %cst_222 = arith.constant 1.000000e+00 : f32
    %603 = vector.broadcast %cst_222 : f32 to vector<8x32xf32>
    %604 = arith.addf %603, %602 : vector<8x32xf32>
    %605 = arith.divf %603, %604 : vector<8x32xf32>
    %606 = vector.extract_strided_slice %591 {offsets = [0, 32], sizes = [8, 32], strides = [1, 1]} : vector<8x128xf32> to vector<8x32xf32>
    %607 = vector.extract_strided_slice %597 {offsets = [0, 32], sizes = [8, 32], strides = [1, 1]} : vector<8x128xf32> to vector<8x32xf32>
    %608 = arith.addf %606, %607 : vector<8x32xf32>
    %609 = arith.negf %608 : vector<8x32xf32>
    %610 = math.exp %609 : vector<8x32xf32>
    %cst_223 = arith.constant 1.000000e+00 : f32
    %611 = vector.broadcast %cst_223 : f32 to vector<8x32xf32>
    %612 = arith.addf %611, %610 : vector<8x32xf32>
    %613 = arith.divf %611, %612 : vector<8x32xf32>
    %614 = vector.extract_strided_slice %591 {offsets = [0, 64], sizes = [8, 32], strides = [1, 1]} : vector<8x128xf32> to vector<8x32xf32>
    %615 = vector.extract_strided_slice %597 {offsets = [0, 64], sizes = [8, 32], strides = [1, 1]} : vector<8x128xf32> to vector<8x32xf32>
    %616 = arith.mulf %605, %615 : vector<8x32xf32>
    %617 = arith.addf %614, %616 : vector<8x32xf32>
    %618 = math.tanh %617 : vector<8x32xf32>
    %cst_224 = arith.constant 1.000000e+00 : f32
    %619 = vector.broadcast %cst_224 : f32 to vector<8x32xf32>
    %620 = arith.subf %619, %613 : vector<8x32xf32>
    %621 = arith.mulf %620, %618 : vector<8x32xf32>
    %622 = arith.mulf %613, %585 : vector<8x32xf32>
    %623 = arith.addf %621, %622 : vector<8x32xf32>
    %c0_225 = arith.constant 0 : index
    %c0_226 = arith.constant 0 : index
    %624 = vector.load %arg10[%c0_225, %c0_226] : memref<8x32xf32, #tpu.memory_space<vmem>>, vector<8x32xf32>
    tpu.vector_store %arg10[%c0_225, %c0_226], %547 {strides = array<i32>} : memref<8x32xf32, #tpu.memory_space<vmem>>, vector<8x32xf32>,
    %c0_227 = arith.constant 0 : index
    %c0_228 = arith.constant 0 : index
    %625 = vector.load %arg11[%c0_227, %c0_228] : memref<8x32xf32, #tpu.memory_space<vmem>>, vector<8x32xf32>
    tpu.vector_store %arg11[%c0_227, %c0_228], %623 {strides = array<i32>} : memref<8x32xf32, #tpu.memory_space<vmem>>, vector<8x32xf32>,
    return
  }
  func.func @transform_0(%arg0: i32) -> (i32, i32, i32) {
    %c0_i32 = arith.constant 0 : i32
    %c0_i32_0 = arith.constant 0 : i32
    %c0_i32_1 = arith.constant 0 : i32
    return %c0_i32, %arg0, %c0_i32_0 : i32, i32, i32
  }
  func.func @transform_1(%arg0: i32) -> (i32, i32) {
    %c0_i32 = arith.constant 0 : i32
    %c0_i32_0 = arith.constant 0 : i32
    %c0_i32_1 = arith.constant 0 : i32
    return %c0_i32, %c0_i32_0 : i32, i32
  }
  func.func @transform_2(%arg0: i32) -> (i32, i32) {
    %c0_i32 = arith.constant 0 : i32
    %c0_i32_0 = arith.constant 0 : i32
    %c0_i32_1 = arith.constant 0 : i32
    return %c0_i32, %c0_i32_0 : i32, i32
  }
  func.func @transform_3(%arg0: i32) -> (i32, i32) {
    %c0_i32 = arith.constant 0 : i32
    %c0_i32_0 = arith.constant 0 : i32
    %c0_i32_1 = arith.constant 0 : i32
    return %c0_i32, %c0_i32_0 : i32, i32
  }
  func.func @transform_4(%arg0: i32) -> (i32, i32) {
    %c0_i32 = arith.constant 0 : i32
    %c0_i32_0 = arith.constant 0 : i32
    %c0_i32_1 = arith.constant 0 : i32
    return %c0_i32, %c0_i32_0 : i32, i32
  }
  func.func @transform_5(%arg0: i32) -> (i32, i32) {
    %c0_i32 = arith.constant 0 : i32
    %c0_i32_0 = arith.constant 0 : i32
    %c0_i32_1 = arith.constant 0 : i32
    return %c0_i32, %c0_i32_0 : i32, i32
  }
  func.func @transform_6(%arg0: i32) -> (i32, i32) {
    %c0_i32 = arith.constant 0 : i32
    %c0_i32_0 = arith.constant 0 : i32
    %c0_i32_1 = arith.constant 0 : i32
    return %c0_i32, %c0_i32_0 : i32, i32
  }
  func.func @transform_7(%arg0: i32) -> (i32, i32) {
    %c0_i32 = arith.constant 0 : i32
    %c0_i32_0 = arith.constant 0 : i32
    %c0_i32_1 = arith.constant 0 : i32
    return %c0_i32, %c0_i32_0 : i32, i32
  }
  func.func @transform_8(%arg0: i32) -> (i32, i32) {
    %c0_i32 = arith.constant 0 : i32
    %c0_i32_0 = arith.constant 0 : i32
    %c0_i32_1 = arith.constant 0 : i32
    return %c0_i32, %c0_i32_0 : i32, i32
  }
  func.func @transform_9(%arg0: i32) -> (i32, i32) {
    %c0_i32 = arith.constant 0 : i32
    %c0_i32_0 = arith.constant 0 : i32
    return %arg0, %c0_i32 : i32, i32
  }
  func.func @transform_10(%arg0: i32) -> (i32, i32) {
    %c0_i32 = arith.constant 0 : i32
    %c0_i32_0 = arith.constant 0 : i32
    return %arg0, %c0_i32 : i32, i32
  }
}

</mosaic_0001>

<bundles_post_ra>
// kernel: tile.56
= control target key start
LH: loop header
LB: loop body
LE: loop exit
PB: predicated region body
PF: predicated region fallthrough
CT: control target
= control target key end

     0   :  { %s22_s0 = inlined_call_operand.vmem [shape: f32[32], index: 0, kind: input, shape index: {}]   ;;  %s23_s1 = inlined_call_operand.vmem [shape: f32[4,32], index: 1, kind: output, shape index: {}]  }
   0x1   :  { %v4_v0 = vld [vmem:[%s22_s0] ss:$0 sm:$0xff] }
   0x2   :  { %5 = vst [vmem:[%s23_s1] sm:$0xf] %v4_v0 }

// kernel: mul.16
= control target key start
LH: loop header
LB: loop body
LE: loop exit
PB: predicated region body
PF: predicated region fallthrough
CT: control target
= control target key end

     0   :  { %vm7_vm0 = vcmask 261120   ;;  %s37_s8 = smov 32   ;;  %s38_s9 = smov 64   ;;  %vm13_vm1 = vcmask 1048320   ;;  %vm19_vm2 = vcmask 785920   ;;  %vm25_vm3 = vcmask 523520   ;;  %s55_s0 = inlined_call_operand.vmem [shape: f32[4,32], index: 0, kind: input, shape index: {}]   ;;  %s56_s1 = inlined_call_operand.vmem [shape: f32[128], index: 1, kind: output, shape index: {}]  }
   0x1   :  { %v4_v0 = vld [vmem:[%s55_s0] sm:$0xf]  ;;  %s36_s0 = smov 96  }
   0x2   :  { %5 = vst [vmem:[#allocation1] sm:$0xf] %v4_v0 }
   0x9   :  { %v10_v1 = vld [vmem:[#allocation1 + $0x3] sm:$0x1]   ;;  %v22_v2 = vld [vmem:[#allocation1 + $0x1] sm:$0x1]   ;;  %v6_v3 = vld [vmem:[#allocation1] sm:$0x1]  }
   0xa   :  { %11 = vrot.lane.b32.xlu0 %v10_v1, %s36_s0  ;;  %23 = vrot.lane.b32.xlu1 %v22_v2, %s37_s8  ;;  %v16_v4 = vld [vmem:[#allocation1 + $0x2] sm:$0x1]   ;;  %8 = vst.msk [vmem:[#allocation0] sm:$0x1] %vm7_vm0, %v6_v3  }
   0xe   :  { %17 = vrot.lane.b32.xlu0 %v16_v4, %s38_s9 }
  0x7c   :  { %v12_v5 = vpop.permute.xlu0 %11   ;;  %v24_v6 = vpop.permute.xlu1 %23  }
  0x7d   :  { %14 = vst.msk [vmem:[#allocation0] sm:$0x1] %vm13_vm1, %v12_v5  }
  0x80   :  { %v18_v7 = vpop.permute.xlu0 %17  }
  0x81   :  { %20 = vst.msk [vmem:[#allocation0] sm:$0x1] %vm19_vm2, %v18_v7  }
  0x82   :  { %26 = vst.msk [vmem:[#allocation0] sm:$0x1] %vm25_vm3, %v24_v6  }
  0x89   :  { %v30_v8 = vld [vmem:[#allocation0] sm:$0x1] }
  0x8a   :  { %32 = vst [vmem:[%s56_s1] sm:$0x1] %v30_v8 }

// kernel: _lambda_.4
= control target key start
LH: loop header
LB: loop body
LE: loop exit
PB: predicated region body
PF: predicated region fallthrough
CT: control target
= control target key end

     0   :  { %12 = vsyncpa [#allocation4], 0  ;;  %s2313_s0 = inlined_call_operand.hbm [shape: bf16[2,8,16], index: 0, kind: input, shape index: {}]   ;;  %s2314_s1 = inlined_call_operand.hbm [shape: bf16[16,128], index: 1, kind: input, shape index: {}]   ;;  %s2315_s2 = inlined_call_operand.hbm [shape: f32[1,128], index: 2, kind: input, shape index: {}]   ;;  %s2316_s3 = inlined_call_operand.hbm [shape: bf16[16,128], index: 3, kind: input, shape index: {}]   ;;  %s2317_s4 = inlined_call_operand.hbm [shape: f32[1,128], index: 4, kind: input, shape index: {}]   ;;  %s2318_s5 = inlined_call_operand.hbm [shape: bf16[5,128,128], index: 5, kind: input, shape index: {}]   ;;  %s2319_s6 = inlined_call_operand.hbm [shape: f32[1,128], index: 6, kind: input, shape index: {}]   ;;  %s2320_s7 = inlined_call_operand.hbm [shape: bf16[2,8,128], index: 7, kind: output, shape index: {}]  }
   0x1   :  { %14 = vsyncpa [#allocation4 + $0x1], 0 }
   0x2   :  { %15 = vsyncpa [#allocation7], 0 }
   0x3   :  { %16 = vsyncpa [#allocation10], 0 }
   0x4   :  { %17 = vsyncpa [#allocation13], 0 }
   0x5   :  { %18 = vsyncpa [#allocation5], 0 }
   0x6   :  { %20 = vsyncpa [#allocation5 + $0x1], 0  ;;  %s1920_s24 = smov 0   ;;  %s1922_s25 = smov 0  }
   0x7   :  { %s1924_s26 = smov 0   ;;  %s1926_s27 = smov 0  }
   0x8 LB: > { %s1868_s28 = smov [#allocation6]   ;;  %s1941_s30 = sadd.s32 4294967295, %s1866_s27   ;;  %s1866_s27 = sphi %s1926_s27, %s2346_s27   ;;  %s1862_s26 = sphi %s1924_s26, %s2345_s26   ;;  %s1858_s25 = sphi %s1922_s25, %s2344_s25   ;;  %s1854_s24 = sphi %s1920_s24, %s2343_s24  }
   0x9   : > { %s221_s29 = sshll.u32 %s1868_s28, 4  ;;  %p1187_p0 = scmp.ge.s32.totalorder %s1866_s27, 1  ;;  %s1946_s29 = int_to_ptr.vmem [resolvable:$true] %s221_s29 }
   0xa   : > { %p2321_p1 = scmp.eq.s32.totalorder %s1941_s30, 0  ;;  %p209_p2 = scmp.lt.s32.totalorder %s1866_s27, 3 }
   0xb   : > { %s1869_s9 = smov [#allocation9]   ;;  %s1870_s12 = smov [#allocation12]  }
   0xc   : > { %p1948_p3 = pnand %p1187_p0, %p209_p2  ;;  %s245_s10 = sshll.u32 %s1869_s9, 4  ;;  %s1961_s10 = int_to_ptr.vmem [resolvable:$true] %s245_s10 }
   0xd   : > { %s269_s13 = sshll.u32 %s1870_s12, 4  ;;  %s1590_s16 = scalar_lea.hbm %s2314_s1, 128  ;;  %s1963_s13 = int_to_ptr.vmem [resolvable:$true] %s269_s13 }
   0xe   : > { %s2324_s8 = scalar_select %p1948_p3, 1, 0 }
   0xf   : > { %p1465_p5 = pneg %p1948_p3  ;;  %p1591_p7 = scmp.ne.s32.totalorder %s2314_s1, %s1590_s16 }
  0x10   : > { %p1597_p11 = scmp.lt.u32.totalorder %s1590_s16, %s2314_s1 }
  0x11   : > { %p1957_p6 = pnand %p1465_p5, %p2321_p1 }
  0x13   : > { %p1973_p8 = pneg %p1957_p6 }
  0x15   : > { %p1593_p9 = pnand %p1973_p8, %p1591_p7 }
  0x17   : > { %p1594_p10 = pneg %p1593_p9 }
  0x19   : > { %p1599_p12 = pnand %p1597_p11, %p1594_p10 }
  0x1b   : > { %1602 = shalt.err (!%p1599_p12)
}
  0x1c   : > { %s1603_s22 = scalar_lea.vmem %s1946_s29, 128  ;;  %p1611_p5 = scmp.lt.s32.totalorder %s1946_s29, %s1946_s29 }
  0x1d   : > { %p1604_p13 = scmp.ne.s32.totalorder %s1946_s29, %s1603_s22  ;;  %p1612_p4 = scmp.lt.s32.totalorder %s1603_s22, %s1603_s22 }
  0x1f   : > { %p1606_p0 = pnand %p1604_p13, %p1973_p8  ;;  %p1613_p7 = por %p1612_p4, %p1611_p5 }
  0x21   : > { %p1607_p2 = pneg %p1606_p0 }
  0x23   : > { %p1614_p9 = pnand %p1613_p7, %p1607_p2 }
  0x25   : > { %1617 = shalt.err (!%p1614_p9)
}
  0x26   : > { %s1871_s23 = smov 64   ;;  %s1872_s28 = smov 4  }
  0x27   : > { %1468 = dma.hbm_to_vmem [thread:$0]  (!%p1957_p6), %s2314_s1, 128, %s1946_s29, [#allocation7], %s1871_s23, %s1871_s23, %s1872_s28  }
  0x28   : > { %s1618_s16 = scalar_lea.hbm %s2316_s3, 128 }
  0x29   : > { %p1619_p4 = scmp.ne.s32.totalorder %s2316_s3, %s1618_s16  ;;  %p1625_p12 = scmp.lt.u32.totalorder %s1618_s16, %s2316_s3 }
  0x2b   : > { %p1621_p10 = pnand %p1619_p4, %p1973_p8 }
  0x2d   : > { %p1622_p11 = pneg %p1621_p10 }
  0x2f   : > { %p1627_p13 = pnand %p1625_p12, %p1622_p11 }
  0x31   : > { %1630 = shalt.err (!%p1627_p13)
}
  0x32   : > { %s1631_s29 = scalar_lea.vmem %s1961_s10, 128  ;;  %p1639_p7 = scmp.lt.s32.totalorder %s1961_s10, %s1961_s10 }
  0x33   : > { %p1632_p0 = scmp.ne.s32.totalorder %s1961_s10, %s1631_s29  ;;  %p1640_p9 = scmp.lt.s32.totalorder %s1631_s29, %s1631_s29 }
  0x35   : > { %p1634_p2 = pnand %p1632_p0, %p1973_p8  ;;  %p1641_p4 = por %p1640_p9, %p1639_p7 }
  0x37   : > { %p1635_p5 = pneg %p1634_p2 }
  0x39   : > { %p1642_p10 = pnand %p1641_p4, %p1635_p5 }
  0x3b   : > { %1645 = shalt.err (!%p1642_p10)
}
  0x3c   : > { %1474 = dma.hbm_to_vmem [thread:$0]  (!%p1957_p6), %s2316_s3, 128, %s1961_s10, [#allocation10], %s1871_s23, %s1871_s23, %s1872_s28  }
  0x3d   : > { %s1646_s15 = scalar_lea.hbm %s2318_s5, 5120 }
  0x3e   : > { %p1647_p11 = scmp.ne.s32.totalorder %s2318_s5, %s1646_s15  ;;  %p1653_p0 = scmp.lt.u32.totalorder %s1646_s15, %s2318_s5 }
  0x40   : > { %p1649_p12 = pnand %p1647_p11, %p1973_p8 }
  0x42   : > { %p1650_p13 = pneg %p1649_p12 }
  0x44   : > { %p1655_p2 = pnand %p1653_p0, %p1650_p13 }
  0x46   : > { %1658 = shalt.err (!%p1655_p2)
}
  0x47   : > { %s1659_s10 = scalar_lea.vmem %s1963_s13, 5120  ;;  %p1667_p4 = scmp.lt.s32.totalorder %s1963_s13, %s1963_s13 }
  0x48   : > { %p1660_p5 = scmp.ne.s32.totalorder %s1963_s13, %s1659_s10  ;;  %p1668_p10 = scmp.lt.s32.totalorder %s1659_s10, %s1659_s10 }
  0x4a   : > { %p1662_p7 = pnand %p1660_p5, %p1973_p8  ;;  %p1669_p11 = por %p1668_p10, %p1667_p4 }
  0x4c   : > { %p1663_p9 = pneg %p1662_p7 }
  0x4e   : > { %p1670_p12 = pnand %p1669_p11, %p1663_p9 }
  0x50   : > { %1673 = shalt.err (!%p1670_p12)
}
  0x51   : > { %1480 = dma.hbm_to_vmem [thread:$0]  (!%p1957_p6), %s2318_s5, 5120, %s1963_s13, [#allocation13], %s1871_s23, %s1871_s23, %s1872_s28  }
  0x52   : > { %s1873_s22 = smov [#allocation8]   ;;  %s1874_s12 = smov [#allocation11]  }
  0x53   : > { %s235_s9 = sshll.u32 %s1873_s22, 4  ;;  %s259_s14 = sshll.u32 %s1874_s12, 4  ;;  %s236_s9 = int_to_ptr.vmem [resolvable:$true] %s235_s9  ;;  %s260_s14 = int_to_ptr.vmem [resolvable:$true] %s259_s14 }
  0x54   : > { %s1674_s17 = scalar_lea.hbm %s2315_s2, 16 }
  0x55   : > { %p1675_p13 = scmp.ne.s32.totalorder %s2315_s2, %s1674_s17  ;;  %p1681_p5 = scmp.lt.u32.totalorder %s1674_s17, %s2315_s2 }
  0x57   : > { %p1677_p0 = pnand %p1675_p13, %p1973_p8 }
  0x59   : > { %p1678_p2 = pneg %p1677_p0 }
  0x5b   : > { %p1683_p7 = pnand %p1681_p5, %p1678_p2 }
  0x5d   : > { %1686 = shalt.err (!%p1683_p7)
}
  0x5e   : > { %s1687_s13 = scalar_lea.vmem %s236_s9, 16  ;;  %s1694_s23 = scalar_lea.vmem %s236_s9, 32 }
  0x5f   : > { %p1688_p9 = scmp.ne.s32.totalorder %s236_s9, %s1687_s13  ;;  %p1695_p11 = scmp.lt.s32.totalorder %s236_s9, %s236_s9 }
  0x60   : > { %p1696_p12 = scmp.lt.s32.totalorder %s1694_s23, %s1687_s13 }
  0x61   : > { %p1690_p4 = pnand %p1688_p9, %p1973_p8 }
  0x62   : > { %p1697_p1 = por %p1696_p12, %p1695_p11 }
  0x63   : > { %p1691_p10 = pneg %p1690_p4 }
  0x65   : > { %p1698_p3 = pnand %p1697_p1, %p1691_p10 }
  0x67   : > { %1701 = shalt.err (!%p1698_p3)
}
  0x68   : > { %1471 = dma.hbm_to_vmem [thread:$0]  (!%p1957_p6), %s2315_s2, 16, %s236_s9, [#allocation7]  }
  0x69   : > { %s1702_s15 = scalar_lea.hbm %s2317_s4, 16 }
  0x6a   : > { %p1703_p13 = scmp.ne.s32.totalorder %s2317_s4, %s1702_s15  ;;  %p1709_p3 = scmp.lt.u32.totalorder %s1702_s15, %s2317_s4 }
  0x6c   : > { %p1705_p0 = pnand %p1703_p13, %p1973_p8 }
  0x6e   : > { %p1706_p1 = pneg %p1705_p0 }
  0x70   : > { %p1711_p2 = pnand %p1709_p3, %p1706_p1 }
  0x72   : > { %1714 = shalt.err (!%p1711_p2)
}
  0x73   : > { %s1715_s10 = scalar_lea.vmem %s260_s14, 16  ;;  %s1722_s9 = scalar_lea.vmem %s260_s14, 32 }
  0x74   : > { %p1716_p5 = scmp.ne.s32.totalorder %s260_s14, %s1715_s10  ;;  %p1723_p4 = scmp.lt.s32.totalorder %s260_s14, %s260_s14 }
  0x75   : > { %p1724_p10 = scmp.lt.s32.totalorder %s1722_s9, %s1715_s10 }
  0x76   : > { %p1718_p7 = pnand %p1716_p5, %p1973_p8 }
  0x77   : > { %p1725_p11 = por %p1724_p10, %p1723_p4 }
  0x78   : > { %p1719_p9 = pneg %p1718_p7 }
  0x7a   : > { %p1726_p12 = pnand %p1725_p11, %p1719_p9 }
  0x7c   : > { %1729 = shalt.err (!%p1726_p12)
}
  0x7d   : > { %1477 = dma.hbm_to_vmem [thread:$0]  (!%p1957_p6), %s2317_s4, 16, %s260_s14, [#allocation10]  }
  0x7e   : > { %s1875_s23 = smov [#allocation14]   ;;  %s1730_s12 = scalar_lea.hbm %s2319_s6, 16 }
  0x7f   : > { %s283_s28 = sshll.u32 %s1875_s23, 4  ;;  %p1731_p13 = scmp.ne.s32.totalorder %s2319_s6, %s1730_s12  ;;  %s284_s28 = int_to_ptr.vmem [resolvable:$true] %s283_s28 }
  0x80   : > { %p1737_p3 = scmp.lt.u32.totalorder %s1730_s12, %s2319_s6 }
  0x81   : > { %p1733_p0 = pnand %p1731_p13, %p1973_p8 }
  0x83   : > { %p1734_p1 = pneg %p1733_p0 }
  0x85   : > { %p1739_p2 = pnand %p1737_p3, %p1734_p1 }
  0x87   : > { %1742 = shalt.err (!%p1739_p2)
}
  0x88   : > { %s1743_s14 = scalar_lea.vmem %s284_s28, 16  ;;  %s1750_s20 = scalar_lea.vmem %s284_s28, 32 }
  0x89   : > { %p1744_p5 = scmp.ne.s32.totalorder %s284_s28, %s1743_s14  ;;  %p1751_p4 = scmp.lt.s32.totalorder %s284_s28, %s284_s28 }
  0x8a   : > { %p1752_p10 = scmp.lt.s32.totalorder %s1750_s20, %s1743_s14 }
  0x8b   : > { %p1746_p7 = pnand %p1744_p5, %p1973_p8 }
  0x8c   : > { %p1753_p11 = por %p1752_p10, %p1751_p4 }
  0x8d   : > { %p1747_p9 = pneg %p1746_p7 }
  0x8f   : > { %p1754_p12 = pnand %p1753_p11, %p1747_p9 }
  0x91   : > { %1757 = shalt.err (!%p1754_p12)
}
  0x92   : > { %1483 = dma.hbm_to_vmem [thread:$0]  (!%p1957_p6), %s2319_s6, 16, %s284_s28, [#allocation13]  }
  0x93   : > { %s1186_s19 = sadd.s32 4294967294, %s1866_s27   ;;  %s2105_s11 = sadd.s32 1, %s1866_s27  }
  0x94   : > { %s30_s21 = ssub.s32 %s1866_s27, %s2105_s11  ;;  %s33_s13 = sadd.s32 1, %s1862_s26 }
  0x95   : > { %p31_p8 = scmp.eq.s32.totalorder %s30_s21, 0  ;;  %p40_p13 = scmp.ne.s32.totalorder %s1862_s26, %s1858_s25 }
  0x96   : > { %p41_p0 = scmp.eq.s32.totalorder %s1866_s27, 0  ;;  %p46_p1 = scmp.ne.s32.totalorder %s1858_s25, %s1854_s24 }
  0x97   : > { %s2116_s23 = scalar_select %p31_p8, %s1862_s26, %s33_s13  }
  0x98   : > { %p2118_p3 = por %p41_p0, %p40_p13  ;;  %p2328_p2 = scmp.eq.s32.totalorder %s1941_s30, 0 }
  0x99   : > { %p196_p5 = scmp.eq.s32.totalorder %s1941_s30, 1  ;;  %p202_p7 = scmp.eq.s32.totalorder %s1186_s19, 1 }
  0x9a   : > { %p2124_p6 = por %p2328_p2, %p46_p1  ;;  %p1498_p9 = scmp.lt.s32.totalorder %s1866_s27, 2 }
  0x9b   : > { %s294_s22 = sand.u32 1, %s1862_s26   ;;  %p2131_p4 = por %p196_p5, %p40_p13 }
  0x9c   : > { %p2135_p10 = por %p202_p7, %p46_p1  ;;  %s1195_s16 = sshll.u32 %s294_s22, 2 }
  0x9d   : > { %s2330_s12 = scalar_select %p2131_p4, 1, 0 }
  0x9e   : > { %s2331_s15 = scalar_select %p2135_p10, 1, 0 }
  0x9f   : > { %s1196_s17 = sshll.u32 %s1866_s27, 6  ;;  %s298_s10 = scalar_lea.vmem [#allocation3], %s1195_s16 }
  0xa0   : > { %s2143_s20 = scalar_lea.hbm %s2313_s0, %s1196_s17  ;;  %s305_s9 = sshll.u32 %s298_s10, 4  ;;  %s2145_s9 = int_to_ptr.vmem [resolvable:$true] %s305_s9 }
  0xa1   : > { %p2149_p11 = pnand %p1498_p9, %p2118_p3  ;;  %s295_s21 = scalar_lea.sflag [#allocation4], %s294_s22 }
  0xa2   : > { %s1758_s13 = scalar_lea.hbm %s2143_s20, 64  ;;  %s1763_s18 = scalar_lea.hbm %s2313_s0, 128 }
  0xa3   : > { %p1759_p12 = scmp.ne.s32.totalorder %s2143_s20, %s1758_s13  ;;  %p1760_p8 = pneg %p2149_p11 }
  0xa4   : > { %p1764_p1 = scmp.lt.u32.totalorder %s2143_s20, %s2313_s0  ;;  %p1765_p3 = scmp.lt.u32.totalorder %s1763_s18, %s1758_s13 }
  0xa5   : > { %p1761_p13 = pnand %p1760_p8, %p1759_p12  ;;  %p1767_p5 = scmp.lt.u32.totalorder %s1758_s13, %s2143_s20 }
  0xa6   : > { %p1766_p2 = por %p1765_p3, %p1764_p1 }
  0xa7   : > { %p1762_p0 = pneg %p1761_p13 }
  0xa8   : > { %p1768_p7 = por %p1767_p5, %p1766_p2 }
  0xaa   : > { %p1769_p9 = pnand %p1768_p7, %p1762_p0 }
  0xac   : > { %1772 = shalt.err (!%p1769_p9)
}
  0xad   : > { %s1773_s22 = scalar_lea.vmem %s2145_s9, 64  ;;  %s1876_s10 = smov [#allocation3]  }
  0xae   : > { %p1774_p12 = scmp.ne.s32.totalorder %s2145_s9, %s1773_s22  ;;  %s1778_s16 = sshll.u32 %s1876_s10, 4  ;;  %s1779_s16 = int_to_ptr.vmem [resolvable:$false] %s1778_s16 }
  0xaf   : > { %s1780_s17 = scalar_lea.vmem %s1779_s16, 128  ;;  %p1781_p4 = scmp.lt.s32.totalorder %s2145_s9, %s1779_s16 }
  0xb0   : > { %p1776_p13 = pnand %p1774_p12, %p1760_p8  ;;  %p1782_p1 = scmp.lt.s32.totalorder %s1780_s17, %s1773_s22 }
  0xb2   : > { %p1777_p10 = pneg %p1776_p13  ;;  %p1783_p3 = por %p1782_p1, %p1781_p4 }
  0xb4   : > { %p1784_p2 = pnand %p1783_p3, %p1777_p10 }
  0xb6   : > { %1787 = shalt.err (!%p1784_p2)
}
  0xb7   : > { %1487 = dma.hbm_to_vmem [thread:$0]  (!%p2149_p11), %s2143_s20, 64, %s2145_s9, %s295_s21  }
  0xb8   : > { %p2333_p0 = scmp.ne.s32.totalorder %s2324_s8, 0 }
  0xb9   : > { %s2181_s13 = sand.u32 (!%p2333_p0), 1, %s1858_s25  }
  0xba   : > { %314 = sbr.rel (%p2333_p0) target bundleno = 731 (0x2db), region = 48  ;;  %s1198_s18 = sshll.u32 (!%p2333_p0), %s2181_s13, 2 }
  0xbb   : > { %s317_s29 = scalar_lea.sflag (!%p2333_p0), [#allocation4], %s2181_s13  ;;  %s320_s14 = scalar_lea.vmem (!%p2333_p0), [#allocation3], %s1198_s18 }
  0xc1   : > { %1833 = dma.done.wait (%p2124_p6), %s317_s29, 64  }
  0xc2   : > { %1835 = vsyncadd (%p2124_p6), %s317_s29, 4294967232  ;;  %p2334_p4 = scmp.eq.s32.totalorder %s1941_s30, 0 }
  0xc4   : > { %1837 = dma.done.wait (%p2334_p4), [#allocation7], 144   ;;  %p2335_p10 = pmov %p2334_p4 }
  0xc5   : > { %p2336_p11 = pmov %p2334_p4 }
  0xc6   : > { %1839 = vsyncadd (%p2335_p10), [#allocation7], 4294967152 }
  0xc7   : > { %1841 = dma.done.wait (%p2336_p11), [#allocation10], 144   ;;  %p2337_p8 = pmov %p2334_p4 }
  0xc8   : > { %p2338_p5 = pmov %p2334_p4 }
  0xc9   : > { %1843 = vsyncadd (%p2337_p8), [#allocation10], 4294967152 }
  0xca   : > { %1845 = dma.done.wait (%p2338_p5), [#allocation13], 5136   ;;  %p2339_p7 = pmov %p2334_p4 }
  0xcb   : > { %v1877_v0 = vmov 0.0   ;;  %vm1878_vm0 = vmmov 0   ;;  %v1548_v1 = vld [vmem:[#allocation9] sm:$0xff]   ;;  %v376_v2 = vld [vmem:[%s320_s14] sm:$0xf]  ;;  %vm392_vm1 = vcmask 130048  }
  0xcc   : > { %1847 = vsyncadd (%p2339_p7), [#allocation13], 4294962160  ;;  %1306 = vmatprep.subr.bf16.mxu1 %v1877_v0  ;;  %492 = vst [vmem:[#allocation2] sm:$0x3] %v1877_v0  ;;  %1308 = vmatprep.mubr.msk.bf16.mxu1 %vm1878_vm0, %v1877_v0  ;;  %v1549_v3 = vld [vmem:[#allocation6] sm:$0xff]   ;;  %v1551_v4 = vld [vmem:[#allocation12 + $0x80] sm:$0xff]  }
  0xcd   : > { %493 = vst [vmem:[#allocation2 + $0xa] sm:$0x3] %v1877_v0  ;;  %1358 = vmatprep.subr.bf16.mxu0 %v1877_v0  ;;  %1374 = vmatprep.mubr.msk.bf16.mxu0 %vm1878_vm0, %v1877_v0  ;;  %v1553_v5 = vld [vmem:[#allocation12 + $0x88] sm:$0xff]   ;;  %v1550_v6 = vld [vmem:[#allocation12] sm:$0xff]   ;;  %v1555_v7 = vld [vmem:[#allocation12 + $0x90] sm:$0xff]   ;;  %s1254_s8 = sshll.u32 %s1941_s30, 6 }
  0xce   : > { %1307 = vmatpush3.bf16.msra.mxu1 %v1548_v1  ;;  %1359 = vmatpush3.bf16.msra.mxu0 %v1551_v4  ;;  %v1552_v8 = vld [vmem:[#allocation12 + $0x8] sm:$0xff]   ;;  %v1557_v9 = vld [vmem:[#allocation12 + $0x98] sm:$0xff]   ;;  %v1554_v10 = vld [vmem:[#allocation12 + $0x10] sm:$0xff]   ;;  %s374_s28 = scalar_lea.vmem [#allocation15], %s1198_s18  ;;  %s2269_s21 = scalar_lea.hbm %s2320_s7, %s1254_s8 }
  0xcf   : > { %1312 = vmatprep.subr.bf16.mxu1 %v1877_v0  ;;  %1360 = vmatprep.subr.bf16.mxu0 %v1877_v0  ;;  %v1559_v11 = vld [vmem:[#allocation12 + $0xa0] sm:$0xff]   ;;  %v1556_v12 = vld [vmem:[#allocation12 + $0x18] sm:$0xff]   ;;  %v1561_v14 = vld [vmem:[#allocation12 + $0xa8] sm:$0xff]   ;;  %s1059_s20 = sshll.u32 %s374_s28, 4  ;;  %s1046_s22 = scalar_lea.sflag [#allocation5], %s2181_s13  ;;  %s2271_s20 = int_to_ptr.vmem [resolvable:$true] %s1059_s20 }
  0xd0   : > { %v1558_v13 = vld [vmem:[#allocation12 + $0x20] sm:$0xff]   ;;  %v1563_v15 = vld [vmem:[#allocation12 + $0xb0] sm:$0xff]   ;;  %v1560_v16 = vld [vmem:[#allocation12 + $0x28] sm:$0xff]   ;;  %s1788_s10 = scalar_lea.vmem %s2271_s20, 64  ;;  %p2340_p9 = scmp.ne.s32.totalorder %s2330_s12, 0 }
  0xd1   : > { %1309 = vmatmul.mubr.msk.bf16.vlgmr.msra.gmra.mrb[0].mxu1 %vm392_vm1, %v376_v2  ;;  %v1565_v17 = vld [vmem:[#allocation12 + $0xb8] sm:$0xff]   ;;  %v1562_v18 = vld [vmem:[#allocation12 + $0x30] sm:$0xff]   ;;  %v1567_v27 = vld [vmem:[#allocation12 + $0xc0] sm:$0xff]   ;;  %p1789_p6 = scmp.ne.s32.totalorder %s2271_s20, %s1788_s10  ;;  %s1879_s30 = smov [#allocation15]  }
  0xd2   : > { %1313 = vmatpush3.bf16.msra.mxu1 %v1549_v3  ;;  %1314 = vmatprep.mubr.msk.bf16.mxu1 %vm1878_vm0, %v1877_v0  ;;  %v1564_v19 = vld [vmem:[#allocation12 + $0x38] sm:$0xff]   ;;  %v1209_v20 = vld [vmem:[#allocation8] ss:$0 sm:$0xff]  ;;  %v1569_v29 = vld [vmem:[#allocation12 + $0xc8] sm:$0xff]   ;;  %s1792_s16 = sshll.u32 %s1879_s30, 4  ;;  %s1793_s16 = int_to_ptr.vmem [resolvable:$false] %s1792_s16 }
  0xd3   : > { %1318 = vmatprep.subr.bf16.mxu1 %v1877_v0  ;;  %1361 = vmatpush3.bf16.msra.mxu0 %v1553_v5  ;;  %v1566_v31 = vld [vmem:[#allocation12 + $0x40] sm:$0xff]   ;;  %v1571_v32 = vld [vmem:[#allocation12 + $0xd0] sm:$0xff]   ;;  %v1568_v34 = vld [vmem:[#allocation12 + $0x48] sm:$0xff]   ;;  %p1790_p12 = pnand %p1789_p6, %p2340_p9  ;;  %s1794_s17 = scalar_lea.vmem %s1793_s16, 128 }
  0xd4   : > { %1362 = vmatprep.subr.bf16.mxu0 %v1877_v0  ;;  %v1573_v35 = vld [vmem:[#allocation12 + $0xd8] sm:$0xff]   ;;  %v1570_v36 = vld [vmem:[#allocation12 + $0x50] sm:$0xff]   ;;  %v1575_v37 = vld [vmem:[#allocation12 + $0xe0] sm:$0xff]   ;;  %p1795_p1 = scmp.lt.s32.totalorder %s2271_s20, %s1793_s16  ;;  %p1796_p3 = scmp.lt.s32.totalorder %s1794_s17, %s1788_s10 }
  0xd5   : > { %v1572_v38 = vld [vmem:[#allocation12 + $0x58] sm:$0xff]   ;;  %v1577_v39 = vld [vmem:[#allocation12 + $0xe8] sm:$0xff]   ;;  %v1574_v40 = vld [vmem:[#allocation12 + $0x60] sm:$0xff]   ;;  %p1791_p13 = pneg %p1790_p12 }
  0xd6   : > { %v1579_v41 = vld [vmem:[#allocation12 + $0xf0] sm:$0xff]   ;;  %v1576_v42 = vld [vmem:[#allocation12 + $0x68] sm:$0xff]   ;;  %v1581_v43 = vld [vmem:[#allocation12 + $0xf8] sm:$0xff]   ;;  %p1797_p2 = por %p1796_p3, %p1795_p1 }
  0xd7   : > { %1363 = vmatpush3.bf16.msra.mxu0 %v1555_v7  ;;  %v1578_v45 = vld [vmem:[#allocation12 + $0x70] sm:$0xff]   ;;  %v1582_v46 = vld [vmem:[#allocation12 + $0x100] sm:$0xff]   ;;  %v1580_v48 = vld [vmem:[#allocation12 + $0x78] sm:$0xff]  }
  0xd8   : > { %1364 = vmatprep.subr.bf16.mxu0 %v1877_v0  ;;  %v1583_v49 = vld [vmem:[#allocation12 + $0x108] sm:$0xff]   ;;  %v1584_v51 = vld [vmem:[#allocation12 + $0x110] sm:$0xff]   ;;  %v1585_v53 = vld [vmem:[#allocation12 + $0x118] sm:$0xff]   ;;  %p1798_p0 = pnand %p1797_p2, %p1791_p13 }
  0xd9   : > { %1315 = vmatmul.mubr.msk.bf16.vlgmr.msra.gmra.mrb[4].mxu1 %vm392_vm1, %v376_v2  ;;  %v1586_v54 = vld [vmem:[#allocation12 + $0x120] sm:$0xff]   ;;  %v1587_v55 = vld [vmem:[#allocation12 + $0x128] sm:$0xff]   ;;  %v1588_v56 = vld [vmem:[#allocation12 + $0x130] sm:$0xff]  }
  0xda   : > { %1319 = vmatpush3.bf16.msra.mxu1 %v1550_v6  ;;  %1334 = vmatprep.mubr.msk.bf16.mxu1 %vm1878_vm0, %v1877_v0  ;;  %v1589_v57 = vld [vmem:[#allocation12 + $0x138] sm:$0xff]   ;;  %v1212_v2 = vld [vmem:[#allocation14] ss:$0 sm:$0xff] }
  0xdb   : > { %1320 = vmatprep.subr.bf16.mxu1 %v1877_v0  ;;  %1365 = vmatpush3.bf16.msra.mxu0 %v1557_v9  ;;  %v1206_v1 = vld [vmem:[#allocation11] ss:$0 sm:$0xff] }
  0xdc   : > { %1366 = vmatprep.subr.bf16.mxu0 %v1877_v0  ;;  %v1418_v3 = vadd.f32 %v1212_v2, %v1206_v1 }
  0xde   : > { %1321 = vmatpush3.bf16.msra.mxu1 %v1552_v8 }
  0xdf   : > { %1322 = vmatprep.subr.bf16.mxu1 %v1877_v0  ;;  %1367 = vmatpush3.bf16.msra.mxu0 %v1559_v11 }
  0xe0   : > { %1368 = vmatprep.subr.bf16.mxu0 %v1877_v0 }
  0xe2   : > { %1323 = vmatpush3.bf16.msra.mxu1 %v1554_v10 }
  0xe3   : > { %1324 = vmatprep.subr.bf16.mxu1 %v1877_v0  ;;  %1369 = vmatpush3.bf16.msra.mxu0 %v1561_v14 }
  0xe4   : > { %1370 = vmatprep.subr.bf16.mxu0 %v1877_v0 }
  0xe6   : > { %1325 = vmatpush3.bf16.msra.mxu1 %v1556_v12 }
  0xe7   : > { %1326 = vmatprep.subr.bf16.mxu1 %v1877_v0  ;;  %1371 = vmatpush3.bf16.msra.mxu0 %v1563_v15 }
  0xe8   : > { %1372 = vmatprep.subr.bf16.mxu0 %v1877_v0 }
  0xea   : > { %1327 = vmatpush3.bf16.msra.mxu1 %v1558_v13 }
  0xeb   : > { %1328 = vmatprep.subr.bf16.mxu1 %v1877_v0  ;;  %1373 = vmatpush3.bf16.msra.mxu0 %v1565_v17 }
  0xec   : > { %1378 = vmatprep.subr.bf16.mxu0 %v1877_v0 }
  0xee   : > { %1329 = vmatpush3.bf16.msra.mxu1 %v1560_v16 }
  0xef   : > { %1330 = vmatprep.subr.bf16.mxu1 %v1877_v0 }
  0xf2   : > { %1331 = vmatpush3.bf16.msra.mxu1 %v1562_v18 }
  0xf3   : > { %1332 = vmatprep.subr.bf16.mxu1 %v1877_v0 }
  0xf6   : > { %1333 = vmatpush3.bf16.msra.mxu1 %v1564_v19 }
  0xf7   : > { %1338 = vmatprep.subr.bf16.mxu1 %v1877_v0 }
 0x1ac   : > { %v485_v21 = vpop.f32.mrb[4].mxu1 }
 0x1ad   : > { %v486_v22 = vadd.f32 %v1209_v20, %v485_v21  ;;  %v1316_v23 = vpop.f32.mrb[5].mxu1 }
 0x1ae   : > { %v488_v24 = vpop.f32.mrb[6].mxu1 }
 0x1af   : > { %v491_v25 = vmax.f32 %v486_v22, 0.0  ;;  %v1317_v26 = vpop.f32.mrb[7].mxu1 }
 0x1b1   : > { %494 = vst [vmem:[#allocation2 + $0x2] sm:$0xff] %v491_v25  ;;  %v719_v28 = vpack.c.bf16 %v491_v25, %v491_v25 }
 0x1b3   : > { %1375 = vmatmul.mubr.bf16.vlgmr.msra.gmra.mrb[0].mxu0 %v719_v28 }
 0x1b4   : > { %1379 = vmatpush3.bf16.msra.mxu0 %v1567_v27  ;;  %1394 = vmatprep.mubr.msk.bf16.mxu0 %vm1878_vm0, %v1877_v0 }
 0x1b5   : > { %1380 = vmatprep.subr.bf16.mxu0 %v1877_v0 }
 0x1b8   : > { %v503_v30 = vld [vmem:[#allocation2] sm:$0xff]  ;;  %1381 = vmatpush3.bf16.msra.mxu0 %v1569_v29 }
 0x1b9   : > { %v504_v33 = vpack.c.bf16 %v503_v30, %v503_v30  ;;  %1382 = vmatprep.subr.bf16.mxu0 %v1877_v0  ;;  %v826_v44 = vld [vmem:[#allocation2 + $0x3] sm:$0xff] }
 0x1ba   : > { %v827_v47 = vpack.c.bf16 %v826_v44, %v826_v44  ;;  %v610_v50 = vld [vmem:[#allocation2 + $0x1] sm:$0xff] }
 0x1bb   : > { %1335 = vmatmul.mubr.bf16.vlgmr.msra.gmra.mrb[0].mxu1 %v504_v33  ;;  %v611_v52 = vpack.c.bf16 %v610_v50, %v610_v50  ;;  %v934_v58 = vld [vmem:[#allocation2 + $0x4] sm:$0xff] }
 0x1bc   : > { %1339 = vmatpush3.bf16.msra.mxu1 %v1566_v31  ;;  %1383 = vmatpush3.bf16.msra.mxu0 %v1571_v32  ;;  %v935_v59 = vpack.c.bf16 %v934_v58, %v934_v58 }
 0x1bd   : > { %1340 = vmatprep.subr.bf16.mxu1 %v1877_v0  ;;  %1384 = vmatprep.subr.bf16.mxu0 %v1877_v0 }
 0x1be   : > { %1354 = vmatprep.mubr.msk.bf16.mxu1 %vm1878_vm0, %v1877_v0 }
 0x1c0   : > { %1341 = vmatpush3.bf16.msra.mxu1 %v1568_v34  ;;  %1385 = vmatpush3.bf16.msra.mxu0 %v1573_v35 }
 0x1c1   : > { %1342 = vmatprep.subr.bf16.mxu1 %v1877_v0  ;;  %1386 = vmatprep.subr.bf16.mxu0 %v1877_v0 }
 0x1c4   : > { %1343 = vmatpush3.bf16.msra.mxu1 %v1570_v36  ;;  %1387 = vmatpush3.bf16.msra.mxu0 %v1575_v37 }
 0x1c5   : > { %1344 = vmatprep.subr.bf16.mxu1 %v1877_v0  ;;  %1388 = vmatprep.subr.bf16.mxu0 %v1877_v0 }
 0x1c8   : > { %1345 = vmatpush3.bf16.msra.mxu1 %v1572_v38  ;;  %1389 = vmatpush3.bf16.msra.mxu0 %v1577_v39 }
 0x1c9   : > { %1346 = vmatprep.subr.bf16.mxu1 %v1877_v0  ;;  %1390 = vmatprep.subr.bf16.mxu0 %v1877_v0 }
 0x1cc   : > { %1347 = vmatpush3.bf16.msra.mxu1 %v1574_v40  ;;  %1391 = vmatpush3.bf16.msra.mxu0 %v1579_v41 }
 0x1cd   : > { %1348 = vmatprep.subr.bf16.mxu1 %v1877_v0  ;;  %1392 = vmatprep.subr.bf16.mxu0 %v1877_v0 }
 0x1d0   : > { %1349 = vmatpush3.bf16.msra.mxu1 %v1576_v42  ;;  %1393 = vmatpush3.bf16.msra.mxu0 %v1581_v43 }
 0x1d1   : > { %1350 = vmatprep.subr.bf16.mxu1 %v1877_v0  ;;  %1398 = vmatprep.subr.bf16.mxu0 %v1877_v0 }
 0x1d3   : > { %1395 = vmatmul.mubr.bf16.vlgmr.msra.gmra.mrb[0].mxu0 %v827_v47 }
 0x1d4   : > { %1351 = vmatpush3.bf16.msra.mxu1 %v1578_v45  ;;  %1399 = vmatpush3.bf16.msra.mxu0 %v1582_v46 }
 0x1d5   : > { %1352 = vmatprep.subr.bf16.mxu1 %v1877_v0  ;;  %1400 = vmatprep.subr.bf16.mxu0 %v1877_v0 }
 0x1d6   : > { %1414 = vmatprep.mubr.msk.bf16.mxu0 %vm1878_vm0, %v1877_v0 }
 0x1d8   : > { %1353 = vmatpush3.bf16.msra.mxu1 %v1580_v48  ;;  %1401 = vmatpush3.bf16.msra.mxu0 %v1583_v49 }
 0x1d9   : > { %1402 = vmatprep.subr.bf16.mxu0 %v1877_v0 }
 0x1db   : > { %1355 = vmatmul.mubr.bf16.vlgmr.msra.gmra.mrb[0].mxu1 %v611_v52 }
 0x1dc   : > { %1403 = vmatpush3.bf16.msra.mxu0 %v1584_v51 }
 0x1dd   : > { %1404 = vmatprep.subr.bf16.mxu0 %v1877_v0 }
 0x1e0   : > { %1405 = vmatpush3.bf16.msra.mxu0 %v1585_v53 }
 0x1e1   : > { %1406 = vmatprep.subr.bf16.mxu0 %v1877_v0 }
 0x1e4   : > { %1407 = vmatpush3.bf16.msra.mxu0 %v1586_v54 }
 0x1e5   : > { %1408 = vmatprep.subr.bf16.mxu0 %v1877_v0 }
 0x1e8   : > { %1409 = vmatpush3.bf16.msra.mxu0 %v1587_v55 }
 0x1e9   : > { %1410 = vmatprep.subr.bf16.mxu0 %v1877_v0 }
 0x1ec   : > { %1411 = vmatpush3.bf16.msra.mxu0 %v1588_v56 }
 0x1ed   : > { %1412 = vmatprep.subr.bf16.mxu0 %v1877_v0 }
 0x1f0   : > { %1413 = vmatpush3.bf16.msra.mxu0 %v1589_v57 }
 0x1f3   : > { %1415 = vmatmul.mubr.bf16.vlgmr.msra.gmra.mrb[0].mxu0 %v935_v59 }
 0x2ae   : > { %v711_v60 = vpop.f32.mrb[0].mxu1 }
 0x2af   : > { %v1356_v61 = vpop.f32.mrb[1].mxu1  ;;  %v1419_v4 = vadd.f32 %v1418_v3, %v711_v60 }
 0x2b0   : > { %v714_v62 = vpop.f32.mrb[2].mxu1 }
 0x2b1   : > { %v1357_v63 = vpop.f32.mrb[3].mxu1 }
 0x2c6   : > { %v1035_v5 = vpop.f32.mrb[0].mxu0 }
 0x2c7   : > { %v1420_v6 = vadd.f32 %v1419_v4, %v1035_v5  ;;  %v1416_v7 = vpop.f32.mrb[1].mxu0 }
 0x2c8   : > { %v1038_v0 = vpop.f32.mrb[2].mxu0 }
 0x2c9   : > { %v1042_v8 = vmax.f32 %v1420_v6, 0.0  ;;  %v1417_v9 = vpop.f32.mrb[3].mxu0 }
 0x2cb   : > { %v1043_v10 = vpack.c.bf16 %v1042_v8, %v1042_v8 }
 0x2cd   : > { %1044 = vst [vmem:[%s374_s28] sm:$0xf] %v1043_v10 }
 0x2ce   : > { %1801 = shalt.err (!%p1798_p0)
}
 0x2cf   : > { %s1802_s13 = scalar_lea.hbm %s2269_s21, 64  ;;  %s1806_s14 = scalar_lea.hbm %s2320_s7, 128 }
 0x2d0   : > { %p1803_p4 = scmp.ne.s32.totalorder %s2269_s21, %s1802_s13  ;;  %p1807_p8 = scmp.lt.u32.totalorder %s2269_s21, %s2320_s7 }
 0x2d1   : > { %p1808_p5 = scmp.lt.u32.totalorder %s1806_s14, %s1802_s13  ;;  %p1810_p6 = scmp.lt.u32.totalorder %s1802_s13, %s2269_s21 }
 0x2d2   : > { %p1804_p10 = pnand %p1803_p4, %p2340_p9 }
 0x2d3   : > { %p1809_p7 = por %p1808_p5, %p1807_p8 }
 0x2d4   : > { %p1805_p11 = pneg %p1804_p10 }
 0x2d5   : > { %p1811_p12 = por %p1810_p6, %p1809_p7 }
 0x2d7   : > { %p1812_p13 = pnand %p1811_p12, %p1805_p11 }
 0x2d9   : > { %1815 = shalt.err (!%p1812_p13)
}
 0x2da   : > { %1463 = dma.vmem_to_hbm [thread:$0]  (%p2340_p9), %s2271_s20, 64, %s2269_s21, %s1046_s22  }
 0x2db PF: > { %s1071_s9 = sand.u32 1, %s1854_s24   ;;  %p2341_p1 = scmp.ne.s32.totalorder %s2331_s15, 0 }
 0x2dc   : > { %p2342_p3 = scmp.ge.s32.totalorder %s1866_s27, 2  ;;  %s1072_s19 = scalar_lea.sflag [#allocation5], %s1071_s9 }
 0x2de   : > { %p1489_p2 = pnand %p2342_p3, %p2341_p1 }
 0x2e0   : > { %1849 = dma.done.wait (!%p1489_p2), %s1072_s19, 64  }
 0x2e1   : > { %1851 = vsyncadd (!%p1489_p2), %s1072_s19, 4294967232  ;;  %p23_p0 = scmp.ge.s32.totalorder %s2105_s11, 4   ;;  %s2343_s24 = smov %s1858_s25 }
 0x2e2   : > { %s2344_s25 = smov %s1862_s26  ;;  %s2345_s26 = smov %s2116_s23 }
 0x2e3   : > { %s2346_s27 = smov %s2105_s11  ;;  %25 = sbr.rel (!%p23_p0) target bundleno = 8 (0x8), region = 121 }
 0x2ea   :  { %1077 = vsyncpa [#allocation4], 1 }
 0x2eb   :  { %1079 = vsyncpa [#allocation4 + $0x1], 1 }
 0x2ec   :  { %1080 = vsyncpa [#allocation7], 1 }
 0x2ed   :  { %1081 = vsyncpa [#allocation10], 1 }
 0x2ee   :  { %1082 = vsyncpa [#allocation13], 1 }
 0x2ef   :  { %1083 = vsyncpa [#allocation5], 1 }
 0x2f0   :  { %1085 = vsyncpa [#allocation5 + $0x1], 1 }

// kernel: _lambda_.5
= control target key start
LH: loop header
LB: loop body
LE: loop exit
PB: predicated region body
PF: predicated region fallthrough
CT: control target
= control target key end

     0   :  { %10 = vsyncpa [#allocation4], 0  ;;  %s2093_s0 = inlined_call_operand.hbm [shape: bf16[2,8,128], index: 0, kind: input, shape index: {}]   ;;  %s2094_s1 = inlined_call_operand.hbm [shape: bf16[128,128], index: 1, kind: input, shape index: {}]   ;;  %s2095_s2 = inlined_call_operand.hbm [shape: f32[1,128], index: 2, kind: input, shape index: {}]   ;;  %s2096_s3 = inlined_call_operand.hbm [shape: bf16[5,128,128], index: 3, kind: input, shape index: {}]   ;;  %s2097_s4 = inlined_call_operand.hbm [shape: f32[1,128], index: 4, kind: input, shape index: {}]   ;;  %s2098_s5 = inlined_call_operand.hbm [shape: bf16[2,8,128], index: 5, kind: output, shape index: {}]  }
   0x1   :  { %12 = vsyncpa [#allocation4 + $0x1], 0 }
   0x2   :  { %13 = vsyncpa [#allocation7], 0 }
   0x3   :  { %14 = vsyncpa [#allocation10], 0 }
   0x4   :  { %15 = vsyncpa [#allocation5], 0 }
   0x5   :  { %17 = vsyncpa [#allocation5 + $0x1], 0  ;;  %s1739_s18 = smov 0   ;;  %s1741_s19 = smov 0  }
   0x6   :  { %s1743_s20 = smov 0   ;;  %s1745_s21 = smov 0  }
   0x7 LB: > { %s1699_s22 = smov [#allocation6]   ;;  %s1760_s24 = sadd.s32 4294967295, %s1697_s21   ;;  %s1697_s21 = sphi %s1745_s21, %s2122_s21   ;;  %s1693_s20 = sphi %s1743_s20, %s2121_s20   ;;  %s1689_s19 = sphi %s1741_s19, %s2120_s19   ;;  %s1685_s18 = sphi %s1739_s18, %s2119_s18  }
   0x8   : > { %s176_s23 = sshll.u32 %s1699_s22, 4  ;;  %p1085_p0 = scmp.ge.s32.totalorder %s1697_s21, 1  ;;  %s1765_s23 = int_to_ptr.vmem [resolvable:$true] %s176_s23 }
   0x9   : > { %p2099_p1 = scmp.eq.s32.totalorder %s1760_s24, 0  ;;  %p164_p2 = scmp.lt.s32.totalorder %s1697_s21, 3 }
   0xa   : > { %s1700_s26 = smov [#allocation9]   ;;  %s1701_s29 = smov [#allocation8]  }
   0xb   : > { %p1767_p3 = pnand %p1085_p0, %p164_p2  ;;  %s200_s27 = sshll.u32 %s1700_s26, 4  ;;  %s1780_s27 = int_to_ptr.vmem [resolvable:$true] %s200_s27 }
   0xc   : > { %s190_s30 = sshll.u32 %s1701_s29, 4  ;;  %s1481_s8 = scalar_lea.hbm %s2094_s1, 1024  ;;  %s1782_s30 = int_to_ptr.vmem [resolvable:$true] %s190_s30 }
   0xd   : > { %s2102_s25 = scalar_select %p1767_p3, 1, 0 }
   0xe   : > { %p1362_p5 = pneg %p1767_p3  ;;  %p1482_p7 = scmp.ne.s32.totalorder %s2094_s1, %s1481_s8 }
   0xf   : > { %p1488_p11 = scmp.lt.u32.totalorder %s1481_s8, %s2094_s1 }
  0x10   : > { %p1776_p6 = pnand %p1362_p5, %p2099_p1 }
  0x12   : > { %p1792_p8 = pneg %p1776_p6 }
  0x14   : > { %p1484_p9 = pnand %p1792_p8, %p1482_p7 }
  0x16   : > { %p1485_p10 = pneg %p1484_p9 }
  0x18   : > { %p1490_p12 = pnand %p1488_p11, %p1485_p10 }
  0x1a   : > { %1493 = shalt.err (!%p1490_p12)
}
  0x1b   : > { %s1494_s14 = scalar_lea.vmem %s1765_s23, 1024  ;;  %p1502_p5 = scmp.lt.s32.totalorder %s1765_s23, %s1765_s23 }
  0x1c   : > { %p1495_p13 = scmp.ne.s32.totalorder %s1765_s23, %s1494_s14  ;;  %p1503_p4 = scmp.lt.s32.totalorder %s1494_s14, %s1494_s14 }
  0x1e   : > { %p1497_p0 = pnand %p1495_p13, %p1792_p8  ;;  %p1504_p7 = por %p1503_p4, %p1502_p5 }
  0x20   : > { %p1498_p2 = pneg %p1497_p0 }
  0x22   : > { %p1505_p9 = pnand %p1504_p7, %p1498_p2 }
  0x24   : > { %1508 = shalt.err (!%p1505_p9)
}
  0x25   : > { %s1702_s15 = smov 64   ;;  %s1703_s16 = smov 4  }
  0x26   : > { %1365 = dma.hbm_to_vmem [thread:$0]  (!%p1776_p6), %s2094_s1, 1024, %s1765_s23, [#allocation7], %s1702_s15, %s1702_s15, %s1703_s16  }
  0x27   : > { %s1509_s6 = scalar_lea.hbm %s2096_s3, 5120 }
  0x28   : > { %p1510_p4 = scmp.ne.s32.totalorder %s2096_s3, %s1509_s6  ;;  %p1516_p12 = scmp.lt.u32.totalorder %s1509_s6, %s2096_s3 }
  0x2a   : > { %p1512_p10 = pnand %p1510_p4, %p1792_p8 }
  0x2c   : > { %p1513_p11 = pneg %p1512_p10 }
  0x2e   : > { %p1518_p13 = pnand %p1516_p12, %p1513_p11 }
  0x30   : > { %1521 = shalt.err (!%p1518_p13)
}
  0x31   : > { %s1522_s23 = scalar_lea.vmem %s1780_s27, 5120  ;;  %p1530_p7 = scmp.lt.s32.totalorder %s1780_s27, %s1780_s27 }
  0x32   : > { %p1523_p0 = scmp.ne.s32.totalorder %s1780_s27, %s1522_s23  ;;  %p1531_p9 = scmp.lt.s32.totalorder %s1522_s23, %s1522_s23 }
  0x34   : > { %p1525_p2 = pnand %p1523_p0, %p1792_p8  ;;  %p1532_p4 = por %p1531_p9, %p1530_p7 }
  0x36   : > { %p1526_p5 = pneg %p1525_p2 }
  0x38   : > { %p1533_p10 = pnand %p1532_p4, %p1526_p5 }
  0x3a   : > { %1536 = shalt.err (!%p1533_p10)
}
  0x3b   : > { %1371 = dma.hbm_to_vmem [thread:$0]  (!%p1776_p6), %s2096_s3, 5120, %s1780_s27, [#allocation10], %s1702_s15, %s1702_s15, %s1703_s16  }
  0x3c   : > { %s1537_s22 = scalar_lea.hbm %s2095_s2, 16 }
  0x3d   : > { %p1538_p11 = scmp.ne.s32.totalorder %s2095_s2, %s1537_s22  ;;  %p1544_p0 = scmp.lt.u32.totalorder %s1537_s22, %s2095_s2 }
  0x3f   : > { %p1540_p12 = pnand %p1538_p11, %p1792_p8 }
  0x41   : > { %p1541_p13 = pneg %p1540_p12 }
  0x43   : > { %p1546_p2 = pnand %p1544_p0, %p1541_p13 }
  0x45   : > { %1549 = shalt.err (!%p1546_p2)
}
  0x46   : > { %s1550_s27 = scalar_lea.vmem %s1782_s30, 16  ;;  %s1557_s15 = scalar_lea.vmem %s1782_s30, 32 }
  0x47   : > { %p1551_p5 = scmp.ne.s32.totalorder %s1782_s30, %s1550_s27  ;;  %p1558_p4 = scmp.lt.s32.totalorder %s1782_s30, %s1782_s30 }
  0x48   : > { %p1559_p10 = scmp.lt.s32.totalorder %s1557_s15, %s1550_s27 }
  0x49   : > { %p1553_p7 = pnand %p1551_p5, %p1792_p8 }
  0x4a   : > { %p1560_p11 = por %p1559_p10, %p1558_p4 }
  0x4b   : > { %p1554_p9 = pneg %p1553_p7 }
  0x4d   : > { %p1561_p12 = pnand %p1560_p11, %p1554_p9 }
  0x4f   : > { %1564 = shalt.err (!%p1561_p12)
}
  0x50   : > { %1368 = dma.hbm_to_vmem [thread:$0]  (!%p1776_p6), %s2095_s2, 16, %s1782_s30, [#allocation7]  }
  0x51   : > { %s1704_s9 = smov [#allocation11]   ;;  %s1565_s13 = scalar_lea.hbm %s2097_s4, 16 }
  0x52   : > { %s214_s10 = sshll.u32 %s1704_s9, 4  ;;  %p1566_p13 = scmp.ne.s32.totalorder %s2097_s4, %s1565_s13  ;;  %s215_s10 = int_to_ptr.vmem [resolvable:$true] %s214_s10 }
  0x53   : > { %p1572_p5 = scmp.lt.u32.totalorder %s1565_s13, %s2097_s4 }
  0x54   : > { %p1568_p0 = pnand %p1566_p13, %p1792_p8 }
  0x56   : > { %p1569_p2 = pneg %p1568_p0 }
  0x58   : > { %p1574_p7 = pnand %p1572_p5, %p1569_p2 }
  0x5a   : > { %1577 = shalt.err (!%p1574_p7)
}
  0x5b   : > { %s1578_s30 = scalar_lea.vmem %s215_s10, 16  ;;  %s1585_s29 = scalar_lea.vmem %s215_s10, 32 }
  0x5c   : > { %p1579_p9 = scmp.ne.s32.totalorder %s215_s10, %s1578_s30  ;;  %p1586_p11 = scmp.lt.s32.totalorder %s215_s10, %s215_s10 }
  0x5d   : > { %p1587_p12 = scmp.lt.s32.totalorder %s1585_s29, %s1578_s30 }
  0x5e   : > { %p1581_p4 = pnand %p1579_p9, %p1792_p8 }
  0x5f   : > { %p1588_p1 = por %p1587_p12, %p1586_p11 }
  0x60   : > { %p1582_p10 = pneg %p1581_p4 }
  0x62   : > { %p1589_p3 = pnand %p1588_p1, %p1582_p10 }
  0x64   : > { %1592 = shalt.err (!%p1589_p3)
}
  0x65   : > { %1374 = dma.hbm_to_vmem [thread:$0]  (!%p1776_p6), %s2097_s4, 16, %s215_s10, [#allocation10]  }
  0x66   : > { %s1084_s11 = sadd.s32 4294967294, %s1697_s21   ;;  %s1880_s28 = sadd.s32 1, %s1697_s21  }
  0x67   : > { %s27_s27 = ssub.s32 %s1697_s21, %s1880_s28  ;;  %s30_s15 = sadd.s32 1, %s1693_s20 }
  0x68   : > { %p28_p1 = scmp.eq.s32.totalorder %s27_s27, 0  ;;  %p37_p3 = scmp.ne.s32.totalorder %s1693_s20, %s1689_s19 }
  0x69   : > { %p38_p8 = scmp.eq.s32.totalorder %s1697_s21, 0  ;;  %p43_p13 = scmp.ne.s32.totalorder %s1689_s19, %s1685_s18 }
  0x6a   : > { %s1891_s16 = scalar_select %p28_p1, %s1693_s20, %s30_s15  }
  0x6b   : > { %p1893_p0 = por %p38_p8, %p37_p3  ;;  %p2106_p2 = scmp.eq.s32.totalorder %s1760_s24, 0 }
  0x6c   : > { %p151_p5 = scmp.eq.s32.totalorder %s1760_s24, 1  ;;  %p157_p7 = scmp.eq.s32.totalorder %s1084_s11, 1 }
  0x6d   : > { %p1899_p6 = por %p2106_p2, %p43_p13  ;;  %p1387_p9 = scmp.lt.s32.totalorder %s1697_s21, 2 }
  0x6e   : > { %s225_s10 = sand.u32 1, %s1693_s20   ;;  %p1906_p4 = por %p151_p5, %p37_p3 }
  0x6f   : > { %p1910_p10 = por %p157_p7, %p43_p13  ;;  %s1091_s13 = sshll.u32 %s225_s10, 2 }
  0x70   : > { %s2108_s23 = scalar_select %p1906_p4, 1, 0 }
  0x71   : > { %s2109_s12 = scalar_select %p1910_p10, 1, 0 }
  0x72   : > { %s1092_s14 = sshll.u32 %s1697_s21, 6  ;;  %s229_s30 = scalar_lea.vmem [#allocation3], %s1091_s13 }
  0x73   : > { %s1918_s26 = scalar_lea.hbm %s2093_s0, %s1092_s14  ;;  %s236_s29 = sshll.u32 %s229_s30, 4  ;;  %s1920_s29 = int_to_ptr.vmem [resolvable:$true] %s236_s29 }
  0x74   : > { %p1924_p11 = pnand %p1387_p9, %p1893_p0  ;;  %s226_s7 = scalar_lea.sflag [#allocation4], %s225_s10 }
  0x75   : > { %s1593_s11 = scalar_lea.hbm %s1918_s26, 64  ;;  %s1598_s13 = scalar_lea.hbm %s2093_s0, 128 }
  0x76   : > { %p1594_p12 = scmp.ne.s32.totalorder %s1918_s26, %s1593_s11  ;;  %p1595_p1 = pneg %p1924_p11 }
  0x77   : > { %p1599_p13 = scmp.lt.u32.totalorder %s1918_s26, %s2093_s0  ;;  %p1600_p0 = scmp.lt.u32.totalorder %s1598_s13, %s1593_s11 }
  0x78   : > { %p1596_p3 = pnand %p1595_p1, %p1594_p12  ;;  %p1602_p5 = scmp.lt.u32.totalorder %s1593_s11, %s1918_s26 }
  0x79   : > { %p1601_p2 = por %p1600_p0, %p1599_p13 }
  0x7a   : > { %p1597_p8 = pneg %p1596_p3 }
  0x7b   : > { %p1603_p7 = por %p1602_p5, %p1601_p2 }
  0x7d   : > { %p1604_p9 = pnand %p1603_p7, %p1597_p8 }
  0x7f   : > { %1607 = shalt.err (!%p1604_p9)
}
  0x80   : > { %s1608_s10 = scalar_lea.vmem %s1920_s29, 64  ;;  %s1705_s17 = smov [#allocation3]  }
  0x81   : > { %p1609_p12 = scmp.ne.s32.totalorder %s1920_s29, %s1608_s10  ;;  %s1613_s22 = sshll.u32 %s1705_s17, 4  ;;  %s1614_s22 = int_to_ptr.vmem [resolvable:$false] %s1613_s22 }
  0x82   : > { %s1615_s30 = scalar_lea.vmem %s1614_s22, 128  ;;  %p1616_p4 = scmp.lt.s32.totalorder %s1920_s29, %s1614_s22 }
  0x83   : > { %p1611_p3 = pnand %p1609_p12, %p1595_p1  ;;  %p1617_p13 = scmp.lt.s32.totalorder %s1615_s30, %s1608_s10 }
  0x85   : > { %p1612_p10 = pneg %p1611_p3  ;;  %p1618_p0 = por %p1617_p13, %p1616_p4 }
  0x87   : > { %p1619_p2 = pnand %p1618_p0, %p1612_p10 }
  0x89   : > { %1622 = shalt.err (!%p1619_p2)
}
  0x8a   : > { %1378 = dma.hbm_to_vmem [thread:$0]  (!%p1924_p11), %s1918_s26, 64, %s1920_s29, %s226_s7  }
  0x8b   : > { %p2111_p8 = scmp.ne.s32.totalorder %s2102_s25, 0 }
  0x8c   : > { %s1956_s11 = sand.u32 (!%p2111_p8), 1, %s1689_s19  }
  0x8d   : > { %245 = sbr.rel (%p2111_p8) target bundleno = 703 (0x2bf), region = 40  ;;  %s1094_s27 = sshll.u32 (!%p2111_p8), %s1956_s11, 2 }
  0x8e   : > { %s248_s15 = scalar_lea.sflag (!%p2111_p8), [#allocation4], %s1956_s11  ;;  %s1962_s13 = scalar_lea.vmem (!%p2111_p8), [#allocation3], %s1094_s27 }
  0x94   : > { %1668 = dma.done.wait (%p1899_p6), %s248_s15, 64  }
  0x95   : > { %1670 = vsyncadd (%p1899_p6), %s248_s15, 4294967232  ;;  %p2112_p4 = scmp.eq.s32.totalorder %s1760_s24, 0 }
  0x97   : > { %1672 = dma.done.wait (%p2112_p4), [#allocation7], 1040   ;;  %p2113_p10 = pmov %p2112_p4 }
  0x98   : > { %p2114_p11 = pmov %p2112_p4 }
  0x99   : > { %1674 = vsyncadd (%p2113_p10), [#allocation7], 4294966256 }
  0x9a   : > { %1676 = dma.done.wait (%p2114_p11), [#allocation10], 5136   ;;  %p2115_p1 = pmov %p2112_p4 }
  0x9b   : > { %v1706_v0 = vmov 0.0   ;;  %vm1707_vm0 = vmmov 0   ;;  %v1433_v1 = vld [vmem:[#allocation6] sm:$0xff]   ;;  %v1434_v2 = vld [vmem:[#allocation6 + $0x8] sm:$0xff]   ;;  %v1435_v3 = vld [vmem:[#allocation6 + $0x10] sm:$0xff]   ;;  %s1151_s25 = sshll.u32 %s1760_s24, 6 }
  0x9c   : > { %1678 = vsyncadd (%p2115_p1), [#allocation10], 4294962160  ;;  %1208 = vmatprep.subr.bf16.mxu0 %v1706_v0  ;;  %409 = vst [vmem:[#allocation2] sm:$0x3] %v1706_v0  ;;  %1224 = vmatprep.mubr.msk.bf16.mxu0 %vm1707_vm0, %v1706_v0  ;;  %v1436_v4 = vld [vmem:[#allocation6 + $0x18] sm:$0xff]   ;;  %v1442_v5 = vld [vmem:[#allocation9 + $0x80] sm:$0xff]   ;;  %s2049_s7 = scalar_lea.hbm %s2098_s5, %s1151_s25 }
  0x9d   : > { %410 = vst [vmem:[#allocation2 + $0xa] sm:$0x3] %v1706_v0  ;;  %1268 = vmatprep.subr.bf16.mxu1 %v1706_v0  ;;  %1284 = vmatprep.mubr.msk.bf16.mxu1 %vm1707_vm0, %v1706_v0  ;;  %v1444_v6 = vld [vmem:[#allocation9 + $0x88] sm:$0xff]   ;;  %v1437_v7 = vld [vmem:[#allocation6 + $0x20] sm:$0xff]   ;;  %v1446_v8 = vld [vmem:[#allocation9 + $0x90] sm:$0xff]   ;;  %s293_s9 = scalar_lea.vmem [#allocation12], %s1094_s27 }
  0x9e   : > { %1209 = vmatpush3.bf16.msra.mxu0 %v1433_v1  ;;  %1269 = vmatpush3.bf16.msra.mxu1 %v1442_v5  ;;  %v1438_v9 = vld [vmem:[#allocation6 + $0x28] sm:$0xff]   ;;  %v1448_v10 = vld [vmem:[#allocation9 + $0x98] sm:$0xff]   ;;  %v1439_v11 = vld [vmem:[#allocation6 + $0x30] sm:$0xff]   ;;  %s976_s26 = sshll.u32 %s293_s9, 4  ;;  %s963_s8 = scalar_lea.sflag [#allocation5], %s1956_s11  ;;  %s2051_s26 = int_to_ptr.vmem [resolvable:$true] %s976_s26 }
  0x9f   : > { %1210 = vmatprep.subr.bf16.mxu0 %v1706_v0  ;;  %1270 = vmatprep.subr.bf16.mxu1 %v1706_v0  ;;  %v1450_v12 = vld [vmem:[#allocation9 + $0xa0] sm:$0xff]   ;;  %v1440_v13 = vld [vmem:[#allocation6 + $0x38] sm:$0xff]   ;;  %v1443_v16 = vld [vmem:[#allocation9 + $0x8] sm:$0xff]   ;;  %s1623_s14 = scalar_lea.vmem %s2051_s26, 64  ;;  %p2116_p5 = scmp.ne.s32.totalorder %s2108_s23, 0 }
  0xa0   : > { %v1996_v14 = vld [vmem:[%s1962_s13] sm:$0xf]  ;;  %v1441_v15 = vld [vmem:[#allocation9] sm:$0xff]   ;;  %v1452_v20 = vld [vmem:[#allocation9 + $0xa8] sm:$0xff]   ;;  %p1624_p6 = scmp.ne.s32.totalorder %s2051_s26, %s1623_s14  ;;  %s1708_s24 = smov [#allocation12]  }
  0xa1   : > { %v1445_v17 = vld [vmem:[#allocation9 + $0x10] sm:$0xff]   ;;  %v1447_v18 = vld [vmem:[#allocation9 + $0x18] sm:$0xff]   ;;  %v1449_v19 = vld [vmem:[#allocation9 + $0x20] sm:$0xff]   ;;  %s1627_s10 = sshll.u32 %s1708_s24, 4  ;;  %s1628_s10 = int_to_ptr.vmem [resolvable:$false] %s1627_s10 }
  0xa2   : > { %1211 = vmatpush3.bf16.msra.mxu0 %v1434_v2  ;;  %1271 = vmatpush3.bf16.msra.mxu1 %v1444_v6  ;;  %v1454_v21 = vld [vmem:[#allocation9 + $0xb0] sm:$0xff]   ;;  %v1451_v22 = vld [vmem:[#allocation9 + $0x28] sm:$0xff]   ;;  %v1456_v23 = vld [vmem:[#allocation9 + $0xb8] sm:$0xff]   ;;  %p1625_p7 = pnand %p1624_p6, %p2116_p5  ;;  %s1629_s17 = scalar_lea.vmem %s1628_s10, 128 }
  0xa3   : > { %1212 = vmatprep.subr.bf16.mxu0 %v1706_v0  ;;  %1272 = vmatprep.subr.bf16.mxu1 %v1706_v0  ;;  %v1453_v24 = vld [vmem:[#allocation9 + $0x30] sm:$0xff]   ;;  %v1455_v25 = vld [vmem:[#allocation9 + $0x38] sm:$0xff]   ;;  %v1458_v33 = vld [vmem:[#allocation9 + $0xc0] sm:$0xff]   ;;  %p1630_p12 = scmp.lt.s32.totalorder %s2051_s26, %s1628_s10  ;;  %p1631_p3 = scmp.lt.s32.totalorder %s1629_s17, %s1623_s14 }
  0xa4   : > { %v1100_v26 = vld [vmem:[#allocation8] ss:$0 sm:$0xff]  ;;  %v1460_v35 = vld [vmem:[#allocation9 + $0xc8] sm:$0xff]   ;;  %v1457_v37 = vld [vmem:[#allocation9 + $0x40] sm:$0xff]   ;;  %p1626_p9 = pneg %p1625_p7 }
  0xa5   : > { %v1462_v38 = vld [vmem:[#allocation9 + $0xd0] sm:$0xff]   ;;  %v1459_v40 = vld [vmem:[#allocation9 + $0x48] sm:$0xff]   ;;  %v1464_v41 = vld [vmem:[#allocation9 + $0xd8] sm:$0xff]   ;;  %p1632_p13 = por %p1631_p3, %p1630_p12 }
  0xa6   : > { %1213 = vmatpush3.bf16.msra.mxu0 %v1435_v3  ;;  %1273 = vmatpush3.bf16.msra.mxu1 %v1446_v8  ;;  %v1461_v42 = vld [vmem:[#allocation9 + $0x50] sm:$0xff]   ;;  %v1466_v43 = vld [vmem:[#allocation9 + $0xe0] sm:$0xff]   ;;  %v1463_v44 = vld [vmem:[#allocation9 + $0x58] sm:$0xff]   ;;  %v296_v3 = vunpack.c.l.bf16 %v1996_v14 }
  0xa7   : > { %1214 = vmatprep.subr.bf16.mxu0 %v1706_v0  ;;  %1274 = vmatprep.subr.bf16.mxu1 %v1706_v0  ;;  %v1468_v45 = vld [vmem:[#allocation9 + $0xe8] sm:$0xff]   ;;  %v1465_v46 = vld [vmem:[#allocation9 + $0x60] sm:$0xff]   ;;  %v1470_v47 = vld [vmem:[#allocation9 + $0xf0] sm:$0xff]   ;;  %p1633_p0 = pnand %p1632_p13, %p1626_p9 }
  0xa8   : > { %v1467_v48 = vld [vmem:[#allocation9 + $0x68] sm:$0xff]   ;;  %v1472_v49 = vld [vmem:[#allocation9 + $0xf8] sm:$0xff]   ;;  %v1469_v51 = vld [vmem:[#allocation9 + $0x70] sm:$0xff]  }
  0xa9   : > { %v1473_v52 = vld [vmem:[#allocation9 + $0x100] sm:$0xff]   ;;  %v1471_v54 = vld [vmem:[#allocation9 + $0x78] sm:$0xff]   ;;  %v1474_v55 = vld [vmem:[#allocation9 + $0x108] sm:$0xff]  }
  0xaa   : > { %1215 = vmatpush3.bf16.msra.mxu0 %v1436_v4  ;;  %1275 = vmatpush3.bf16.msra.mxu1 %v1448_v10  ;;  %v1475_v57 = vld [vmem:[#allocation9 + $0x110] sm:$0xff]   ;;  %v1476_v59 = vld [vmem:[#allocation9 + $0x118] sm:$0xff]   ;;  %v1477_v60 = vld [vmem:[#allocation9 + $0x120] sm:$0xff]  }
  0xab   : > { %1216 = vmatprep.subr.bf16.mxu0 %v1706_v0  ;;  %1276 = vmatprep.subr.bf16.mxu1 %v1706_v0  ;;  %v1478_v61 = vld [vmem:[#allocation9 + $0x128] sm:$0xff]   ;;  %v1479_v62 = vld [vmem:[#allocation9 + $0x130] sm:$0xff]   ;;  %v1480_v63 = vld [vmem:[#allocation9 + $0x138] sm:$0xff]  }
  0xac   : > { %v1109_v4 = vld [vmem:[#allocation11] ss:$0 sm:$0xff] }
  0xad   : > { %v419_v5 = vadd.f32 %v1109_v4, %v296_v3 }
  0xae   : > { %1217 = vmatpush3.bf16.msra.mxu0 %v1437_v7  ;;  %1277 = vmatpush3.bf16.msra.mxu1 %v1450_v12 }
  0xaf   : > { %1218 = vmatprep.subr.bf16.mxu0 %v1706_v0  ;;  %1278 = vmatprep.subr.bf16.mxu1 %v1706_v0 }
  0xb2   : > { %1219 = vmatpush3.bf16.msra.mxu0 %v1438_v9  ;;  %1279 = vmatpush3.bf16.msra.mxu1 %v1452_v20 }
  0xb3   : > { %1220 = vmatprep.subr.bf16.mxu0 %v1706_v0  ;;  %1280 = vmatprep.subr.bf16.mxu1 %v1706_v0 }
  0xb6   : > { %1221 = vmatpush3.bf16.msra.mxu0 %v1439_v11  ;;  %1281 = vmatpush3.bf16.msra.mxu1 %v1454_v21 }
  0xb7   : > { %1222 = vmatprep.subr.bf16.mxu0 %v1706_v0  ;;  %1282 = vmatprep.subr.bf16.mxu1 %v1706_v0 }
  0xba   : > { %1223 = vmatpush3.bf16.msra.mxu0 %v1440_v13  ;;  %1283 = vmatpush3.bf16.msra.mxu1 %v1456_v23 }
  0xbb   : > { %1228 = vmatprep.subr.bf16.mxu0 %v1706_v0  ;;  %1288 = vmatprep.subr.bf16.mxu1 %v1706_v0 }
  0xbd   : > { %1225 = vmatmul.mubr.bf16.vlgmr.msra.gmra.mrb[0].mxu0 %v1996_v14 }
  0xbe   : > { %1229 = vmatpush3.bf16.msra.mxu0 %v1441_v15  ;;  %1244 = vmatprep.mubr.msk.bf16.mxu0 %vm1707_vm0, %v1706_v0 }
  0xbf   : > { %1230 = vmatprep.subr.bf16.mxu0 %v1706_v0 }
  0xc2   : > { %1231 = vmatpush3.bf16.msra.mxu0 %v1443_v16 }
  0xc3   : > { %1232 = vmatprep.subr.bf16.mxu0 %v1706_v0 }
  0xc6   : > { %1233 = vmatpush3.bf16.msra.mxu0 %v1445_v17 }
  0xc7   : > { %1234 = vmatprep.subr.bf16.mxu0 %v1706_v0 }
  0xca   : > { %1235 = vmatpush3.bf16.msra.mxu0 %v1447_v18 }
  0xcb   : > { %1236 = vmatprep.subr.bf16.mxu0 %v1706_v0 }
  0xce   : > { %1237 = vmatpush3.bf16.msra.mxu0 %v1449_v19 }
  0xcf   : > { %1238 = vmatprep.subr.bf16.mxu0 %v1706_v0 }
  0xd2   : > { %1239 = vmatpush3.bf16.msra.mxu0 %v1451_v22 }
  0xd3   : > { %1240 = vmatprep.subr.bf16.mxu0 %v1706_v0 }
  0xd6   : > { %1241 = vmatpush3.bf16.msra.mxu0 %v1453_v24 }
  0xd7   : > { %1242 = vmatprep.subr.bf16.mxu0 %v1706_v0 }
  0xda   : > { %1243 = vmatpush3.bf16.msra.mxu0 %v1455_v25 }
  0xdb   : > { %1248 = vmatprep.subr.bf16.mxu0 %v1706_v0 }
 0x190   : > { %v402_v27 = vpop.f32.mrb[0].mxu0 }
 0x191   : > { %v403_v28 = vadd.f32 %v1100_v26, %v402_v27  ;;  %v1226_v29 = vpop.f32.mrb[1].mxu0 }
 0x192   : > { %v405_v30 = vpop.f32.mrb[2].mxu0 }
 0x193   : > { %v408_v31 = vmax.f32 %v403_v28, 0.0  ;;  %v1227_v32 = vpop.f32.mrb[3].mxu0 }
 0x195   : > { %411 = vst [vmem:[#allocation2 + $0x2] sm:$0xff] %v408_v31  ;;  %v636_v34 = vpack.c.bf16 %v408_v31, %v408_v31 }
 0x197   : > { %1285 = vmatmul.mubr.bf16.vlgmr.msra.gmra.mrb[0].mxu1 %v636_v34 }
 0x198   : > { %1289 = vmatpush3.bf16.msra.mxu1 %v1458_v33  ;;  %1304 = vmatprep.mubr.msk.bf16.mxu1 %vm1707_vm0, %v1706_v0 }
 0x199   : > { %1290 = vmatprep.subr.bf16.mxu1 %v1706_v0 }
 0x19c   : > { %v420_v36 = vld [vmem:[#allocation2] sm:$0xff]  ;;  %1291 = vmatpush3.bf16.msra.mxu1 %v1460_v35 }
 0x19d   : > { %v421_v39 = vpack.c.bf16 %v420_v36, %v420_v36  ;;  %1292 = vmatprep.subr.bf16.mxu1 %v1706_v0  ;;  %v743_v50 = vld [vmem:[#allocation2 + $0x3] sm:$0xff] }
 0x19e   : > { %v744_v53 = vpack.c.bf16 %v743_v50, %v743_v50  ;;  %v527_v56 = vld [vmem:[#allocation2 + $0x1] sm:$0xff] }
 0x19f   : > { %1245 = vmatmul.mubr.bf16.vlgmr.msra.gmra.mrb[4].mxu0 %v421_v39  ;;  %v528_v58 = vpack.c.bf16 %v527_v56, %v527_v56  ;;  %v851_v1 = vld [vmem:[#allocation2 + $0x4] sm:$0xff] }
 0x1a0   : > { %1249 = vmatpush3.bf16.msra.mxu0 %v1457_v37  ;;  %1293 = vmatpush3.bf16.msra.mxu1 %v1462_v38  ;;  %v852_v2 = vpack.c.bf16 %v851_v1, %v851_v1 }
 0x1a1   : > { %1250 = vmatprep.subr.bf16.mxu0 %v1706_v0  ;;  %1294 = vmatprep.subr.bf16.mxu1 %v1706_v0 }
 0x1a2   : > { %1264 = vmatprep.mubr.msk.bf16.mxu0 %vm1707_vm0, %v1706_v0 }
 0x1a4   : > { %1251 = vmatpush3.bf16.msra.mxu0 %v1459_v40  ;;  %1295 = vmatpush3.bf16.msra.mxu1 %v1464_v41 }
 0x1a5   : > { %1252 = vmatprep.subr.bf16.mxu0 %v1706_v0  ;;  %1296 = vmatprep.subr.bf16.mxu1 %v1706_v0 }
 0x1a8   : > { %1253 = vmatpush3.bf16.msra.mxu0 %v1461_v42  ;;  %1297 = vmatpush3.bf16.msra.mxu1 %v1466_v43 }
 0x1a9   : > { %1254 = vmatprep.subr.bf16.mxu0 %v1706_v0  ;;  %1298 = vmatprep.subr.bf16.mxu1 %v1706_v0 }
 0x1ac   : > { %1255 = vmatpush3.bf16.msra.mxu0 %v1463_v44  ;;  %1299 = vmatpush3.bf16.msra.mxu1 %v1468_v45 }
 0x1ad   : > { %1256 = vmatprep.subr.bf16.mxu0 %v1706_v0  ;;  %1300 = vmatprep.subr.bf16.mxu1 %v1706_v0 }
 0x1b0   : > { %1257 = vmatpush3.bf16.msra.mxu0 %v1465_v46  ;;  %1301 = vmatpush3.bf16.msra.mxu1 %v1470_v47 }
 0x1b1   : > { %1258 = vmatprep.subr.bf16.mxu0 %v1706_v0  ;;  %1302 = vmatprep.subr.bf16.mxu1 %v1706_v0 }
 0x1b4   : > { %1259 = vmatpush3.bf16.msra.mxu0 %v1467_v48  ;;  %1303 = vmatpush3.bf16.msra.mxu1 %v1472_v49 }
 0x1b5   : > { %1260 = vmatprep.subr.bf16.mxu0 %v1706_v0  ;;  %1308 = vmatprep.subr.bf16.mxu1 %v1706_v0 }
 0x1b7   : > { %1305 = vmatmul.mubr.bf16.vlgmr.msra.gmra.mrb[0].mxu1 %v744_v53 }
 0x1b8   : > { %1261 = vmatpush3.bf16.msra.mxu0 %v1469_v51  ;;  %1309 = vmatpush3.bf16.msra.mxu1 %v1473_v52 }
 0x1b9   : > { %1262 = vmatprep.subr.bf16.mxu0 %v1706_v0  ;;  %1310 = vmatprep.subr.bf16.mxu1 %v1706_v0 }
 0x1ba   : > { %1324 = vmatprep.mubr.msk.bf16.mxu1 %vm1707_vm0, %v1706_v0 }
 0x1bc   : > { %1263 = vmatpush3.bf16.msra.mxu0 %v1471_v54  ;;  %1311 = vmatpush3.bf16.msra.mxu1 %v1474_v55 }
 0x1bd   : > { %1312 = vmatprep.subr.bf16.mxu1 %v1706_v0 }
 0x1bf   : > { %1265 = vmatmul.mubr.bf16.vlgmr.msra.gmra.mrb[4].mxu0 %v528_v58 }
 0x1c0   : > { %1313 = vmatpush3.bf16.msra.mxu1 %v1475_v57 }
 0x1c1   : > { %1314 = vmatprep.subr.bf16.mxu1 %v1706_v0 }
 0x1c4   : > { %1315 = vmatpush3.bf16.msra.mxu1 %v1476_v59 }
 0x1c5   : > { %1316 = vmatprep.subr.bf16.mxu1 %v1706_v0 }
 0x1c8   : > { %1317 = vmatpush3.bf16.msra.mxu1 %v1477_v60 }
 0x1c9   : > { %1318 = vmatprep.subr.bf16.mxu1 %v1706_v0 }
 0x1cc   : > { %1319 = vmatpush3.bf16.msra.mxu1 %v1478_v61 }
 0x1cd   : > { %1320 = vmatprep.subr.bf16.mxu1 %v1706_v0 }
 0x1d0   : > { %1321 = vmatpush3.bf16.msra.mxu1 %v1479_v62 }
 0x1d1   : > { %1322 = vmatprep.subr.bf16.mxu1 %v1706_v0 }
 0x1d4   : > { %1323 = vmatpush3.bf16.msra.mxu1 %v1480_v63 }
 0x1d7   : > { %1325 = vmatmul.mubr.bf16.vlgmr.msra.gmra.mrb[0].mxu1 %v852_v2 }
 0x292   : > { %v628_v6 = vpop.f32.mrb[4].mxu0 }
 0x293   : > { %v1328_v7 = vadd.f32 %v628_v6, %v419_v5  ;;  %v1266_v8 = vpop.f32.mrb[5].mxu0 }
 0x294   : > { %v631_v9 = vpop.f32.mrb[6].mxu0 }
 0x295   : > { %v1267_v10 = vpop.f32.mrb[7].mxu0 }
 0x2aa   : > { %v952_v11 = vpop.f32.mrb[0].mxu1 }
 0x2ab   : > { %v1329_v12 = vadd.f32 %v1328_v7, %v952_v11  ;;  %v1326_v0 = vpop.f32.mrb[1].mxu1 }
 0x2ac   : > { %v955_v13 = vpop.f32.mrb[2].mxu1 }
 0x2ad   : > { %v959_v15 = vmax.f32 %v1329_v12, 0.0  ;;  %v1327_v16 = vpop.f32.mrb[3].mxu1 }
 0x2af   : > { %v960_v14 = vpack.c.bf16 %v959_v15, %v959_v15 }
 0x2b1   : > { %961 = vst [vmem:[%s293_s9] sm:$0xf] %v960_v14 }
 0x2b2   : > { %1636 = shalt.err (!%p1633_p0)
}
 0x2b3   : > { %s1637_s22 = scalar_lea.hbm %s2049_s7, 64  ;;  %s1641_s27 = scalar_lea.hbm %s2098_s5, 128 }
 0x2b4   : > { %p1638_p2 = scmp.ne.s32.totalorder %s2049_s7, %s1637_s22  ;;  %p1642_p10 = scmp.lt.u32.totalorder %s2049_s7, %s2098_s5 }
 0x2b5   : > { %p1643_p11 = scmp.lt.u32.totalorder %s1641_s27, %s1637_s22  ;;  %p1645_p6 = scmp.lt.u32.totalorder %s1637_s22, %s2049_s7 }
 0x2b6   : > { %p1639_p8 = pnand %p1638_p2, %p2116_p5 }
 0x2b7   : > { %p1644_p1 = por %p1643_p11, %p1642_p10 }
 0x2b8   : > { %p1640_p4 = pneg %p1639_p8 }
 0x2b9   : > { %p1646_p7 = por %p1645_p6, %p1644_p1 }
 0x2bb   : > { %p1647_p9 = pnand %p1646_p7, %p1640_p4 }
 0x2bd   : > { %1650 = shalt.err (!%p1647_p9)
}
 0x2be   : > { %1360 = dma.vmem_to_hbm [thread:$0]  (%p2116_p5), %s2051_s26, 64, %s2049_s7, %s963_s8  }
 0x2bf PF: > { %s988_s25 = sand.u32 1, %s1685_s18   ;;  %p2117_p12 = scmp.ne.s32.totalorder %s2109_s12, 0 }
 0x2c0   : > { %p2118_p3 = scmp.ge.s32.totalorder %s1697_s21, 2  ;;  %s989_s9 = scalar_lea.sflag [#allocation5], %s988_s25 }
 0x2c2   : > { %p1380_p13 = pnand %p2118_p3, %p2117_p12 }
 0x2c4   : > { %1680 = dma.done.wait (!%p1380_p13), %s989_s9, 64  }
 0x2c5   : > { %1682 = vsyncadd (!%p1380_p13), %s989_s9, 4294967232  ;;  %p20_p0 = scmp.ge.s32.totalorder %s1880_s28, 4   ;;  %s2119_s18 = smov %s1689_s19 }
 0x2c6   : > { %s2120_s19 = smov %s1693_s20  ;;  %s2121_s20 = smov %s1891_s16 }
 0x2c7   : > { %s2122_s21 = smov %s1880_s28  ;;  %22 = sbr.rel (!%p20_p0) target bundleno = 7 (0x7), region = 105 }
 0x2ce   :  { %994 = vsyncpa [#allocation4], 1 }
 0x2cf   :  { %996 = vsyncpa [#allocation4 + $0x1], 1 }
 0x2d0   :  { %997 = vsyncpa [#allocation7], 1 }
 0x2d1   :  { %998 = vsyncpa [#allocation10], 1 }
 0x2d2   :  { %999 = vsyncpa [#allocation5], 1 }
 0x2d3   :  { %1001 = vsyncpa [#allocation5 + $0x1], 1 }

// kernel: _lambda_.7
= control target key start
LH: loop header
LB: loop body
LE: loop exit
PB: predicated region body
PF: predicated region fallthrough
CT: control target
= control target key end

     0   :  { %16 = vsyncpa [#allocation3], 0  ;;  %s3570_s0 = inlined_call_operand.hbm [shape: bf16[8,8,32], index: 0, kind: input, shape index: {}]   ;;  %s3571_s1 = inlined_call_operand.hbm [shape: bf16[32,128], index: 1, kind: input, shape index: {}]   ;;  %s3572_s2 = inlined_call_operand.hbm [shape: bf16[32,128], index: 2, kind: input, shape index: {}]   ;;  %s3573_s3 = inlined_call_operand.hbm [shape: f32[1,128], index: 3, kind: input, shape index: {}]   ;;  %s3574_s4 = inlined_call_operand.hbm [shape: f32[1,128], index: 4, kind: input, shape index: {}]   ;;  %s3575_s5 = inlined_call_operand.hbm [shape: bf16[32,128], index: 5, kind: input, shape index: {}]   ;;  %s3576_s6 = inlined_call_operand.hbm [shape: bf16[32,128], index: 6, kind: input, shape index: {}]   ;;  %s3577_s7 = inlined_call_operand.hbm [shape: f32[1,128], index: 7, kind: input, shape index: {}]   ;;  %s3578_s8 = inlined_call_operand.hbm [shape: f32[1,128], index: 8, kind: input, shape index: {}]   ;;  %s3579_s9 = inlined_call_operand.hbm [shape: f32[8,32], index: 9, kind: output, shape index: {0}]   ;;  %s3580_s10 = inlined_call_operand.hbm [shape: f32[8,32], index: 10, kind: output, shape index: {1}]  }
   0x1   :  { %17 = vsyncpa [#allocation6], 0 }
   0x2   :  { %18 = vsyncpa [#allocation9], 0 }
   0x3   :  { %19 = vsyncpa [#allocation12], 0 }
   0x4   :  { %20 = vsyncpa [#allocation15], 0 }
   0x5   :  { %21 = vsyncpa [#allocation4], 0 }
   0x6   :  { %22 = vsyncpa [#allocation19], 0  ;;  %s2929_s13 = smov [#allocation5]   ;;  %s2930_s15 = smov [#allocation8]  }
   0x7   :  { %s40_s14 = sshll.u32 %s2929_s13, 4  ;;  %s65_s16 = sshll.u32 %s2930_s15, 4  ;;  %s41_s14 = int_to_ptr.vmem [resolvable:$true] %s40_s14  ;;  %s3001_s16 = int_to_ptr.vmem [resolvable:$true] %s65_s16 }
   0x8   :  { %s2673_s19 = scalar_lea.hbm %s3571_s1, 256 }
   0x9   :  { %p2674_p0 = scmp.ne.s32.totalorder %s3571_s1, %s2673_s19  ;;  %p2677_p1 = scmp.lt.u32.totalorder %s2673_s19, %s3571_s1 }
   0xb   :  { %p2679_p2 = pnand %p2677_p1, %p2674_p0 }
   0xd   :  { %2682 = shalt.err (!%p2679_p2)
}
   0xe   :  { %s2683_s24 = scalar_lea.vmem %s41_s14, 256  ;;  %p2688_p4 = scmp.lt.s32.totalorder %s41_s14, %s41_s14 }
   0xf   :  { %p2684_p3 = scmp.ne.s32.totalorder %s41_s14, %s2683_s24  ;;  %p2689_p5 = scmp.lt.s32.totalorder %s2683_s24, %s2683_s24 }
  0x11   :  { %p2690_p6 = por %p2689_p5, %p2688_p4 }
  0x13   :  { %p2691_p7 = pnand %p2690_p6, %p2684_p3 }
  0x15   :  { %2694 = shalt.err (!%p2691_p7)
}
  0x16   :  { %s2931_s25 = smov 64   ;;  %s2932_s26 = smov 4  }
  0x17   :  { %46 = dma.hbm_to_vmem [thread:$0]  %s3571_s1, 256, %s41_s14, [#allocation6], %s2931_s25, %s2931_s25, %s2932_s26  }
  0x18   :  { %s2695_s11 = scalar_lea.hbm %s3573_s3, 16 }
  0x19   :  { %p2696_p8 = scmp.ne.s32.totalorder %s3573_s3, %s2695_s11  ;;  %p2699_p9 = scmp.lt.u32.totalorder %s2695_s11, %s3573_s3 }
  0x1b   :  { %p2701_p10 = pnand %p2699_p9, %p2696_p8 }
  0x1d   :  { %2704 = shalt.err (!%p2701_p10)
}
  0x1e   :  { %s2705_s18 = scalar_lea.vmem %s3001_s16, 16  ;;  %s2709_s1 = scalar_lea.vmem %s3001_s16, 32 }
  0x1f   :  { %p2706_p11 = scmp.ne.s32.totalorder %s3001_s16, %s2705_s18  ;;  %p2710_p12 = scmp.lt.s32.totalorder %s3001_s16, %s3001_s16 }
  0x20   :  { %p2711_p13 = scmp.lt.s32.totalorder %s2709_s1, %s2705_s18 }
  0x22   :  { %p2712_p0 = por %p2711_p13, %p2710_p12 }
  0x24   :  { %p2713_p1 = pnand %p2712_p0, %p2706_p11 }
  0x26   :  { %2716 = shalt.err (!%p2713_p1)
}
  0x27   :  { %68 = dma.hbm_to_vmem [thread:$0]  %s3573_s3, 16, %s3001_s16, [#allocation9]  }
  0x28   :  { %s2933_s20 = smov [#allocation11]   ;;  %s2934_s22 = smov [#allocation14]  }
  0x29   :  { %s84_s21 = sshll.u32 %s2933_s20, 4  ;;  %s109_s23 = sshll.u32 %s2934_s22, 4  ;;  %s85_s21 = int_to_ptr.vmem [resolvable:$true] %s84_s21  ;;  %s110_s23 = int_to_ptr.vmem [resolvable:$true] %s109_s23 }
  0x2a   :  { %s2717_s28 = scalar_lea.hbm %s3575_s5, 256 }
  0x2b   :  { %p2718_p2 = scmp.ne.s32.totalorder %s3575_s5, %s2717_s28  ;;  %p2721_p3 = scmp.lt.u32.totalorder %s2717_s28, %s3575_s5 }
  0x2d   :  { %p2723_p4 = pnand %p2721_p3, %p2718_p2 }
  0x2f   :  { %2726 = shalt.err (!%p2723_p4)
}
  0x30   :  { %s2727_s3 = scalar_lea.vmem %s85_s21, 256  ;;  %p2732_p6 = scmp.lt.s32.totalorder %s85_s21, %s85_s21 }
  0x31   :  { %p2728_p5 = scmp.ne.s32.totalorder %s85_s21, %s2727_s3  ;;  %p2733_p7 = scmp.lt.s32.totalorder %s2727_s3, %s2727_s3 }
  0x33   :  { %p2734_p8 = por %p2733_p7, %p2732_p6 }
  0x35   :  { %p2735_p9 = pnand %p2734_p8, %p2728_p5 }
  0x37   :  { %2738 = shalt.err (!%p2735_p9)
}
  0x38   :  { %90 = dma.hbm_to_vmem [thread:$0]  %s3575_s5, 256, %s85_s21, [#allocation12], %s2931_s25, %s2931_s25, %s2932_s26  }
  0x39   :  { %s2739_s18 = scalar_lea.hbm %s3577_s7, 16 }
  0x3a   :  { %p2740_p10 = scmp.ne.s32.totalorder %s3577_s7, %s2739_s18  ;;  %p2743_p11 = scmp.lt.u32.totalorder %s2739_s18, %s3577_s7 }
  0x3c   :  { %p2745_p12 = pnand %p2743_p11, %p2740_p10 }
  0x3e   :  { %2748 = shalt.err (!%p2745_p12)
}
  0x3f   :  { %s2749_s22 = scalar_lea.vmem %s110_s23, 16  ;;  %s2753_s24 = scalar_lea.vmem %s110_s23, 32 }
  0x40   :  { %p2750_p13 = scmp.ne.s32.totalorder %s110_s23, %s2749_s22  ;;  %p2754_p0 = scmp.lt.s32.totalorder %s110_s23, %s110_s23 }
  0x41   :  { %p2755_p1 = scmp.lt.s32.totalorder %s2753_s24, %s2749_s22 }
  0x43   :  { %p2756_p2 = por %p2755_p1, %p2754_p0 }
  0x45   :  { %p2757_p3 = pnand %p2756_p2, %p2750_p13 }
  0x47   :  { %2760 = shalt.err (!%p2757_p3)
}
  0x48   :  { %112 = dma.hbm_to_vmem [thread:$0]  %s3577_s7, 16, %s110_s23, [#allocation15]  }
  0x49   :  { %s2935_s27 = smov [#allocation2]   ;;  %s2936_s29 = smov [#allocation7]  }
  0x4a   :  { %s28_s28 = sshll.u32 %s2935_s27, 4  ;;  %s52_s30 = sshll.u32 %s2936_s29, 4  ;;  %s29_s28 = int_to_ptr.vmem [resolvable:$true] %s28_s28  ;;  %s3063_s30 = int_to_ptr.vmem [resolvable:$true] %s52_s30 }
  0x4b   :  { %s2761_s3 = scalar_lea.hbm %s3570_s0, 512 }
  0x4c   :  { %p2762_p4 = scmp.ne.s32.totalorder %s3570_s0, %s2761_s3  ;;  %p2765_p5 = scmp.lt.u32.totalorder %s2761_s3, %s3570_s0 }
  0x4e   :  { %p2767_p6 = pnand %p2765_p5, %p2762_p4 }
  0x50   :  { %2770 = shalt.err (!%p2767_p6)
}
  0x51   :  { %s2771_s7 = scalar_lea.vmem %s29_s28, 512  ;;  %p2776_p8 = scmp.lt.s32.totalorder %s29_s28, %s29_s28 }
  0x52   :  { %p2772_p7 = scmp.ne.s32.totalorder %s29_s28, %s2771_s7  ;;  %p2777_p9 = scmp.lt.s32.totalorder %s2771_s7, %s2771_s7 }
  0x54   :  { %p2778_p10 = por %p2777_p9, %p2776_p8 }
  0x56   :  { %p2779_p11 = pnand %p2778_p10, %p2772_p7 }
  0x58   :  { %2782 = shalt.err (!%p2779_p11)
}
  0x59   :  { %34 = dma.hbm_to_vmem [thread:$0]  %s3570_s0, 512, %s29_s28, [#allocation3], %s2931_s25, %s2931_s25, %s2932_s26  }
  0x5a   :  { %s2783_s19 = scalar_lea.hbm %s3572_s2, 256 }
  0x5b   :  { %p2784_p12 = scmp.ne.s32.totalorder %s3572_s2, %s2783_s19  ;;  %p2787_p13 = scmp.lt.u32.totalorder %s2783_s19, %s3572_s2 }
  0x5d   :  { %p2789_p0 = pnand %p2787_p13, %p2784_p12 }
  0x5f   :  { %2792 = shalt.err (!%p2789_p0)
}
  0x60   :  { %s2793_s21 = scalar_lea.vmem %s3063_s30, 256  ;;  %p2798_p2 = scmp.lt.s32.totalorder %s3063_s30, %s3063_s30 }
  0x61   :  { %p2794_p1 = scmp.ne.s32.totalorder %s3063_s30, %s2793_s21  ;;  %p2799_p3 = scmp.lt.s32.totalorder %s2793_s21, %s2793_s21 }
  0x63   :  { %p2800_p4 = por %p2799_p3, %p2798_p2 }
  0x65   :  { %p2801_p5 = pnand %p2800_p4, %p2794_p1 }
  0x67   :  { %2804 = shalt.err (!%p2801_p5)
}
  0x68   :  { %58 = dma.hbm_to_vmem [thread:$0]  %s3572_s2, 256, %s3063_s30, [#allocation6], %s2931_s25, %s2931_s25, %s2932_s26  }
  0x69   :  { %s2937_s28 = smov [#allocation10]   ;;  %s2938_s11 = smov [#allocation13]  }
  0x6a   :  { %s75_s29 = sshll.u32 %s2937_s28, 4  ;;  %s96_s12 = sshll.u32 %s2938_s11, 4  ;;  %s76_s29 = int_to_ptr.vmem [resolvable:$true] %s75_s29  ;;  %s3100_s12 = int_to_ptr.vmem [resolvable:$true] %s96_s12 }
  0x6b   :  { %s2805_s13 = scalar_lea.hbm %s3574_s4, 16 }
  0x6c   :  { %p2806_p6 = scmp.ne.s32.totalorder %s3574_s4, %s2805_s13  ;;  %p2809_p7 = scmp.lt.u32.totalorder %s2805_s13, %s3574_s4 }
  0x6e   :  { %p2811_p8 = pnand %p2809_p7, %p2806_p6 }
  0x70   :  { %2814 = shalt.err (!%p2811_p8)
}
  0x71   :  { %s2815_s2 = scalar_lea.vmem %s76_s29, 16  ;;  %s2819_s30 = scalar_lea.vmem %s76_s29, 32 }
  0x72   :  { %p2816_p9 = scmp.ne.s32.totalorder %s76_s29, %s2815_s2  ;;  %p2820_p10 = scmp.lt.s32.totalorder %s76_s29, %s76_s29 }
  0x73   :  { %p2821_p11 = scmp.lt.s32.totalorder %s2819_s30, %s2815_s2 }
  0x75   :  { %p2822_p12 = por %p2821_p11, %p2820_p10 }
  0x77   :  { %p2823_p13 = pnand %p2822_p12, %p2816_p9 }
  0x79   :  { %2826 = shalt.err (!%p2823_p13)
}
  0x7a   :  { %78 = dma.hbm_to_vmem [thread:$0]  %s3574_s4, 16, %s76_s29, [#allocation9]  }
  0x7b   :  { %s2827_s20 = scalar_lea.hbm %s3576_s6, 256 }
  0x7c   :  { %p2828_p0 = scmp.ne.s32.totalorder %s3576_s6, %s2827_s20  ;;  %p2831_p1 = scmp.lt.u32.totalorder %s2827_s20, %s3576_s6 }
  0x7e   :  { %p2833_p2 = pnand %p2831_p1, %p2828_p0 }
  0x80   :  { %2836 = shalt.err (!%p2833_p2)
}
  0x81   :  { %s2837_s0 = scalar_lea.vmem %s3100_s12, 256  ;;  %p2842_p4 = scmp.lt.s32.totalorder %s3100_s12, %s3100_s12 }
  0x82   :  { %p2838_p3 = scmp.ne.s32.totalorder %s3100_s12, %s2837_s0  ;;  %p2843_p5 = scmp.lt.s32.totalorder %s2837_s0, %s2837_s0 }
  0x84   :  { %p2844_p6 = por %p2843_p5, %p2842_p4 }
  0x86   :  { %p2845_p7 = pnand %p2844_p6, %p2838_p3 }
  0x88   :  { %2848 = shalt.err (!%p2845_p7)
}
  0x89   :  { %102 = dma.hbm_to_vmem [thread:$0]  %s3576_s6, 256, %s3100_s12, [#allocation12], %s2931_s25, %s2931_s25, %s2932_s26  }
  0x8a   :  { %s2939_s28 = smov [#allocation16]   ;;  %s2849_s16 = scalar_lea.hbm %s3578_s8, 16 }
  0x8b   :  { %s119_s29 = sshll.u32 %s2939_s28, 4  ;;  %p2850_p8 = scmp.ne.s32.totalorder %s3578_s8, %s2849_s16  ;;  %s120_s29 = int_to_ptr.vmem [resolvable:$true] %s119_s29 }
  0x8c   :  { %p2853_p9 = scmp.lt.u32.totalorder %s2849_s16, %s3578_s8 }
  0x8e   :  { %p2855_p10 = pnand %p2853_p9, %p2850_p8 }
  0x90   :  { %2858 = shalt.err (!%p2855_p10)
}
  0x91   :  { %s2859_s23 = scalar_lea.vmem %s120_s29, 16  ;;  %s2863_s6 = scalar_lea.vmem %s120_s29, 32 }
  0x92   :  { %p2860_p11 = scmp.ne.s32.totalorder %s120_s29, %s2859_s23  ;;  %p2864_p12 = scmp.lt.s32.totalorder %s120_s29, %s120_s29 }
  0x93   :  { %p2865_p13 = scmp.lt.s32.totalorder %s2863_s6, %s2859_s23 }
  0x95   :  { %p2866_p0 = por %p2865_p13, %p2864_p12 }
  0x97   :  { %p2867_p1 = pnand %p2866_p0, %p2860_p11 }
  0x99   :  { %2870 = shalt.err (!%p2867_p1)
}
  0x9a   :  { %122 = dma.hbm_to_vmem [thread:$0]  %s3578_s8, 16, %s120_s29, [#allocation15]  }
  0x9b   :  { %2915 = dma.done.wait [#allocation3], 512  }
  0x9c   :  { %2916 = vsyncadd [#allocation3], 4294966784 }
  0x9d   :  { %2917 = dma.done.wait [#allocation6], 512  }
  0x9e   :  { %2918 = vsyncadd [#allocation6], 4294966784 }
  0x9f   :  { %2919 = dma.done.wait [#allocation9], 32  }
  0xa0   :  { %2920 = vsyncadd [#allocation9], 4294967264 }
  0xa1   :  { %2921 = dma.done.wait [#allocation12], 512  }
  0xa2   :  { %2922 = vsyncadd [#allocation12], 4294966784 }
  0xa3   :  { %2923 = dma.done.wait [#allocation15], 32  }
  0xa4   :  { %2924 = vsyncadd [#allocation15], 4294967264  ;;  %v2940_v0 = vmov 0.0   ;;  %vm2941_vm0 = vmmov 0   ;;  %v3152_v1 = vld [vmem:[#allocation5] sm:$0xff]   ;;  %v3154_v2 = vld [vmem:[#allocation7] sm:$0xff]  }
  0xa5   :  { %2284 = vmatprep.subr.bf16.mxu0 %v2940_v0  ;;  %2292 = vmatprep.subr.bf16.mxu1 %v2940_v0  ;;  %v3157_v3 = vld [vmem:[#allocation5 + $0x8] sm:$0xff]   ;;  %v3161_v4 = vld [vmem:[#allocation7 + $0x8] sm:$0xff]   ;;  %v151_v5 = vld [vmem:[#allocation2] sm:$0xf]  ;;  %vm175_vm1 = vcmask 261120   ;;  %v2942_v6 = vmov 0  }
  0xa6   :  { %2288 = vmatprep.mubr.msk.bf16.mxu0 %vm2941_vm0, %v2940_v0  ;;  %2296 = vmatprep.mubr.msk.bf16.mxu1 %vm2941_vm0, %v2940_v0  ;;  %v3182_v7 = vld [vmem:[#allocation10] ss:$0 sm:$0xff]  ;;  %v3186_v17 = vld [vmem:[#allocation8] ss:$0 sm:$0xff]  ;;  %v312_v28 = vld [vmem:[#allocation2 + $0x4] sm:$0xf] }
  0xa7   :  { %2285 = vmatpush3.bf16.msra.mxu0 %v3152_v1  ;;  %2293 = vmatpush3.bf16.msra.mxu1 %v3154_v2  ;;  %v3190_v29 = vld [vmem:[#allocation11] sm:$0xff]   ;;  %v3194_v30 = vld [vmem:[#allocation11 + $0x8] sm:$0xff]   ;;  %s2943_s8 = smov 96   ;;  %v3207_v42 = vld [vmem:[#allocation13] sm:$0xff]   ;;  %s2944_s2 = smov [#allocation17]  }
  0xa8   :  { %2286 = vmatprep.subr.bf16.mxu0 %v2940_v0  ;;  %2294 = vmatprep.subr.bf16.mxu1 %v2940_v0  ;;  %v3212_v44 = vld [vmem:[#allocation13 + $0x8] sm:$0xff]   ;;  %v3234_v54 = vld [vmem:[#allocation16] ss:$0 sm:$0xff]  ;;  %v3239_v62 = vld [vmem:[#allocation14] ss:$0 sm:$0xff]  ;;  %s2103_s30 = sshll.u32 %s2944_s2, 4  ;;  %s2104_s30 = int_to_ptr.vmem [resolvable:$true] %s2103_s30 }
  0xa9   :  { %s2871_s18 = scalar_lea.vmem %s2104_s30, 128  ;;  %p2876_p3 = scmp.lt.s32.totalorder %s2104_s30, %s2104_s30 }
  0xaa   :  { %p2872_p2 = scmp.ne.s32.totalorder %s2104_s30, %s2871_s18  ;;  %p2877_p4 = scmp.lt.s32.totalorder %s2871_s18, %s2871_s18 }
  0xab   :  { %2287 = vmatpush3.bf16.msra.mxu0 %v3157_v3  ;;  %2295 = vmatpush3.bf16.msra.mxu1 %v3161_v4 }
  0xac   :  { %2300 = vmatprep.subr.bf16.mxu0 %v2940_v0  ;;  %2308 = vmatprep.subr.bf16.mxu1 %v2940_v0  ;;  %p2878_p5 = por %p2877_p4, %p2876_p3 }
  0xae   :  { %2289 = vmatmul.mubr.msk.bf16.vlgmr.msra.gmra.mrb[0].mxu0 %vm175_vm1, %v151_v5  ;;  %2297 = vmatmul.mubr.bf16.vlgmr.msra.gmra.mrb[0].mxu1 %v2942_v6  ;;  %p2879_p6 = pnand %p2878_p5, %p2872_p2 }
  0xaf   :  { %2301 = vmatpush3.bf16.msra.mxu0 %v3152_v1  ;;  %2304 = vmatprep.mubr.msk.bf16.mxu0 %vm2941_vm0, %v2940_v0 }
  0xb0   :  { %2302 = vmatprep.subr.bf16.mxu0 %v2940_v0  ;;  %2309 = vmatpush3.bf16.msra.mxu1 %v3154_v2 }
  0xb1   :  { %2312 = vmatprep.mubr.msk.bf16.mxu1 %vm2941_vm0, %v2940_v0  ;;  %2310 = vmatprep.subr.bf16.mxu1 %v2940_v0 }
  0xb3   :  { %2303 = vmatpush3.bf16.msra.mxu0 %v3157_v3 }
  0xb4   :  { %2316 = vmatprep.subr.bf16.mxu0 %v2940_v0  ;;  %2311 = vmatpush3.bf16.msra.mxu1 %v3161_v4 }
  0xb5   :  { %2324 = vmatprep.subr.bf16.mxu1 %v2940_v0 }
  0xb6   :  { %2305 = vmatmul.mubr.msk.bf16.vlgmr.msra.gmra.mrb[4].mxu0 %vm175_vm1, %v312_v28 }
  0xb7   :  { %2317 = vmatpush3.bf16.msra.mxu0 %v3190_v29  ;;  %2320 = vmatprep.mubr.msk.bf16.mxu0 %vm2941_vm0, %v2940_v0 }
  0xb8   :  { %2318 = vmatprep.subr.bf16.mxu0 %v2940_v0 }
  0xbb   :  { %2319 = vmatpush3.bf16.msra.mxu0 %v3194_v30 }
  0xbc   :  { %2332 = vmatprep.subr.bf16.mxu0 %v2940_v0 }
 0x181   :  { %v213_v8 = vpop.f32.mrb[0].mxu0  ;;  %v279_v9 = vpop.f32.mrb[0].mxu1 }
 0x182   :  { %v2290_v10 = vpop.f32.mrb[1].mxu0  ;;  %v280_v11 = vadd.f32 %v3182_v7, %v279_v9  ;;  %v2298_v12 = vpop.f32.mrb[1].mxu1  ;;  %v214_v18 = vadd.f32 %v3186_v17, %v213_v8 }
 0x183   :  { %v216_v13 = vpop.f32.mrb[2].mxu0  ;;  %v282_v14 = vpop.f32.mrb[2].mxu1 }
 0x184   :  { %v2291_v15 = vpop.f32.mrb[3].mxu0  ;;  %293 = vrot.lane.b32.xlu0 %v280_v11, %s2931_s25  ;;  %v2299_v16 = vpop.f32.mrb[3].mxu1  ;;  %v285_v19 = vadd.f32 %v280_v11, %v214_v18 }
 0x186   :  { %v2137_v20 = vmul.f32 -1.442695, %v285_v19 }
 0x188   :  { %2565 = vpow2.f32 %v2137_v20 }
 0x189   :  { %v350_v38 = vpop.f32.mrb[4].mxu0 }
 0x18a   :  { %v2306_v39 = vpop.f32.mrb[5].mxu0  ;;  %v351_v60 = vadd.f32 %v3186_v17, %v350_v38 }
 0x18b   :  { %v353_v40 = vpop.f32.mrb[6].mxu0 }
 0x18c   :  { %v2307_v41 = vpop.f32.mrb[7].mxu0 }
 0x192   :  { %v2566_v21 = vpop.eup %2565 }
 0x193   :  { %v289_v22 = vadd.f32 1.0, %v2566_v21 }
 0x195   :  { %2567 = vrcp.f32 %v289_v22 }
 0x19f   :  { %v2568_v23 = vpop.eup %2567 }
 0x1a0   :  { %v303_v32 = vsub.f32 1.0, %v2568_v23  ;;  %v309_v34 = vmul.f32 0.0, %v2568_v23 }
 0x1f6   :  { %v294_v24 = vpop.permute.xlu0 %293 }
 0x1f7   :  { %v296_v25 = vmul.f32 %v2568_v23, %v294_v24 }
 0x1f9   :  { %298 = vrot.lane.b32.xlu0 %v296_v25, %s2931_s25  ;;  %v582_v25 = vld [vmem:[#allocation2 + $0x8] sm:$0xf] }
 0x26b   :  { %v299_v26 = vpop.permute.xlu0 %298 }
 0x26c   :  { %v301_v27 = vadd.f32 %v299_v26, %v214_v18 }
 0x26e   :  { %2569 = vtanh.f32 %v301_v27 }
 0x278   :  { %v2570_v31 = vpop.eup %2569 }
 0x279   :  { %305 = vrot.lane.b32.xlu1 %v2570_v31, %s2943_s8 }
 0x2eb   :  { %v306_v33 = vpop.permute.xlu1 %305 }
 0x2ec   :  { %v308_v35 = vmul.f32 %v306_v33, %v303_v32 }
 0x2ee   :  { %v3202_v36 = vadd.f32 %v309_v34, %v308_v35 }
 0x2f0   :  { %v356_v37 = vpack.c.bf16 %v3202_v36, %v3202_v36 }
 0x2f2   :  { %358 = vrot.lane.b32.xlu1 %v356_v37, %s2943_s8 }
 0x364   :  { %v359_v43 = vpop.permute.xlu1 %358 }
 0x365   :  { %2313 = vmatmul.mubr.msk.bf16.vlgmr.msra.gmra.mrb[4].mxu1 %vm175_vm1, %v359_v43  ;;  %2321 = vmatmul.mubr.msk.bf16.vlgmr.msra.gmra.mrb[8].mxu0 %vm175_vm1, %v359_v43 }
 0x366   :  { %2325 = vmatpush3.bf16.msra.mxu1 %v3207_v42  ;;  %2328 = vmatprep.mubr.msk.bf16.mxu1 %vm2941_vm0, %v2940_v0 }
 0x367   :  { %2326 = vmatprep.subr.bf16.mxu1 %v2940_v0  ;;  %2333 = vmatpush3.bf16.msra.mxu0 %v3152_v1 }
 0x368   :  { %2334 = vmatprep.subr.bf16.mxu0 %v2940_v0  ;;  %2336 = vmatprep.mubr.msk.bf16.mxu0 %vm2941_vm0, %v2940_v0 }
 0x36a   :  { %2327 = vmatpush3.bf16.msra.mxu1 %v3212_v44 }
 0x36b   :  { %2335 = vmatpush3.bf16.msra.mxu0 %v3157_v3  ;;  %2340 = vmatprep.subr.bf16.mxu1 %v2940_v0 }
 0x36c   :  { %2348 = vmatprep.subr.bf16.mxu0 %v2940_v0 }
 0x36d   :  { %2329 = vmatmul.mubr.bf16.vlgmr.msra.gmra.mrb[8].mxu1 %v2942_v6 }
 0x36e   :  { %2341 = vmatpush3.bf16.msra.mxu1 %v3154_v2  ;;  %2344 = vmatprep.mubr.msk.bf16.mxu1 %vm2941_vm0, %v2940_v0 }
 0x36f   :  { %2342 = vmatprep.subr.bf16.mxu1 %v2940_v0  ;;  %2337 = vmatmul.mubr.msk.bf16.vlgmr.msra.gmra.mrb[12].mxu0 %vm175_vm1, %v582_v25 }
 0x370   :  { %2349 = vmatpush3.bf16.msra.mxu0 %v3190_v29  ;;  %2352 = vmatprep.mubr.msk.bf16.mxu0 %vm2941_vm0, %v2940_v0 }
 0x371   :  { %2350 = vmatprep.subr.bf16.mxu0 %v2940_v0 }
 0x372   :  { %2343 = vmatpush3.bf16.msra.mxu1 %v3161_v4 }
 0x373   :  { %2356 = vmatprep.subr.bf16.mxu1 %v2940_v0 }
 0x374   :  { %2351 = vmatpush3.bf16.msra.mxu0 %v3194_v30 }
 0x375   :  { %2364 = vmatprep.subr.bf16.mxu0 %v2940_v0 }
 0x438   :  { %v397_v45 = vpop.f32.mrb[4].mxu1  ;;  %v486_v46 = vpop.f32.mrb[8].mxu0 }
 0x439   :  { %v398_v47 = vadd.f32 %v3182_v7, %v397_v45  ;;  %v2314_v48 = vpop.f32.mrb[5].mxu1  ;;  %v2322_v49 = vpop.f32.mrb[9].mxu0  ;;  %v487_v5 = vadd.f32 %v3239_v62, %v486_v46 }
 0x43a   :  { %v400_v50 = vpop.f32.mrb[6].mxu1  ;;  %v489_v51 = vpop.f32.mrb[10].mxu0 }
 0x43b   :  { %411 = vrot.lane.b32.xlu0 %v398_v47, %s2931_s25  ;;  %v2315_v52 = vpop.f32.mrb[7].mxu1  ;;  %v2323_v53 = vpop.f32.mrb[11].mxu0  ;;  %v403_v61 = vadd.f32 %v398_v47, %v351_v60 }
 0x43d   :  { %v2140_v63 = vmul.f32 -1.442695, %v403_v61 }
 0x43f   :  { %2571 = vpow2.f32 %v2140_v63 }
 0x440   :  { %v549_v55 = vpop.f32.mrb[8].mxu1 }
 0x441   :  { %v550_v56 = vadd.f32 %v3234_v54, %v549_v55  ;;  %v2330_v57 = vpop.f32.mrb[9].mxu1 }
 0x442   :  { %v552_v58 = vpop.f32.mrb[10].mxu1 }
 0x443   :  { %563 = vrot.lane.b32.xlu1 %v550_v56, %s2931_s25  ;;  %v2331_v59 = vpop.f32.mrb[11].mxu1  ;;  %v555_v6 = vadd.f32 %v550_v56, %v487_v5 }
 0x445   :  { %v2148_v8 = vmul.f32 -1.442695, %v555_v6 }
 0x447   :  { %2573 = vpow2.f32 %v2148_v8 }
 0x449   :  { %v2572_v9 = vpop.eup %2571 }
 0x44a   :  { %v407_v10 = vadd.f32 1.0, %v2572_v9 }
 0x44c   :  { %2575 = vrcp.f32 %v407_v10 }
 0x451   :  { %v2574_v11 = vpop.eup %2573 }
 0x452   :  { %v559_v12 = vadd.f32 1.0, %v2574_v11 }
 0x454   :  { %2577 = vrcp.f32 %v559_v12 }
 0x456   :  { %v2576_v13 = vpop.eup %2575 }
 0x457   :  { %v421_v27 = vsub.f32 1.0, %v2576_v13  ;;  %v427_v31 = vmul.f32 %v2576_v13, %v3202_v36  ;;  %v620_v36 = vpop.f32.mrb[12].mxu0 }
 0x458   :  { %v2338_v43 = vpop.f32.mrb[13].mxu0  ;;  %v621_v6 = vadd.f32 %v3186_v17, %v620_v36 }
 0x459   :  { %v623_v45 = vpop.f32.mrb[14].mxu0 }
 0x45a   :  { %v2339_v46 = vpop.f32.mrb[15].mxu0 }
 0x45e   :  { %v2578_v16 = vpop.eup %2577 }
 0x45f   :  { %v573_v35 = vsub.f32 1.0, %v2578_v16  ;;  %v579_v38 = vmul.f32 0.0, %v2578_v16 }
 0x4ad   :  { %v412_v14 = vpop.permute.xlu0 %411 }
 0x4ae   :  { %v414_v15 = vmul.f32 %v2576_v13, %v412_v14 }
 0x4b0   :  { %416 = vrot.lane.b32.xlu0 %v414_v15, %s2931_s25 }
 0x4b5   :  { %v564_v18 = vpop.permute.xlu1 %563 }
 0x4b6   :  { %v566_v19 = vmul.f32 %v2578_v16, %v564_v18 }
 0x4b8   :  { %568 = vrot.lane.b32.xlu1 %v566_v19, %s2931_s25 }
 0x522   :  { %v417_v20 = vpop.permute.xlu0 %416 }
 0x523   :  { %v419_v21 = vadd.f32 %v417_v20, %v351_v60 }
 0x525   :  { %2579 = vtanh.f32 %v419_v21 }
 0x52a   :  { %v569_v22 = vpop.permute.xlu1 %568 }
 0x52b   :  { %v571_v23 = vadd.f32 %v569_v22, %v487_v5 }
 0x52d   :  { %2581 = vtanh.f32 %v571_v23 }
 0x52f   :  { %v2580_v24 = vpop.eup %2579 }
 0x530   :  { %423 = vrot.lane.b32.xlu0 %v2580_v24, %s2943_s8 }
 0x537   :  { %v2582_v26 = vpop.eup %2581 }
 0x538   :  { %575 = vrot.lane.b32.xlu1 %v2582_v26, %s2943_s8 }
 0x5a2   :  { %v424_v28 = vpop.permute.xlu0 %423 }
 0x5a3   :  { %v426_v32 = vmul.f32 %v424_v28, %v421_v27 }
 0x5a5   :  { %v3254_v33 = vadd.f32 %v427_v31, %v426_v32  ;;  %v813_v31 = vld [vmem:[#allocation2 + $0xc] sm:$0xf] }
 0x5a7   :  { %v626_v34 = vpack.c.bf16 %v3254_v33, %v3254_v33 }
 0x5a9   :  { %628 = vrot.lane.b32.xlu0 %v626_v34, %s2943_s8 }
 0x5aa   :  { %v576_v37 = vpop.permute.xlu1 %575 }
 0x5ab   :  { %v578_v39 = vmul.f32 %v576_v37, %v573_v35 }
 0x5ad   :  { %v3259_v40 = vadd.f32 %v579_v38, %v578_v39 }
 0x5af   :  { %v739_v41 = vpack.c.bf16 %v3259_v40, %v3259_v40 }
 0x5b1   :  { %741 = vrot.lane.b32.xlu1 %v739_v41, %s2943_s8 }
 0x61b   :  { %v629_v47 = vpop.permute.xlu0 %628 }
 0x61c   :  { %2345 = vmatmul.mubr.msk.bf16.vlgmr.msra.gmra.mrb[12].mxu1 %vm175_vm1, %v629_v47  ;;  %2353 = vmatmul.mubr.msk.bf16.vlgmr.msra.gmra.mrb[16].mxu0 %vm175_vm1, %v629_v47 }
 0x61d   :  { %2357 = vmatpush3.bf16.msra.mxu1 %v3207_v42  ;;  %2360 = vmatprep.mubr.msk.bf16.mxu1 %vm2941_vm0, %v2940_v0 }
 0x61e   :  { %2358 = vmatprep.subr.bf16.mxu1 %v2940_v0  ;;  %2365 = vmatpush3.bf16.msra.mxu0 %v3152_v1 }
 0x61f   :  { %2366 = vmatprep.subr.bf16.mxu0 %v2940_v0  ;;  %2368 = vmatprep.mubr.msk.bf16.mxu0 %vm2941_vm0, %v2940_v0 }
 0x621   :  { %2359 = vmatpush3.bf16.msra.mxu1 %v3212_v44 }
 0x622   :  { %2367 = vmatpush3.bf16.msra.mxu0 %v3157_v3  ;;  %2372 = vmatprep.subr.bf16.mxu1 %v2940_v0 }
 0x623   :  { %v742_v48 = vpop.permute.xlu1 %741  ;;  %2380 = vmatprep.subr.bf16.mxu0 %v2940_v0 }
 0x624   :  { %2361 = vmatmul.mubr.msk.bf16.vlgmr.msra.gmra.mrb[16].mxu1 %vm175_vm1, %v742_v48 }
 0x625   :  { %2373 = vmatpush3.bf16.msra.mxu1 %v3154_v2  ;;  %2376 = vmatprep.mubr.msk.bf16.mxu1 %vm2941_vm0, %v2940_v0 }
 0x626   :  { %2374 = vmatprep.subr.bf16.mxu1 %v2940_v0  ;;  %2369 = vmatmul.mubr.msk.bf16.vlgmr.msra.gmra.mrb[20].mxu0 %vm175_vm1, %v813_v31 }
 0x627   :  { %2381 = vmatpush3.bf16.msra.mxu0 %v3190_v29  ;;  %2384 = vmatprep.mubr.msk.bf16.mxu0 %vm2941_vm0, %v2940_v0 }
 0x628   :  { %2382 = vmatprep.subr.bf16.mxu0 %v2940_v0 }
 0x629   :  { %2375 = vmatpush3.bf16.msra.mxu1 %v3161_v4 }
 0x62a   :  { %2388 = vmatprep.subr.bf16.mxu1 %v2940_v0 }
 0x62b   :  { %2383 = vmatpush3.bf16.msra.mxu0 %v3194_v30 }
 0x62c   :  { %2396 = vmatprep.subr.bf16.mxu0 %v2940_v0 }
 0x6ef   :  { %v667_v49 = vpop.f32.mrb[12].mxu1  ;;  %v733_v50 = vpop.f32.mrb[16].mxu0 }
 0x6f0   :  { %v668_v51 = vadd.f32 %v3182_v7, %v667_v49  ;;  %v2346_v52 = vpop.f32.mrb[13].mxu1  ;;  %v2354_v53 = vpop.f32.mrb[17].mxu0  ;;  %v734_v10 = vadd.f32 %v3239_v62, %v733_v50 }
 0x6f1   :  { %v670_v55 = vpop.f32.mrb[14].mxu1  ;;  %v736_v56 = vpop.f32.mrb[18].mxu0 }
 0x6f2   :  { %681 = vrot.lane.b32.xlu0 %v668_v51, %s2931_s25  ;;  %v2347_v57 = vpop.f32.mrb[15].mxu1  ;;  %v2355_v58 = vpop.f32.mrb[19].mxu0  ;;  %v673_v8 = vadd.f32 %v668_v51, %v621_v6 }
 0x6f4   :  { %v2151_v9 = vmul.f32 -1.442695, %v673_v8 }
 0x6f6   :  { %2583 = vpow2.f32 %v2151_v9 }
 0x6f7   :  { %v780_v59 = vpop.f32.mrb[16].mxu1 }
 0x6f8   :  { %v781_v60 = vadd.f32 %v3234_v54, %v780_v59  ;;  %v2362_v61 = vpop.f32.mrb[17].mxu1 }
 0x6f9   :  { %v783_v63 = vpop.f32.mrb[18].mxu1 }
 0x6fa   :  { %794 = vrot.lane.b32.xlu1 %v781_v60, %s2931_s25  ;;  %v2363_v5 = vpop.f32.mrb[19].mxu1  ;;  %v786_v11 = vadd.f32 %v781_v60, %v734_v10 }
 0x6fc   :  { %v2154_v12 = vmul.f32 -1.442695, %v786_v11 }
 0x6fe   :  { %2585 = vpow2.f32 %v2154_v12 }
 0x700   :  { %v2584_v13 = vpop.eup %2583 }
 0x701   :  { %v677_v14 = vadd.f32 1.0, %v2584_v13 }
 0x703   :  { %2587 = vrcp.f32 %v677_v14 }
 0x708   :  { %v2586_v15 = vpop.eup %2585 }
 0x709   :  { %v790_v16 = vadd.f32 1.0, %v2586_v15 }
 0x70b   :  { %2589 = vrcp.f32 %v790_v16 }
 0x70d   :  { %v2588_v18 = vpop.eup %2587 }
 0x70e   :  { %v691_v34 = vsub.f32 1.0, %v2588_v18  ;;  %v697_v37 = vmul.f32 %v2588_v18, %v3254_v33  ;;  %v851_v33 = vpop.f32.mrb[20].mxu0 }
 0x70f   :  { %v2370_v49 = vpop.f32.mrb[21].mxu0  ;;  %v852_v11 = vadd.f32 %v3186_v17, %v851_v33 }
 0x710   :  { %v854_v50 = vpop.f32.mrb[22].mxu0 }
 0x711   :  { %v2371_v51 = vpop.f32.mrb[23].mxu0 }
 0x715   :  { %v2590_v21 = vpop.eup %2589 }
 0x716   :  { %v804_v36 = vsub.f32 1.0, %v2590_v21  ;;  %v810_v45 = vmul.f32 %v2590_v21, %v3259_v40 }
 0x764   :  { %v682_v19 = vpop.permute.xlu0 %681 }
 0x765   :  { %v684_v20 = vmul.f32 %v2588_v18, %v682_v19 }
 0x767   :  { %686 = vrot.lane.b32.xlu0 %v684_v20, %s2931_s25 }
 0x76c   :  { %v795_v22 = vpop.permute.xlu1 %794 }
 0x76d   :  { %v797_v23 = vmul.f32 %v2590_v21, %v795_v22 }
 0x76f   :  { %799 = vrot.lane.b32.xlu1 %v797_v23, %s2931_s25 }
 0x7d9   :  { %v687_v24 = vpop.permute.xlu0 %686 }
 0x7da   :  { %v689_v25 = vadd.f32 %v687_v24, %v621_v6 }
 0x7dc   :  { %2591 = vtanh.f32 %v689_v25 }
 0x7e1   :  { %v800_v26 = vpop.permute.xlu1 %799 }
 0x7e2   :  { %v802_v27 = vadd.f32 %v800_v26, %v734_v10 }
 0x7e4   :  { %2593 = vtanh.f32 %v802_v27 }
 0x7e6   :  { %v2592_v28 = vpop.eup %2591 }
 0x7e7   :  { %693 = vrot.lane.b32.xlu0 %v2592_v28, %s2943_s8 }
 0x7ee   :  { %v2594_v32 = vpop.eup %2593 }
 0x7ef   :  { %806 = vrot.lane.b32.xlu1 %v2594_v32, %s2943_s8 }
 0x859   :  { %v694_v35 = vpop.permute.xlu0 %693 }
 0x85a   :  { %v696_v38 = vmul.f32 %v694_v35, %v691_v34 }
 0x85c   :  { %v3303_v39 = vadd.f32 %v697_v37, %v696_v38  ;;  %v1044_v37 = vld [vmem:[#allocation2 + $0x10] sm:$0xf] }
 0x85e   :  { %v857_v41 = vpack.c.bf16 %v3303_v39, %v3303_v39 }
 0x860   :  { %859 = vrot.lane.b32.xlu0 %v857_v41, %s2943_s8 }
 0x861   :  { %v807_v43 = vpop.permute.xlu1 %806 }
 0x862   :  { %v809_v46 = vmul.f32 %v807_v43, %v804_v36 }
 0x864   :  { %v3309_v47 = vadd.f32 %v810_v45, %v809_v46 }
 0x866   :  { %v970_v48 = vpack.c.bf16 %v3309_v47, %v3309_v47 }
 0x868   :  { %972 = vrot.lane.b32.xlu1 %v970_v48, %s2943_s8 }
 0x8d2   :  { %v860_v52 = vpop.permute.xlu0 %859 }
 0x8d3   :  { %2377 = vmatmul.mubr.msk.bf16.vlgmr.msra.gmra.mrb[20].mxu1 %vm175_vm1, %v860_v52  ;;  %2385 = vmatmul.mubr.msk.bf16.vlgmr.msra.gmra.mrb[24].mxu0 %vm175_vm1, %v860_v52 }
 0x8d4   :  { %2389 = vmatpush3.bf16.msra.mxu1 %v3207_v42  ;;  %2392 = vmatprep.mubr.msk.bf16.mxu1 %vm2941_vm0, %v2940_v0 }
 0x8d5   :  { %2390 = vmatprep.subr.bf16.mxu1 %v2940_v0  ;;  %2397 = vmatpush3.bf16.msra.mxu0 %v3152_v1 }
 0x8d6   :  { %2398 = vmatprep.subr.bf16.mxu0 %v2940_v0  ;;  %2400 = vmatprep.mubr.msk.bf16.mxu0 %vm2941_vm0, %v2940_v0 }
 0x8d8   :  { %2391 = vmatpush3.bf16.msra.mxu1 %v3212_v44 }
 0x8d9   :  { %2399 = vmatpush3.bf16.msra.mxu0 %v3157_v3  ;;  %2404 = vmatprep.subr.bf16.mxu1 %v2940_v0 }
 0x8da   :  { %v973_v40 = vpop.permute.xlu1 %972  ;;  %2412 = vmatprep.subr.bf16.mxu0 %v2940_v0 }
 0x8db   :  { %2393 = vmatmul.mubr.msk.bf16.vlgmr.msra.gmra.mrb[24].mxu1 %vm175_vm1, %v973_v40 }
 0x8dc   :  { %2405 = vmatpush3.bf16.msra.mxu1 %v3154_v2  ;;  %2408 = vmatprep.mubr.msk.bf16.mxu1 %vm2941_vm0, %v2940_v0 }
 0x8dd   :  { %2406 = vmatprep.subr.bf16.mxu1 %v2940_v0  ;;  %2401 = vmatmul.mubr.msk.bf16.vlgmr.msra.gmra.mrb[28].mxu0 %vm175_vm1, %v1044_v37 }
 0x8de   :  { %2413 = vmatpush3.bf16.msra.mxu0 %v3190_v29  ;;  %2416 = vmatprep.mubr.msk.bf16.mxu0 %vm2941_vm0, %v2940_v0 }
 0x8df   :  { %2414 = vmatprep.subr.bf16.mxu0 %v2940_v0 }
 0x8e0   :  { %2407 = vmatpush3.bf16.msra.mxu1 %v3161_v4 }
 0x8e1   :  { %2420 = vmatprep.subr.bf16.mxu1 %v2940_v0 }
 0x8e2   :  { %2415 = vmatpush3.bf16.msra.mxu0 %v3194_v30 }
 0x8e3   :  { %2428 = vmatprep.subr.bf16.mxu0 %v2940_v0 }
 0x9a6   :  { %v898_v53 = vpop.f32.mrb[20].mxu1  ;;  %v964_v55 = vpop.f32.mrb[24].mxu0 }
 0x9a7   :  { %v899_v56 = vadd.f32 %v3182_v7, %v898_v53  ;;  %v2378_v57 = vpop.f32.mrb[21].mxu1  ;;  %v2386_v58 = vpop.f32.mrb[25].mxu0  ;;  %v965_v14 = vadd.f32 %v3239_v62, %v964_v55 }
 0x9a8   :  { %v901_v59 = vpop.f32.mrb[22].mxu1  ;;  %v967_v60 = vpop.f32.mrb[26].mxu0 }
 0x9a9   :  { %912 = vrot.lane.b32.xlu0 %v899_v56, %s2931_s25  ;;  %v2379_v61 = vpop.f32.mrb[23].mxu1  ;;  %v2387_v63 = vpop.f32.mrb[27].mxu0  ;;  %v904_v12 = vadd.f32 %v899_v56, %v852_v11 }
 0x9ab   :  { %v2157_v13 = vmul.f32 -1.442695, %v904_v12 }
 0x9ad   :  { %2595 = vpow2.f32 %v2157_v13 }
 0x9ae   :  { %v1011_v5 = vpop.f32.mrb[24].mxu1 }
 0x9af   :  { %v1012_v6 = vadd.f32 %v3234_v54, %v1011_v5  ;;  %v2394_v8 = vpop.f32.mrb[25].mxu1 }
 0x9b0   :  { %v1014_v9 = vpop.f32.mrb[26].mxu1 }
 0x9b1   :  { %1025 = vrot.lane.b32.xlu1 %v1012_v6, %s2931_s25  ;;  %v2395_v10 = vpop.f32.mrb[27].mxu1  ;;  %v1017_v15 = vadd.f32 %v1012_v6, %v965_v14 }
 0x9b3   :  { %v2160_v16 = vmul.f32 -1.442695, %v1017_v15 }
 0x9b5   :  { %2597 = vpow2.f32 %v2160_v16 }
 0x9b7   :  { %v2596_v18 = vpop.eup %2595 }
 0x9b8   :  { %v908_v19 = vadd.f32 1.0, %v2596_v18 }
 0x9ba   :  { %2599 = vrcp.f32 %v908_v19 }
 0x9bf   :  { %v2598_v20 = vpop.eup %2597 }
 0x9c0   :  { %v1021_v21 = vadd.f32 1.0, %v2598_v20 }
 0x9c2   :  { %2601 = vrcp.f32 %v1021_v21 }
 0x9c4   :  { %v2600_v22 = vpop.eup %2599 }
 0x9c5   :  { %v922_v41 = vsub.f32 1.0, %v2600_v22  ;;  %v928_v43 = vmul.f32 %v2600_v22, %v3303_v39  ;;  %v1082_v39 = vpop.f32.mrb[28].mxu0 }
 0x9c6   :  { %v2402_v53 = vpop.f32.mrb[29].mxu0  ;;  %v1083_v15 = vadd.f32 %v3186_v17, %v1082_v39 }
 0x9c7   :  { %v1085_v55 = vpop.f32.mrb[30].mxu0 }
 0x9c8   :  { %v2403_v56 = vpop.f32.mrb[31].mxu0 }
 0x9cc   :  { %v2602_v25 = vpop.eup %2601 }
 0x9cd   :  { %v1035_v33 = vsub.f32 1.0, %v2602_v25  ;;  %v1041_v50 = vmul.f32 %v2602_v25, %v3309_v47 }
 0xa1b   :  { %v913_v23 = vpop.permute.xlu0 %912 }
 0xa1c   :  { %v915_v24 = vmul.f32 %v2600_v22, %v913_v23 }
 0xa1e   :  { %917 = vrot.lane.b32.xlu0 %v915_v24, %s2931_s25 }
 0xa23   :  { %v1026_v26 = vpop.permute.xlu1 %1025 }
 0xa24   :  { %v1028_v27 = vmul.f32 %v2602_v25, %v1026_v26 }
 0xa26   :  { %1030 = vrot.lane.b32.xlu1 %v1028_v27, %s2931_s25 }
 0xa90   :  { %v918_v28 = vpop.permute.xlu0 %917 }
 0xa91   :  { %v920_v31 = vadd.f32 %v918_v28, %v852_v11 }
 0xa93   :  { %2603 = vtanh.f32 %v920_v31 }
 0xa98   :  { %v1031_v32 = vpop.permute.xlu1 %1030 }
 0xa99   :  { %v1033_v34 = vadd.f32 %v1031_v32, %v965_v14 }
 0xa9b   :  { %2605 = vtanh.f32 %v1033_v34 }
 0xa9d   :  { %v2604_v35 = vpop.eup %2603 }
 0xa9e   :  { %924 = vrot.lane.b32.xlu0 %v2604_v35, %s2943_s8 }
 0xaa5   :  { %v2606_v38 = vpop.eup %2605 }
 0xaa6   :  { %1037 = vrot.lane.b32.xlu1 %v2606_v38, %s2943_s8 }
 0xb10   :  { %v925_v36 = vpop.permute.xlu0 %924 }
 0xb11   :  { %v927_v45 = vmul.f32 %v925_v36, %v922_v41 }
 0xb13   :  { %v3353_v46 = vadd.f32 %v928_v43, %v927_v45  ;;  %v1275_v43 = vld [vmem:[#allocation2 + $0x14] sm:$0xf] }
 0xb15   :  { %v1088_v48 = vpack.c.bf16 %v3353_v46, %v3353_v46 }
 0xb17   :  { %1090 = vrot.lane.b32.xlu0 %v1088_v48, %s2943_s8 }
 0xb18   :  { %v1038_v49 = vpop.permute.xlu1 %1037 }
 0xb19   :  { %v1040_v51 = vmul.f32 %v1038_v49, %v1035_v33 }
 0xb1b   :  { %v3359_v52 = vadd.f32 %v1041_v50, %v1040_v51 }
 0xb1d   :  { %v1201_v40 = vpack.c.bf16 %v3359_v52, %v3359_v52 }
 0xb1f   :  { %1203 = vrot.lane.b32.xlu1 %v1201_v40, %s2943_s8 }
 0xb89   :  { %v1091_v57 = vpop.permute.xlu0 %1090 }
 0xb8a   :  { %2409 = vmatmul.mubr.msk.bf16.vlgmr.msra.gmra.mrb[28].mxu1 %vm175_vm1, %v1091_v57  ;;  %2417 = vmatmul.mubr.msk.bf16.vlgmr.msra.gmra.mrb[32].mxu0 %vm175_vm1, %v1091_v57 }
 0xb8b   :  { %2421 = vmatpush3.bf16.msra.mxu1 %v3207_v42  ;;  %2424 = vmatprep.mubr.msk.bf16.mxu1 %vm2941_vm0, %v2940_v0 }
 0xb8c   :  { %2422 = vmatprep.subr.bf16.mxu1 %v2940_v0  ;;  %2429 = vmatpush3.bf16.msra.mxu0 %v3152_v1 }
 0xb8d   :  { %2430 = vmatprep.subr.bf16.mxu0 %v2940_v0  ;;  %2432 = vmatprep.mubr.msk.bf16.mxu0 %vm2941_vm0, %v2940_v0 }
 0xb8f   :  { %2423 = vmatpush3.bf16.msra.mxu1 %v3212_v44 }
 0xb90   :  { %2431 = vmatpush3.bf16.msra.mxu0 %v3157_v3  ;;  %2436 = vmatprep.subr.bf16.mxu1 %v2940_v0 }
 0xb91   :  { %v1204_v47 = vpop.permute.xlu1 %1203  ;;  %2444 = vmatprep.subr.bf16.mxu0 %v2940_v0 }
 0xb92   :  { %2425 = vmatmul.mubr.msk.bf16.vlgmr.msra.gmra.mrb[32].mxu1 %vm175_vm1, %v1204_v47 }
 0xb93   :  { %2437 = vmatpush3.bf16.msra.mxu1 %v3154_v2  ;;  %2440 = vmatprep.mubr.msk.bf16.mxu1 %vm2941_vm0, %v2940_v0 }
 0xb94   :  { %2438 = vmatprep.subr.bf16.mxu1 %v2940_v0  ;;  %2433 = vmatmul.mubr.msk.bf16.vlgmr.msra.gmra.mrb[36].mxu0 %vm175_vm1, %v1275_v43 }
 0xb95   :  { %2445 = vmatpush3.bf16.msra.mxu0 %v3190_v29  ;;  %2448 = vmatprep.mubr.msk.bf16.mxu0 %vm2941_vm0, %v2940_v0 }
 0xb96   :  { %2446 = vmatprep.subr.bf16.mxu0 %v2940_v0 }
 0xb97   :  { %2439 = vmatpush3.bf16.msra.mxu1 %v3161_v4 }
 0xb98   :  { %2452 = vmatprep.subr.bf16.mxu1 %v2940_v0 }
 0xb99   :  { %2447 = vmatpush3.bf16.msra.mxu0 %v3194_v30 }
 0xb9a   :  { %2460 = vmatprep.subr.bf16.mxu0 %v2940_v0 }
 0xc5d   :  { %v1129_v58 = vpop.f32.mrb[28].mxu1  ;;  %v1195_v59 = vpop.f32.mrb[32].mxu0 }
 0xc5e   :  { %v1130_v60 = vadd.f32 %v3182_v7, %v1129_v58  ;;  %v2410_v61 = vpop.f32.mrb[29].mxu1  ;;  %v2418_v63 = vpop.f32.mrb[33].mxu0  ;;  %v1196_v19 = vadd.f32 %v3239_v62, %v1195_v59 }
 0xc5f   :  { %v1132_v5 = vpop.f32.mrb[30].mxu1  ;;  %v1198_v6 = vpop.f32.mrb[34].mxu0 }
 0xc60   :  { %1143 = vrot.lane.b32.xlu0 %v1130_v60, %s2931_s25  ;;  %v2411_v8 = vpop.f32.mrb[31].mxu1  ;;  %v2419_v9 = vpop.f32.mrb[35].mxu0  ;;  %v1135_v16 = vadd.f32 %v1130_v60, %v1083_v15 }
 0xc62   :  { %v2163_v18 = vmul.f32 -1.442695, %v1135_v16 }
 0xc64   :  { %2607 = vpow2.f32 %v2163_v18 }
 0xc65   :  { %v1242_v10 = vpop.f32.mrb[32].mxu1 }
 0xc66   :  { %v1243_v11 = vadd.f32 %v3234_v54, %v1242_v10  ;;  %v2426_v12 = vpop.f32.mrb[33].mxu1 }
 0xc67   :  { %v1245_v13 = vpop.f32.mrb[34].mxu1 }
 0xc68   :  { %1256 = vrot.lane.b32.xlu1 %v1243_v11, %s2931_s25  ;;  %v2427_v14 = vpop.f32.mrb[35].mxu1  ;;  %v1248_v20 = vadd.f32 %v1243_v11, %v1196_v19 }
 0xc6a   :  { %v2166_v21 = vmul.f32 -1.442695, %v1248_v20 }
 0xc6c   :  { %2609 = vpow2.f32 %v2166_v21 }
 0xc6e   :  { %v2608_v22 = vpop.eup %2607 }
 0xc6f   :  { %v1139_v23 = vadd.f32 1.0, %v2608_v22 }
 0xc71   :  { %2611 = vrcp.f32 %v1139_v23 }
 0xc76   :  { %v2610_v24 = vpop.eup %2609 }
 0xc77   :  { %v1252_v25 = vadd.f32 1.0, %v2610_v24 }
 0xc79   :  { %2613 = vrcp.f32 %v1252_v25 }
 0xc7b   :  { %v2612_v26 = vpop.eup %2611 }
 0xc7c   :  { %v1153_v48 = vsub.f32 1.0, %v2612_v26  ;;  %v1159_v49 = vmul.f32 %v2612_v26, %v3353_v46  ;;  %v1313_v46 = vpop.f32.mrb[36].mxu0 }
 0xc7d   :  { %v2434_v58 = vpop.f32.mrb[37].mxu0 }
 0xc7e   :  { %v1316_v59 = vpop.f32.mrb[38].mxu0 }
 0xc7f   :  { %v2435_v60 = vpop.f32.mrb[39].mxu0  ;;  %v2662_v59 = vld [vmem:[#allocation5 + $0x8] sm:$0xff]  }
 0xc83   :  { %v2614_v31 = vpop.eup %2613 }
 0xc84   :  { %v1266_v39 = vsub.f32 1.0, %v2614_v31  ;;  %v1272_v55 = vmul.f32 %v2614_v31, %v3359_v52 }
 0xcd2   :  { %v1144_v27 = vpop.permute.xlu0 %1143 }
 0xcd3   :  { %v1146_v28 = vmul.f32 %v2612_v26, %v1144_v27 }
 0xcd5   :  { %1148 = vrot.lane.b32.xlu0 %v1146_v28, %s2931_s25 }
 0xcda   :  { %v1257_v32 = vpop.permute.xlu1 %1256 }
 0xcdb   :  { %v1259_v34 = vmul.f32 %v2614_v31, %v1257_v32 }
 0xcdd   :  { %1261 = vrot.lane.b32.xlu1 %v1259_v34, %s2931_s25 }
 0xd47   :  { %v1149_v35 = vpop.permute.xlu0 %1148 }
 0xd48   :  { %v1151_v37 = vadd.f32 %v1149_v35, %v1083_v15  ;;  %v1314_v15 = vadd.f32 %v3186_v17, %v1313_v46 }
 0xd4a   :  { %2615 = vtanh.f32 %v1151_v37 }
 0xd4f   :  { %v1262_v38 = vpop.permute.xlu1 %1261 }
 0xd50   :  { %v1264_v41 = vadd.f32 %v1262_v38, %v1196_v19 }
 0xd52   :  { %2617 = vtanh.f32 %v1264_v41  ;;  %v1506_v41 = vld [vmem:[#allocation2 + $0x18] sm:$0xf] }
 0xd54   :  { %v2616_v36 = vpop.eup %2615 }
 0xd55   :  { %1155 = vrot.lane.b32.xlu0 %v2616_v36, %s2943_s8 }
 0xd5c   :  { %v2618_v45 = vpop.eup %2617 }
 0xd5d   :  { %1268 = vrot.lane.b32.xlu1 %v2618_v45, %s2943_s8 }
 0xdc7   :  { %v1156_v33 = vpop.permute.xlu0 %1155 }
 0xdc8   :  { %v1158_v50 = vmul.f32 %v1156_v33, %v1153_v48 }
 0xdca   :  { %v3403_v51 = vadd.f32 %v1159_v49, %v1158_v50 }
 0xdcc   :  { %v1319_v40 = vpack.c.bf16 %v3403_v51, %v3403_v51 }
 0xdce   :  { %1321 = vrot.lane.b32.xlu0 %v1319_v40, %s2943_s8 }
 0xdcf   :  { %v1269_v53 = vpop.permute.xlu1 %1268 }
 0xdd0   :  { %v1271_v56 = vmul.f32 %v1269_v53, %v1266_v39 }
 0xdd2   :  { %v3409_v57 = vadd.f32 %v1272_v55, %v1271_v56 }
 0xdd4   :  { %v1432_v47 = vpack.c.bf16 %v3409_v57, %v3409_v57 }
 0xdd6   :  { %1434 = vrot.lane.b32.xlu1 %v1432_v47, %s2943_s8 }
 0xe40   :  { %v1322_v61 = vpop.permute.xlu0 %1321 }
 0xe41   :  { %2441 = vmatmul.mubr.msk.bf16.vlgmr.msra.gmra.mrb[36].mxu1 %vm175_vm1, %v1322_v61  ;;  %2449 = vmatmul.mubr.msk.bf16.vlgmr.msra.gmra.mrb[40].mxu0 %vm175_vm1, %v1322_v61  ;;  %v2664_v61 = vld [vmem:[#allocation7 + $0x8] sm:$0xff]  }
 0xe42   :  { %2453 = vmatpush3.bf16.msra.mxu1 %v3207_v42  ;;  %2456 = vmatprep.mubr.msk.bf16.mxu1 %vm2941_vm0, %v2940_v0 }
 0xe43   :  { %2454 = vmatprep.subr.bf16.mxu1 %v2940_v0  ;;  %2461 = vmatpush3.bf16.msra.mxu0 %v3152_v1 }
 0xe44   :  { %2462 = vmatprep.subr.bf16.mxu0 %v2940_v0  ;;  %2464 = vmatprep.mubr.msk.bf16.mxu0 %vm2941_vm0, %v2940_v0 }
 0xe46   :  { %2455 = vmatpush3.bf16.msra.mxu1 %v3212_v44 }
 0xe47   :  { %2463 = vmatpush3.bf16.msra.mxu0 %v3157_v3  ;;  %2468 = vmatprep.subr.bf16.mxu1 %v2940_v0 }
 0xe48   :  { %v1435_v52 = vpop.permute.xlu1 %1434  ;;  %2476 = vmatprep.subr.bf16.mxu0 %v2940_v0 }
 0xe49   :  { %2457 = vmatmul.mubr.msk.bf16.vlgmr.msra.gmra.mrb[40].mxu1 %vm175_vm1, %v1435_v52 }
 0xe4a   :  { %2469 = vmatpush3.bf16.msra.mxu1 %v3154_v2  ;;  %2472 = vmatprep.mubr.msk.bf16.mxu1 %vm2941_vm0, %v2940_v0 }
 0xe4b   :  { %2470 = vmatprep.subr.bf16.mxu1 %v2940_v0  ;;  %2465 = vmatmul.mubr.msk.bf16.vlgmr.msra.gmra.mrb[44].mxu0 %vm175_vm1, %v1506_v41 }
 0xe4c   :  { %2477 = vmatpush3.bf16.msra.mxu0 %v3190_v29  ;;  %2480 = vmatprep.mubr.msk.bf16.mxu0 %vm2941_vm0, %v2940_v0 }
 0xe4d   :  { %2478 = vmatprep.subr.bf16.mxu0 %v2940_v0 }
 0xe4e   :  { %2471 = vmatpush3.bf16.msra.mxu1 %v3161_v4 }
 0xe4f   :  { %2484 = vmatprep.subr.bf16.mxu1 %v2940_v0 }
 0xe50   :  { %2479 = vmatpush3.bf16.msra.mxu0 %v3194_v30 }
 0xe51   :  { %2492 = vmatprep.subr.bf16.mxu0 %v2940_v0 }
 0xf14   :  { %v1360_v1 = vpop.f32.mrb[36].mxu1  ;;  %v1426_v3 = vpop.f32.mrb[40].mxu0 }
 0xf15   :  { %v1361_v63 = vadd.f32 %v3182_v7, %v1360_v1  ;;  %v2442_v5 = vpop.f32.mrb[37].mxu1  ;;  %v2450_v6 = vpop.f32.mrb[41].mxu0  ;;  %v1427_v18 = vadd.f32 %v3239_v62, %v1426_v3  ;;  %v3481_v1 = vld [vmem:[#allocation10] ss:$0 sm:$0xff] }
 0xf16   :  { %v1363_v8 = vpop.f32.mrb[38].mxu1  ;;  %v1429_v9 = vpop.f32.mrb[42].mxu0 }
 0xf17   :  { %1374 = vrot.lane.b32.xlu0 %v1361_v63, %s2931_s25  ;;  %v2443_v2 = vpop.f32.mrb[39].mxu1  ;;  %v2451_v10 = vpop.f32.mrb[43].mxu0  ;;  %v1366_v16 = vadd.f32 %v1361_v63, %v1314_v15 }
 0xf19   :  { %v2169_v7 = vmul.f32 -1.442695, %v1366_v16 }
 0xf1b   :  { %2619 = vpow2.f32 %v2169_v7 }
 0xf1c   :  { %v1473_v11 = vpop.f32.mrb[40].mxu1 }
 0xf1d   :  { %v1474_v12 = vadd.f32 %v3234_v54, %v1473_v11  ;;  %v2458_v13 = vpop.f32.mrb[41].mxu1 }
 0xf1e   :  { %v1476_v14 = vpop.f32.mrb[42].mxu1 }
 0xf1f   :  { %1487 = vrot.lane.b32.xlu1 %v1474_v12, %s2931_s25  ;;  %v2459_v4 = vpop.f32.mrb[43].mxu1  ;;  %v1479_v19 = vadd.f32 %v1474_v12, %v1427_v18 }
 0xf20   :  { %v3487_v4 = vld [vmem:[#allocation8] ss:$0 sm:$0xff] }
 0xf21   :  { %v2172_v20 = vmul.f32 -1.442695, %v1479_v19 }
 0xf23   :  { %2621 = vpow2.f32 %v2172_v20 }
 0xf25   :  { %v2620_v21 = vpop.eup %2619 }
 0xf26   :  { %v1370_v22 = vadd.f32 1.0, %v2620_v21 }
 0xf28   :  { %2623 = vrcp.f32 %v1370_v22 }
 0xf2d   :  { %v2622_v23 = vpop.eup %2621 }
 0xf2e   :  { %v1483_v24 = vadd.f32 1.0, %v2622_v23 }
 0xf30   :  { %2625 = vrcp.f32 %v1483_v24 }
 0xf32   :  { %v2624_v25 = vpop.eup %2623 }
 0xf33   :  { %v1384_v43 = vsub.f32 1.0, %v2624_v25  ;;  %v1390_v48 = vmul.f32 %v2624_v25, %v3403_v51  ;;  %v1544_v51 = vpop.f32.mrb[44].mxu0 }
 0xf34   :  { %v2466_v56 = vpop.f32.mrb[45].mxu0 }
 0xf35   :  { %v1547_v47 = vpop.f32.mrb[46].mxu0 }
 0xf36   :  { %v2467_v46 = vpop.f32.mrb[47].mxu0 }
 0xf3a   :  { %v2626_v17 = vpop.eup %2625 }
 0xf3b   :  { %v1497_v50 = vsub.f32 1.0, %v2626_v17  ;;  %v1503_v30 = vmul.f32 %v2626_v17, %v3409_v57  ;;  %v2661_v57 = vld [vmem:[#allocation5] sm:$0xff]  }
 0xf89   :  { %v1375_v26 = vpop.permute.xlu0 %1374 }
 0xf8a   :  { %v1377_v27 = vmul.f32 %v2624_v25, %v1375_v26 }
 0xf8c   :  { %1379 = vrot.lane.b32.xlu0 %v1377_v27, %s2931_s25 }
 0xf91   :  { %v1488_v28 = vpop.permute.xlu1 %1487 }
 0xf92   :  { %v1490_v31 = vmul.f32 %v2626_v17, %v1488_v28 }
 0xf94   :  { %1492 = vrot.lane.b32.xlu1 %v1490_v31, %s2931_s25 }
 0xffe   :  { %v1380_v32 = vpop.permute.xlu0 %1379 }
 0xfff   :  { %v1382_v34 = vadd.f32 %v1380_v32, %v1314_v15  ;;  %v1545_v15 = vadd.f32 %v3487_v4, %v1544_v51 }
0x1001   :  { %2627 = vtanh.f32 %v1382_v34 }
0x1006   :  { %v1493_v35 = vpop.permute.xlu1 %1492 }
0x1007   :  { %v1495_v37 = vadd.f32 %v1493_v35, %v1427_v18 }
0x1009   :  { %2629 = vtanh.f32 %v1495_v37  ;;  %v1737_v37 = vld [vmem:[#allocation2 + $0x1c] sm:$0xf] }
0x100b   :  { %v2628_v38 = vpop.eup %2627 }
0x100c   :  { %1386 = vrot.lane.b32.xlu0 %v2628_v38, %s2943_s8  ;;  %v2667_v38 = vld [vmem:[#allocation11] sm:$0xff]  }
0x1013   :  { %v2630_v36 = vpop.eup %2629 }
0x1014   :  { %1499 = vrot.lane.b32.xlu1 %v2630_v36, %s2943_s8  ;;  %v2668_v36 = vld [vmem:[#allocation11 + $0x8] sm:$0xff]  }
0x107e   :  { %v1387_v45 = vpop.permute.xlu0 %1386 }
0x107f   :  { %v1389_v33 = vmul.f32 %v1387_v45, %v1384_v43 }
0x1081   :  { %v3453_v49 = vadd.f32 %v1390_v48, %v1389_v33 }
0x1083   :  { %v1550_v29 = vpack.c.bf16 %v3453_v49, %v3453_v49 }
0x1085   :  { %1552 = vrot.lane.b32.xlu0 %v1550_v29, %s2943_s8 }
0x1086   :  { %v1500_v40 = vpop.permute.xlu1 %1499 }
0x1087   :  { %v1502_v39 = vmul.f32 %v1500_v40, %v1497_v50 }
0x1089   :  { %v3459_v53 = vadd.f32 %v1503_v30, %v1502_v39 }
0x108b   :  { %v1663_v55 = vpack.c.bf16 %v3459_v53, %v3459_v53 }
0x108d   :  { %1665 = vrot.lane.b32.xlu1 %v1663_v55, %s2943_s8 }
0x10f7   :  { %v1553_v58 = vpop.permute.xlu0 %1552 }
0x10f8   :  { %2473 = vmatmul.mubr.msk.bf16.vlgmr.msra.gmra.mrb[44].mxu1 %vm175_vm1, %v1553_v58  ;;  %2481 = vmatmul.mubr.msk.bf16.vlgmr.msra.gmra.mrb[48].mxu0 %vm175_vm1, %v1553_v58 }
0x10f9   :  { %2485 = vmatpush3.bf16.msra.mxu1 %v3207_v42  ;;  %2488 = vmatprep.mubr.msk.bf16.mxu1 %vm2941_vm0, %v2940_v0  ;;  %v2663_v42 = vld [vmem:[#allocation7] sm:$0xff]  }
0x10fa   :  { %2486 = vmatprep.subr.bf16.mxu1 %v2940_v0  ;;  %2493 = vmatpush3.bf16.msra.mxu0 %v2661_v57 }
0x10fb   :  { %2494 = vmatprep.subr.bf16.mxu0 %v2940_v0  ;;  %2496 = vmatprep.mubr.msk.bf16.mxu0 %vm2941_vm0, %v2940_v0 }
0x10fd   :  { %2487 = vmatpush3.bf16.msra.mxu1 %v3212_v44 }
0x10fe   :  { %2495 = vmatpush3.bf16.msra.mxu0 %v2662_v59  ;;  %2500 = vmatprep.subr.bf16.mxu1 %v2940_v0  ;;  %v2669_v59 = vld [vmem:[#allocation13] sm:$0xff]  }
0x10ff   :  { %v1666_v60 = vpop.permute.xlu1 %1665  ;;  %2508 = vmatprep.subr.bf16.mxu0 %v2940_v0 }
0x1100   :  { %2489 = vmatmul.mubr.msk.bf16.vlgmr.msra.gmra.mrb[48].mxu1 %vm175_vm1, %v1666_v60 }
0x1101   :  { %2501 = vmatpush3.bf16.msra.mxu1 %v2663_v42  ;;  %2504 = vmatprep.mubr.msk.bf16.mxu1 %vm2941_vm0, %v2940_v0 }
0x1102   :  { %2502 = vmatprep.subr.bf16.mxu1 %v2940_v0  ;;  %2497 = vmatmul.mubr.msk.bf16.vlgmr.msra.gmra.mrb[52].mxu0 %vm175_vm1, %v1737_v37 }
0x1103   :  { %2509 = vmatpush3.bf16.msra.mxu0 %v2667_v38  ;;  %2512 = vmatprep.mubr.msk.bf16.mxu0 %vm2941_vm0, %v2940_v0 }
0x1104   :  { %2510 = vmatprep.subr.bf16.mxu0 %v2940_v0 }
0x1105   :  { %2503 = vmatpush3.bf16.msra.mxu1 %v2664_v61 }
0x1106   :  { %2516 = vmatprep.subr.bf16.mxu1 %v2940_v0 }
0x1107   :  { %2511 = vmatpush3.bf16.msra.mxu0 %v2668_v36 }
0x1108   :  { %2524 = vmatprep.subr.bf16.mxu0 %v2940_v0 }
0x11cb   :  { %v1591_v44 = vpop.f32.mrb[44].mxu1  ;;  %v1657_v52 = vpop.f32.mrb[48].mxu0 }
0x11cc   :  { %v1592_v3 = vadd.f32 %v3481_v1, %v1591_v44  ;;  %v2474_v63 = vpop.f32.mrb[45].mxu1  ;;  %v2482_v5 = vpop.f32.mrb[49].mxu0  ;;  %v1658_v18 = vadd.f32 %v3239_v62, %v1657_v52 }
0x11cd   :  { %v1594_v6 = vpop.f32.mrb[46].mxu1  ;;  %v1660_v8 = vpop.f32.mrb[50].mxu0 }
0x11ce   :  { %1605 = vrot.lane.b32.xlu0 %v1592_v3, %s2931_s25  ;;  %v2475_v9 = vpop.f32.mrb[47].mxu1  ;;  %v2483_v2 = vpop.f32.mrb[51].mxu0  ;;  %v1597_v16 = vadd.f32 %v1592_v3, %v1545_v15 }
0x11cf   :  { %v2671_v2 = vld [vmem:[#allocation16] ss:$0 sm:$0xff] }
0x11d0   :  { %v2175_v7 = vmul.f32 -1.442695, %v1597_v16 }
0x11d2   :  { %2631 = vpow2.f32 %v2175_v7 }
0x11d3   :  { %v1704_v10 = vpop.f32.mrb[48].mxu1 }
0x11d4   :  { %v1705_v11 = vadd.f32 %v3234_v54, %v1704_v10  ;;  %v2490_v12 = vpop.f32.mrb[49].mxu1 }
0x11d5   :  { %v1707_v13 = vpop.f32.mrb[50].mxu1 }
0x11d6   :  { %1718 = vrot.lane.b32.xlu1 %v1705_v11, %s2931_s25  ;;  %v2491_v14 = vpop.f32.mrb[51].mxu1  ;;  %v1710_v19 = vadd.f32 %v1705_v11, %v1658_v18 }
0x11d8   :  { %v2178_v20 = vmul.f32 -1.442695, %v1710_v19 }
0x11da   :  { %2633 = vpow2.f32 %v2178_v20 }
0x11dc   :  { %v2632_v21 = vpop.eup %2631 }
0x11dd   :  { %v1601_v22 = vadd.f32 1.0, %v2632_v21 }
0x11df   :  { %2635 = vrcp.f32 %v1601_v22 }
0x11e4   :  { %v2634_v54 = vpop.eup %2633 }
0x11e5   :  { %v1714_v23 = vadd.f32 1.0, %v2634_v54 }
0x11e7   :  { %2637 = vrcp.f32 %v1714_v23 }
0x11e9   :  { %v2636_v24 = vpop.eup %2635 }
0x11ea   :  { %v1615_v43 = vsub.f32 1.0, %v2636_v24  ;;  %v1621_v48 = vmul.f32 %v2636_v24, %v3453_v49  ;;  %v1775_v49 = vpop.f32.mrb[52].mxu0 }
0x11eb   :  { %v2498_v47 = vpop.f32.mrb[53].mxu0  ;;  %v1776_v13 = vadd.f32 %v3487_v4, %v1775_v49 }
0x11ec   :  { %v1778_v46 = vpop.f32.mrb[54].mxu0 }
0x11ed   :  { %v2499_v58 = vpop.f32.mrb[55].mxu0 }
0x11f1   :  { %v2638_v27 = vpop.eup %2637 }
0x11f2   :  { %v1728_v40 = vsub.f32 1.0, %v2638_v27  ;;  %v1734_v39 = vmul.f32 %v2638_v27, %v3459_v53  ;;  %v2670_v53 = vld [vmem:[#allocation13 + $0x8] sm:$0xff]  }
0x1240   :  { %v1606_v25 = vpop.permute.xlu0 %1605 }
0x1241   :  { %v1608_v26 = vmul.f32 %v2636_v24, %v1606_v25 }
0x1243   :  { %1610 = vrot.lane.b32.xlu0 %v1608_v26, %s2931_s25 }
0x1248   :  { %v1719_v17 = vpop.permute.xlu1 %1718 }
0x1249   :  { %v1721_v28 = vmul.f32 %v2638_v27, %v1719_v17 }
0x124b   :  { %1723 = vrot.lane.b32.xlu1 %v1721_v28, %s2931_s25 }
0x12b5   :  { %v1611_v62 = vpop.permute.xlu0 %1610 }
0x12b6   :  { %v1613_v31 = vadd.f32 %v1611_v62, %v1545_v15  ;;  %v2672_v15 = vld [vmem:[#allocation14] ss:$0 sm:$0xff] }
0x12b8   :  { %2639 = vtanh.f32 %v1613_v31 }
0x12bd   :  { %v1724_v32 = vpop.permute.xlu1 %1723 }
0x12be   :  { %v1726_v34 = vadd.f32 %v1724_v32, %v1658_v18 }
0x12c0   :  { %2641 = vtanh.f32 %v1726_v34 }
0x12c2   :  { %v2640_v35 = vpop.eup %2639 }
0x12c3   :  { %1617 = vrot.lane.b32.xlu0 %v2640_v35, %s2943_s8 }
0x12ca   :  { %v2642_v41 = vpop.eup %2641 }
0x12cb   :  { %1730 = vrot.lane.b32.xlu1 %v2642_v41, %s2943_s8 }
0x1335   :  { %v1618_v45 = vpop.permute.xlu0 %1617 }
0x1336   :  { %v1620_v33 = vmul.f32 %v1618_v45, %v1615_v43 }
0x1338   :  { %v3501_v29 = vadd.f32 %v1621_v48, %v1620_v33 }
0x133a   :  { %v1781_v50 = vpack.c.bf16 %v3501_v29, %v3501_v29 }
0x133c   :  { %1783 = vrot.lane.b32.xlu0 %v1781_v50, %s2943_s8 }
0x133d   :  { %v1731_v30 = vpop.permute.xlu1 %1730 }
0x133e   :  { %v1733_v55 = vmul.f32 %v1731_v30, %v1728_v40 }
0x1340   :  { %v3507_v51 = vadd.f32 %v1734_v39, %v1733_v55 }
0x1342   :  { %v1894_v56 = vpack.c.bf16 %v3507_v51, %v3507_v51 }
0x1344   :  { %1896 = vrot.lane.b32.xlu1 %v1894_v56, %s2943_s8 }
0x13ae   :  { %v1784_v57 = vpop.permute.xlu0 %1783 }
0x13af   :  { %2505 = vmatmul.mubr.msk.bf16.vlgmr.msra.gmra.mrb[52].mxu1 %vm175_vm1, %v1784_v57  ;;  %2513 = vmatmul.mubr.msk.bf16.vlgmr.msra.gmra.mrb[56].mxu0 %vm175_vm1, %v1784_v57 }
0x13b0   :  { %2517 = vmatpush3.bf16.msra.mxu1 %v2669_v59  ;;  %2520 = vmatprep.mubr.msk.bf16.mxu1 %vm2941_vm0, %v2940_v0 }
0x13b1   :  { %2518 = vmatprep.subr.bf16.mxu1 %v2940_v0  ;;  %2525 = vmatpush3.bf16.msra.mxu0 %v2667_v38 }
0x13b2   :  { %2526 = vmatprep.subr.bf16.mxu0 %v2940_v0  ;;  %2528 = vmatprep.mubr.msk.bf16.mxu0 %vm2941_vm0, %v2940_v0 }
0x13b4   :  { %2519 = vmatpush3.bf16.msra.mxu1 %v2670_v53 }
0x13b5   :  { %2527 = vmatpush3.bf16.msra.mxu0 %v2668_v36  ;;  %2532 = vmatprep.subr.bf16.mxu1 %v2940_v0 }
0x13b6   :  { %v1897_v60 = vpop.permute.xlu1 %1896 }
0x13b7   :  { %2521 = vmatmul.mubr.msk.bf16.vlgmr.msra.gmra.mrb[56].mxu1 %vm175_vm1, %v1897_v60 }
0x13b8   :  { %2533 = vmatpush3.bf16.msra.mxu1 %v2669_v59  ;;  %2536 = vmatprep.mubr.msk.bf16.mxu1 %vm2941_vm0, %v2940_v0 }
0x13b9   :  { %2534 = vmatprep.subr.bf16.mxu1 %v2940_v0 }
0x13bc   :  { %2535 = vmatpush3.bf16.msra.mxu1 %v2670_v53 }
0x1482   :  { %v1822_v42 = vpop.f32.mrb[52].mxu1  ;;  %v1888_v61 = vpop.f32.mrb[56].mxu0 }
0x1483   :  { %v1823_v44 = vadd.f32 %v3481_v1, %v1822_v42  ;;  %v2506_v52 = vpop.f32.mrb[53].mxu1  ;;  %v2514_v3 = vpop.f32.mrb[57].mxu0  ;;  %v1889_v16 = vadd.f32 %v2672_v15, %v1888_v61 }
0x1484   :  { %v1825_v63 = vpop.f32.mrb[54].mxu1  ;;  %v1891_v5 = vpop.f32.mrb[58].mxu0 }
0x1485   :  { %v2507_v6 = vpop.f32.mrb[55].mxu1  ;;  %1836 = vrot.lane.b32.xlu1 %v1823_v44, %s2931_s25  ;;  %v2515_v8 = vpop.f32.mrb[59].mxu0  ;;  %v1828_v14 = vadd.f32 %v1823_v44, %v1776_v13 }
0x1487   :  { %v2181_v1 = vmul.f32 -1.442695, %v1828_v14 }
0x1489   :  { %2643 = vpow2.f32 %v2181_v1 }
0x148a   :  { %v1935_v9 = vpop.f32.mrb[56].mxu1 }
0x148b   :  { %v1936_v10 = vadd.f32 %v2671_v2, %v1935_v9  ;;  %v2522_v11 = vpop.f32.mrb[57].mxu1 }
0x148c   :  { %v1938_v12 = vpop.f32.mrb[58].mxu1 }
0x148d   :  { %1949 = vrot.lane.b32.xlu0 %v1936_v10, %s2931_s25  ;;  %v2523_v0 = vpop.f32.mrb[59].mxu1  ;;  %v1941_v7 = vadd.f32 %v1936_v10, %v1889_v16 }
0x148f   :  { %v2184_v18 = vmul.f32 -1.442695, %v1941_v7 }
0x1491   :  { %2645 = vpow2.f32 %v2184_v18 }
0x1493   :  { %v2644_v19 = vpop.eup %2643 }
0x1494   :  { %v1832_v20 = vadd.f32 1.0, %v2644_v19 }
0x1496   :  { %2647 = vrcp.f32 %v1832_v20 }
0x149b   :  { %v2646_v21 = vpop.eup %2645 }
0x149c   :  { %v1945_v22 = vadd.f32 1.0, %v2646_v21 }
0x149e   :  { %2649 = vrcp.f32 %v1945_v22 }
0x14a0   :  { %v2648_v54 = vpop.eup %2647 }
0x14a1   :  { %v1846_v34 = vsub.f32 1.0, %v2648_v54  ;;  %v1852_v37 = vmul.f32 %v2648_v54, %v3501_v29 }
0x14a8   :  { %v2650_v4 = vpop.eup %2649 }
0x14a9   :  { %v1959_v43 = vsub.f32 1.0, %v2650_v4  ;;  %v1965_v48 = vmul.f32 %v2650_v4, %v3507_v51 }
0x14f7   :  { %v1837_v23 = vpop.permute.xlu1 %1836 }
0x14f8   :  { %v1839_v24 = vmul.f32 %v2648_v54, %v1837_v23 }
0x14fa   :  { %1841 = vrot.lane.b32.xlu1 %v1839_v24, %s2931_s25 }
0x14ff   :  { %v1950_v25 = vpop.permute.xlu0 %1949 }
0x1500   :  { %v1952_v26 = vmul.f32 %v2650_v4, %v1950_v25 }
0x1502   :  { %1954 = vrot.lane.b32.xlu0 %v1952_v26, %s2931_s25 }
0x156c   :  { %v1842_v27 = vpop.permute.xlu1 %1841 }
0x156d   :  { %v1844_v17 = vadd.f32 %v1842_v27, %v1776_v13 }
0x156f   :  { %2651 = vtanh.f32 %v1844_v17 }
0x1574   :  { %v1955_v28 = vpop.permute.xlu0 %1954 }
0x1575   :  { %v1957_v62 = vadd.f32 %v1955_v28, %v1889_v16 }
0x1577   :  { %2653 = vtanh.f32 %v1957_v62 }
0x1579   :  { %v2652_v31 = vpop.eup %2651 }
0x157a   :  { %1848 = vrot.lane.b32.xlu1 %v2652_v31, %s2943_s8 }
0x1581   :  { %v2654_v32 = vpop.eup %2653 }
0x1582   :  { %1961 = vrot.lane.b32.xlu0 %v2654_v32, %s2943_s8 }
0x15ec   :  { %v1849_v35 = vpop.permute.xlu1 %1848 }
0x15ed   :  { %v1851_v38 = vmul.f32 %v1849_v35, %v1846_v34 }
0x15ef   :  { %v1853_v41 = vadd.f32 %v1852_v37, %v1851_v38 }
0x15f1   :  { %v1967_v36 = vpack.c.bf16 %v1853_v41, %v1853_v41 }
0x15f3   :  { %1969 = vrot.lane.b32.xlu1 %v1967_v36, %s2943_s8 }
0x15f4   :  { %v1962_v45 = vpop.permute.xlu0 %1961 }
0x15f5   :  { %v1964_v33 = vmul.f32 %v1962_v45, %v1959_v43 }
0x15f7   :  { %v1966_v50 = vadd.f32 %v1965_v48, %v1964_v33 }
0x15f9   :  { %v2014_v40 = vpack.c.bf16 %v1966_v50, %v1966_v50 }
0x15fb   :  { %2016 = vrot.lane.b32.xlu0 %v2014_v40, %s2943_s8 }
0x1665   :  { %v1970_v30 = vpop.permute.xlu1 %1969 }
0x1666   :  { %2529 = vmatmul.mubr.msk.bf16.vlgmr.msra.gmra.mrb[60].mxu0 %vm175_vm1, %v1970_v30 }
0x166d   :  { %v2017_v39 = vpop.permute.xlu0 %2016 }
0x166e   :  { %2537 = vmatmul.mubr.msk.bf16.vlgmr.msra.gmra.mrb[60].mxu1 %vm175_vm1, %v2017_v39 }
0x1739   :  { %v2008_v29 = vpop.f32.mrb[60].mxu0 }
0x173a   :  { %v2530_v55 = vpop.f32.mrb[61].mxu0  ;;  %v2009_v59 = vadd.f32 %v2672_v15, %v2008_v29 }
0x173b   :  { %v2011_v56 = vpop.f32.mrb[62].mxu0 }
0x173c   :  { %v2531_v49 = vpop.f32.mrb[63].mxu0 }
0x1741   :  { %v2055_v47 = vpop.f32.mrb[60].mxu1 }
0x1742   :  { %v2056_v46 = vadd.f32 %v2671_v2, %v2055_v47  ;;  %v2538_v58 = vpop.f32.mrb[61].mxu1 }
0x1743   :  { %v2058_v57 = vpop.f32.mrb[62].mxu1 }
0x1744   :  { %2069 = vrot.lane.b32.xlu0 %v2056_v46, %s2931_s25  ;;  %v2539_v51 = vpop.f32.mrb[63].mxu1  ;;  %v2061_v53 = vadd.f32 %v2056_v46, %v2009_v59 }
0x1746   :  { %v2187_v60 = vmul.f32 -1.442695, %v2061_v53 }
0x1748   :  { %2655 = vpow2.f32 %v2187_v60 }
0x1752   :  { %v2656_v42 = vpop.eup %2655 }
0x1753   :  { %v2065_v61 = vadd.f32 1.0, %v2656_v42 }
0x1755   :  { %2657 = vrcp.f32 %v2065_v61 }
0x175f   :  { %v2658_v44 = vpop.eup %2657 }
0x17b6   :  { %v2070_v52 = vpop.permute.xlu0 %2069 }
0x17b7   :  { %v2072_v3 = vmul.f32 %v2658_v44, %v2070_v52 }
0x17b9   :  { %2074 = vrot.lane.b32.xlu1 %v2072_v3, %s2931_s25 }
0x17bd   :  { %2088 = vrot.lane.b32.xlu1 %v1853_v41, %s2943_s8 }
0x182b   :  { %v2075_v63 = vpop.permute.xlu1 %2074 }
0x182c   :  { %v2077_v5 = vadd.f32 %v2075_v63, %v2009_v59 }
0x182e   :  { %2659 = vtanh.f32 %v2077_v5 }
0x182f   :  { %v2089_v6 = vpop.permute.xlu1 %2088 }
0x1830   :  { %2091 = vst.msk [vmem:[#allocation17] sm:$0xff] %vm175_vm1, %v2089_v6 }
0x1838   :  { %v2660_v8 = vpop.eup %2659 }
0x1839   :  { %2081 = vrot.lane.b32.xlu0 %v2660_v8, %s2943_s8 }
0x183a   :  { %2882 = shalt.err (!%p2879_p6)
}
0x183b   :  { %s2883_s14 = scalar_lea.hbm %s3579_s9, 128 }
0x183c   :  { %p2884_p7 = scmp.ne.s32.totalorder %s3579_s9, %s2883_s14  ;;  %p2887_p8 = scmp.lt.u32.totalorder %s2883_s14, %s3579_s9 }
0x183e   :  { %p2889_p9 = pnand %p2887_p8, %p2884_p7 }
0x1840   :  { %2892 = shalt.err (!%p2889_p9)
}
0x1841   :  { %2106 = dma.vmem_to_hbm [thread:$0]  %s2104_s30, 128, %s3579_s9, [#allocation4]   ;;  %v2079_v9 = vsub.f32 1.0, %v2658_v44  ;;  %v2085_v10 = vmul.f32 %v2658_v44, %v1966_v50 }
0x1842   :  { %s2945_s0 = smov [#allocation18]  }
0x1843   :  { %s2113_s4 = sshll.u32 %s2945_s0, 4  ;;  %s2114_s4 = int_to_ptr.vmem [resolvable:$true] %s2113_s4 }
0x1844   :  { %s2893_s27 = scalar_lea.vmem %s2114_s4, 128  ;;  %p2898_p11 = scmp.lt.s32.totalorder %s2114_s4, %s2114_s4 }
0x1845   :  { %p2894_p10 = scmp.ne.s32.totalorder %s2114_s4, %s2893_s27  ;;  %p2899_p12 = scmp.lt.s32.totalorder %s2893_s27, %s2893_s27 }
0x1847   :  { %p2900_p13 = por %p2899_p12, %p2898_p11 }
0x1849   :  { %p2901_p0 = pnand %p2900_p13, %p2894_p10 }
0x18ab   :  { %v2082_v2 = vpop.permute.xlu0 %2081 }
0x18ac   :  { %v2084_v11 = vmul.f32 %v2082_v2, %v2079_v9 }
0x18ae   :  { %v2086_v12 = vadd.f32 %v2085_v10, %v2084_v11 }
0x18b0   :  { %2093 = vrot.lane.b32.xlu0 %v2086_v12, %s2943_s8 }
0x1922   :  { %v2094_v0 = vpop.permute.xlu0 %2093 }
0x1923   :  { %2096 = vst.msk [vmem:[#allocation18] sm:$0xff] %vm175_vm1, %v2094_v0 }
0x1924   :  { %2904 = shalt.err (!%p2901_p0)
}
0x1925   :  { %s2905_s29 = scalar_lea.hbm %s3580_s10, 128 }
0x1926   :  { %p2906_p1 = scmp.ne.s32.totalorder %s3580_s10, %s2905_s29  ;;  %p2909_p2 = scmp.lt.u32.totalorder %s2905_s29, %s3580_s10 }
0x1928   :  { %p2911_p3 = pnand %p2909_p2, %p2906_p1 }
0x192a   :  { %2914 = shalt.err (!%p2911_p3)
}
0x192b   :  { %2116 = dma.vmem_to_hbm [thread:$0]  %s2114_s4, 128, %s3580_s10, [#allocation19]  }
0x192c   :  { %2925 = dma.done.wait [#allocation4], 128  }
0x192d   :  { %2926 = vsyncadd [#allocation4], 4294967168 }
0x192e   :  { %2927 = dma.done.wait [#allocation19], 128  }
0x192f   :  { %2928 = vsyncadd [#allocation19], 4294967168 }
0x1930   :  { %2123 = vsyncpa [#allocation3], 1 }
0x1931   :  { %2124 = vsyncpa [#allocation6], 1 }
0x1932   :  { %2125 = vsyncpa [#allocation9], 1 }
0x1933   :  { %2126 = vsyncpa [#allocation12], 1 }
0x1934   :  { %2127 = vsyncpa [#allocation15], 1 }
0x1935   :  { %2128 = vsyncpa [#allocation4], 1 }
0x1936   :  { %2129 = vsyncpa [#allocation19], 1 }

</bundles_post_ra>
